<compile_context>
chip_gen: v7x
topology: tpu7x:2x2x1
jax: 0.10.0
libtpu: 0.0.40
codegen_flags: <defaults>
</compile_context>

<pallas_src>
import jax
import jax.numpy as jnp
from jax import lax
from jax.experimental import pallas as pl
from jax.experimental.pallas import tpu as pltpu

LANE = 128  # TPU lane width; channels are padded up to a multiple of this.


def _basic_block_kernel(x_ref, w1_ref, s1_ref, b1_ref, w2_ref, s2_ref, b2_ref,
                        o_ref, pad1_ref):
    # x_ref   : (1, TH+4, W+4, Cp) bf16  input strip (2-row/col halo, padded C),
    #                                    also provides the identity branch
    # w1_ref  : (9*Cp, Cp) bf16          conv1 taps fused along K (im2col order)
    # s1/b1   : (1, Cp) f32              folded BN1 scale / bias
    # w2_ref  : (9*Cp, Cp) bf16          conv2 taps fused along K
    # s2/b2   : (1, Cp) f32              folded BN2 scale / bias
    # o_ref   : (1, TH, W, Cp) f32       output strip
    # pad1_ref: (TH+2, W+2, Cp) bf16     VMEM scratch: zero-padded conv1 output
    _, TH, W, Cp = o_ref.shape
    s = pl.program_id(1)
    n_strips = pl.num_programs(1)

    # ---- conv1 (3x3, pad 1) over strip + 1-row halo: one K=9*Cp MXU matmul ----
    m1 = (TH + 2) * W
    patches1 = [
        x_ref[0, pl.ds(dy, TH + 2), pl.ds(1 + dx, W), :].reshape(m1, Cp)
        for dy in range(3) for dx in range(3)
    ]
    im1 = jnp.concatenate(patches1, axis=-1)                      # (m1, 9*Cp) bf16
    acc1 = jnp.dot(im1, w1_ref[...], preferred_element_type=jnp.float32)
    out1 = jnp.maximum(acc1 * s1_ref[0] + b1_ref[0], 0.0)         # BN1 + ReLU

    # Stage conv1 activation for conv2: interior written, zero border maintained.
    pad1_ref[pl.ds(0, TH + 2), pl.ds(1, W), :] = (
        out1.reshape(TH + 2, W, Cp).astype(pad1_ref.dtype))
    zcol = jnp.zeros((TH + 2, 1, Cp), pad1_ref.dtype)
    pad1_ref[pl.ds(0, TH + 2), pl.ds(0, 1), :] = zcol
    pad1_ref[pl.ds(0, TH + 2), pl.ds(W + 1, 1), :] = zcol

    zrow = jnp.zeros((1, W + 2, Cp), pad1_ref.dtype)

    @pl.when(s == 0)                    # top of image: conv2 sees zero padding
    def _():
        pad1_ref[pl.ds(0, 1), :, :] = zrow

    @pl.when(s == n_strips - 1)         # bottom of image: conv2 sees zero padding
    def _():
        pad1_ref[pl.ds(TH + 1, 1), :, :] = zrow

    # ---- conv2 (3x3, pad 1) + BN2 + residual add + ReLU ----
    m2 = TH * W
    patches2 = [
        pad1_ref[pl.ds(dy, TH), pl.ds(dx, W), :].reshape(m2, Cp)
        for dy in range(3) for dx in range(3)
    ]
    im2 = jnp.concatenate(patches2, axis=-1)                      # (m2, 9*Cp) bf16
    acc2 = jnp.dot(im2, w2_ref[...], preferred_element_type=jnp.float32)
    out2 = acc2 * s2_ref[0] + b2_ref[0]

    ident = x_ref[0, pl.ds(2, TH), pl.ds(2, W), :].reshape(m2, Cp)
    out2 = jnp.maximum(out2 + ident.astype(jnp.float32), 0.0)
    o_ref[0] = out2.reshape(TH, W, Cp).astype(o_ref.dtype)


def _fold_bn(gamma, beta, mean, var, eps=1e-5):
    scale = gamma / jnp.sqrt(var + eps)
    bias = beta - mean * scale
    return scale, bias


def _round_up(v, m):
    return (v + m - 1) // m * m


def _pick_tile_h(H, target=8):
    for th in range(min(target, H), 0, -1):
        if H % th == 0:
            return th
    return H


def basic_block_forward(x_nchw, params, *, tile_h=None):
    """x_nchw: (N, C, H, W) float32. Returns (N, C, H, W)."""
    N, C, H, W = x_nchw.shape
    Cp = _round_up(C, LANE)
    TH = _pick_tile_h(H) if tile_h is None else tile_h
    nS = H // TH

    # NCHW -> NHWC, spatial pad of 2 (conv1 halo + conv2 halo recompute),
    # channel pad to Cp, bf16 for MXU-native operands.
    x = jnp.transpose(x_nchw, (0, 2, 3, 1))
    xp = jnp.pad(x, ((0, 0), (2, 2), (2, 2), (0, Cp - C))).astype(jnp.bfloat16)
    # Overlapping H strips of TH+4 rows (stride TH), flattened to a 4-D array so
    # every BlockSpec is plain blocked indexing.
    strips = jnp.stack(
        [lax.slice_in_dim(xp, s * TH, s * TH + TH + 4, axis=1) for s in range(nS)],
        axis=1).reshape(N * nS, TH + 4, W + 4, Cp)

    def fused_taps(w):
        # torch (Cout, Cin, 3, 3) -> (ky, kx, Cin, Cout) -> zero-pad -> (9*Cp, Cp)
        t = jnp.transpose(w, (2, 3, 1, 0))
        t = jnp.pad(t, ((0, 0), (0, 0), (0, Cp - C), (0, Cp - C)))
        return t.reshape(9 * Cp, Cp).astype(jnp.bfloat16)

    w1f = fused_taps(params["w1"])
    w2f = fused_taps(params["w2"])

    def folded(gamma, beta, mean, var):
        sc, bi = _fold_bn(gamma, beta, mean, var)
        sc = jnp.pad(sc, (0, Cp - C)).reshape(1, Cp).astype(jnp.float32)
        bi = jnp.pad(bi, (0, Cp - C)).reshape(1, Cp).astype(jnp.float32)
        return sc, bi

    s1, b1 = folded(params["gamma1"], params["beta1"], params["mean1"], params["var1"])
    s2, b2 = folded(params["gamma2"], params["beta2"], params["mean2"], params["var2"])

    out_nhwc = pl.pallas_call(
        _basic_block_kernel,
        out_shape=jax.ShapeDtypeStruct((N, H, W, Cp), jnp.float32),
        grid_spec=pltpu.PrefetchScalarGridSpec(
            num_scalar_prefetch=0,
            grid=(N, nS),
            in_specs=[
                pl.BlockSpec((1, TH + 4, W + 4, Cp),
                             lambda n, s: (n * nS + s, 0, 0, 0)),
                pl.BlockSpec((9 * Cp, Cp), lambda n, s: (0, 0)),
                pl.BlockSpec((1, Cp), lambda n, s: (0, 0)),
                pl.BlockSpec((1, Cp), lambda n, s: (0, 0)),
                pl.BlockSpec((9 * Cp, Cp), lambda n, s: (0, 0)),
                pl.BlockSpec((1, Cp), lambda n, s: (0, 0)),
                pl.BlockSpec((1, Cp), lambda n, s: (0, 0)),
            ],
            out_specs=pl.BlockSpec((1, TH, W, Cp), lambda n, s: (n, s, 0, 0)),
            scratch_shapes=[pltpu.VMEM((TH + 2, W + 2, Cp), jnp.bfloat16)],
        ),
        compiler_params=pltpu.CompilerParams(
            dimension_semantics=("parallel", "parallel"),
            vmem_limit_bytes=32 * 1024 * 1024),
    )(strips, w1f, s1, b1, w2f, s2, b2)

    # Drop channel padding, NHWC -> NCHW.
    return jnp.transpose(out_nhwc[..., :C], (0, 3, 1, 2))


def basic_block_reference(x_nchw, params):
    """Pure-JAX f32 reference (NHWC conv via lax.conv_general_dilated)."""
    x = jnp.transpose(x_nchw, (0, 2, 3, 1)).astype(jnp.float32)
    w1 = jnp.transpose(params["w1"], (2, 3, 1, 0))  # HWIO
    w2 = jnp.transpose(params["w2"], (2, 3, 1, 0))
    s1, b1 = _fold_bn(params["gamma1"], params["beta1"], params["mean1"], params["var1"])
    s2, b2 = _fold_bn(params["gamma2"], params["beta2"], params["mean2"], params["var2"])
    dn = ("NHWC", "HWIO", "NHWC")
    y = lax.conv_general_dilated(x, w1, (1, 1), ((1, 1), (1, 1)), dimension_numbers=dn)
    y = jnp.maximum(y * s1 + b1, 0.0)
    y = lax.conv_general_dilated(y, w2, (1, 1), ((1, 1), (1, 1)), dimension_numbers=dn)
    y = y * s2 + b2 + x
    y = jnp.maximum(y, 0.0)
    return jnp.transpose(y, (0, 3, 1, 2))


def make_params(key, planes):
    ks = jax.random.split(key, 10)
    return {
        "w1": 0.1 * jax.random.normal(ks[0], (planes, planes, 3, 3), jnp.float32),
        "gamma1": 1.0 + 0.1 * jax.random.normal(ks[1], (planes,), jnp.float32),
        "beta1": 0.1 * jax.random.normal(ks[2], (planes,), jnp.float32),
        "mean1": 0.1 * jax.random.normal(ks[3], (planes,), jnp.float32),
        "var1": 0.5 + jnp.abs(jax.random.normal(ks[4], (planes,), jnp.float32)),
        "w2": 0.1 * jax.random.normal(ks[5], (planes, planes, 3, 3), jnp.float32),
        "gamma2": 1.0 + 0.1 * jax.random.normal(ks[6], (planes,), jnp.float32),
        "beta2": 0.1 * jax.random.normal(ks[7], (planes,), jnp.float32),
        "mean2": 0.1 * jax.random.normal(ks[8], (planes,), jnp.float32),
        "var2": 0.5 + jnp.abs(jax.random.normal(ks[9], (planes,), jnp.float32)),
    }


if __name__ == "__main__":
    key = jax.random.PRNGKey(0)
    k_x, k_p = jax.random.split(key)

    N, C, H, W = 2, 4, 16, 16   # inplanes == planes == 4, stride=1, downsample=None
    x = jax.random.normal(k_x, (N, C, H, W), jnp.float32)
    params = make_params(k_p, C)

    out = jax.block_until_ready(basic_block_forward(x, params))
    ref = jax.block_until_ready(basic_block_reference(x, params))

    assert out.shape == (N, C, H, W)
    # bf16 MXU operands -> relaxed tolerance vs the f32 reference.
    assert jnp.allclose(out, ref, rtol=3e-2, atol=3e-2), "mismatch vs JAX reference"

    print("KERNEL_OK")
</pallas_src>

<mosaic_0001>
module attributes {stable_mosaic.version = 11 : i64} {
  func.func @_basic_block_kernel(%arg0: i32, %arg1: i32, %arg2: memref<1x12x20x128xbf16, #tpu.memory_space<vmem>>, %arg3: memref<1152x128xbf16, #tpu.memory_space<vmem>>, %arg4: memref<1x128xf32, #tpu.memory_space<vmem>>, %arg5: memref<1x128xf32, #tpu.memory_space<vmem>>, %arg6: memref<1152x128xbf16, #tpu.memory_space<vmem>>, %arg7: memref<1x128xf32, #tpu.memory_space<vmem>>, %arg8: memref<1x128xf32, #tpu.memory_space<vmem>>, %arg9: memref<1x8x16x128xf32, #tpu.memory_space<vmem>>, %arg10: memref<10x18x128xbf16, #tpu.memory_space<vmem>>) attributes {dimension_semantics = [#tpu.dimension_semantics<parallel>, #tpu.dimension_semantics<parallel>], iteration_bounds = array<i64: 2, 2>, scalar_prefetch = 0 : i64, scratch_operands = 1 : i64, tpu.core_type = #tpu.core_type<tc>, window_params = [{transform_indices = @transform_0, window_bounds = array<i64: 1, 12, 20, 128>}, {pipeline_mode = #tpu.pipeline_mode<synchronous>, transform_indices = @transform_1, window_bounds = array<i64: 1152, 128>}, {pipeline_mode = #tpu.pipeline_mode<synchronous>, transform_indices = @transform_2, window_bounds = array<i64: 1, 128>}, {pipeline_mode = #tpu.pipeline_mode<synchronous>, transform_indices = @transform_3, window_bounds = array<i64: 1, 128>}, {pipeline_mode = #tpu.pipeline_mode<synchronous>, transform_indices = @transform_4, window_bounds = array<i64: 1152, 128>}, {pipeline_mode = #tpu.pipeline_mode<synchronous>, transform_indices = @transform_5, window_bounds = array<i64: 1, 128>}, {pipeline_mode = #tpu.pipeline_mode<synchronous>, transform_indices = @transform_6, window_bounds = array<i64: 1, 128>}, {transform_indices = @transform_7, window_bounds = array<i64: 1, 8, 16, 128>}]} {
    %c0 = arith.constant 0 : index
    %c0_0 = arith.constant 0 : index
    %c1 = arith.constant 1 : index
    %c0_1 = arith.constant 0 : index
    %0 = vector.load %arg2[%c0, %c0_0, %c1, %c0_1] : memref<1x12x20x128xbf16, #tpu.memory_space<vmem>>, vector<1x10x16x128xbf16>
    %1 = vector.shape_cast %0 : vector<1x10x16x128xbf16> to vector<10x16x128xbf16>
    %2 = vector.shape_cast %1 : vector<10x16x128xbf16> to vector<160x128xbf16>
    %c0_2 = arith.constant 0 : index
    %c0_3 = arith.constant 0 : index
    %c2 = arith.constant 2 : index
    %c0_4 = arith.constant 0 : index
    %3 = vector.load %arg2[%c0_2, %c0_3, %c2, %c0_4] : memref<1x12x20x128xbf16, #tpu.memory_space<vmem>>, vector<1x10x16x128xbf16>
    %4 = vector.shape_cast %3 : vector<1x10x16x128xbf16> to vector<10x16x128xbf16>
    %5 = vector.shape_cast %4 : vector<10x16x128xbf16> to vector<160x128xbf16>
    %c0_5 = arith.constant 0 : index
    %c0_6 = arith.constant 0 : index
    %c3 = arith.constant 3 : index
    %c0_7 = arith.constant 0 : index
    %6 = vector.load %arg2[%c0_5, %c0_6, %c3, %c0_7] : memref<1x12x20x128xbf16, #tpu.memory_space<vmem>>, vector<1x10x16x128xbf16>
    %7 = vector.shape_cast %6 : vector<1x10x16x128xbf16> to vector<10x16x128xbf16>
    %8 = vector.shape_cast %7 : vector<10x16x128xbf16> to vector<160x128xbf16>
    %c0_8 = arith.constant 0 : index
    %c1_9 = arith.constant 1 : index
    %c1_10 = arith.constant 1 : index
    %c0_11 = arith.constant 0 : index
    %9 = vector.load %arg2[%c0_8, %c1_9, %c1_10, %c0_11] : memref<1x12x20x128xbf16, #tpu.memory_space<vmem>>, vector<1x10x16x128xbf16>
    %10 = vector.shape_cast %9 : vector<1x10x16x128xbf16> to vector<10x16x128xbf16>
    %11 = vector.shape_cast %10 : vector<10x16x128xbf16> to vector<160x128xbf16>
    %c0_12 = arith.constant 0 : index
    %c1_13 = arith.constant 1 : index
    %c2_14 = arith.constant 2 : index
    %c0_15 = arith.constant 0 : index
    %12 = vector.load %arg2[%c0_12, %c1_13, %c2_14, %c0_15] : memref<1x12x20x128xbf16, #tpu.memory_space<vmem>>, vector<1x10x16x128xbf16>
    %13 = vector.shape_cast %12 : vector<1x10x16x128xbf16> to vector<10x16x128xbf16>
    %14 = vector.shape_cast %13 : vector<10x16x128xbf16> to vector<160x128xbf16>
    %c0_16 = arith.constant 0 : index
    %c1_17 = arith.constant 1 : index
    %c3_18 = arith.constant 3 : index
    %c0_19 = arith.constant 0 : index
    %15 = vector.load %arg2[%c0_16, %c1_17, %c3_18, %c0_19] : memref<1x12x20x128xbf16, #tpu.memory_space<vmem>>, vector<1x10x16x128xbf16>
    %16 = vector.shape_cast %15 : vector<1x10x16x128xbf16> to vector<10x16x128xbf16>
    %17 = vector.shape_cast %16 : vector<10x16x128xbf16> to vector<160x128xbf16>
    %c0_20 = arith.constant 0 : index
    %c2_21 = arith.constant 2 : index
    %c1_22 = arith.constant 1 : index
    %c0_23 = arith.constant 0 : index
    %18 = vector.load %arg2[%c0_20, %c2_21, %c1_22, %c0_23] : memref<1x12x20x128xbf16, #tpu.memory_space<vmem>>, vector<1x10x16x128xbf16>
    %19 = vector.shape_cast %18 : vector<1x10x16x128xbf16> to vector<10x16x128xbf16>
    %20 = vector.shape_cast %19 : vector<10x16x128xbf16> to vector<160x128xbf16>
    %c0_24 = arith.constant 0 : index
    %c2_25 = arith.constant 2 : index
    %c2_26 = arith.constant 2 : index
    %c0_27 = arith.constant 0 : index
    %21 = vector.load %arg2[%c0_24, %c2_25, %c2_26, %c0_27] : memref<1x12x20x128xbf16, #tpu.memory_space<vmem>>, vector<1x10x16x128xbf16>
    %22 = vector.shape_cast %21 : vector<1x10x16x128xbf16> to vector<10x16x128xbf16>
    %23 = vector.shape_cast %22 : vector<10x16x128xbf16> to vector<160x128xbf16>
    %c0_28 = arith.constant 0 : index
    %c2_29 = arith.constant 2 : index
    %c3_30 = arith.constant 3 : index
    %c0_31 = arith.constant 0 : index
    %24 = vector.load %arg2[%c0_28, %c2_29, %c3_30, %c0_31] : memref<1x12x20x128xbf16, #tpu.memory_space<vmem>>, vector<1x10x16x128xbf16>
    %25 = vector.shape_cast %24 : vector<1x10x16x128xbf16> to vector<10x16x128xbf16>
    %26 = vector.shape_cast %25 : vector<10x16x128xbf16> to vector<160x128xbf16>
    %27 = tpu.concatenate %2, %5, %8, %11, %14, %17, %20, %23, %26 in 1 : vector<160x128xbf16>, vector<160x128xbf16>, vector<160x128xbf16>, vector<160x128xbf16>, vector<160x128xbf16>, vector<160x128xbf16>, vector<160x128xbf16>, vector<160x128xbf16>, vector<160x128xbf16> -> vector<160x1152xbf16>
    %c0_32 = arith.constant 0 : index
    %c0_33 = arith.constant 0 : index
    %28 = vector.load %arg3[%c0_32, %c0_33] : memref<1152x128xbf16, #tpu.memory_space<vmem>>, vector<1152x128xbf16>
    %cst = arith.constant dense<0.000000e+00> : vector<160x128xf32>
    %29 = tpu.matmul %27, %28, %cst {dimension_numbers = #tpu.dot_dimension_numbers<[1], [0], [0], [1], [0, 0, 1, 1], [], []>} : vector<160x1152xbf16>, vector<1152x128xbf16>, vector<160x128xf32> -> vector<160x128xf32>
    %c0_34 = arith.constant 0 : index
    %c0_35 = arith.constant 0 : index
    %30 = vector.load %arg4[%c0_34, %c0_35] : memref<1x128xf32, #tpu.memory_space<vmem>>, vector<1x128xf32>
    %31 = vector.shape_cast %30 : vector<1x128xf32> to vector<128xf32>
    %32 = vector.shape_cast %31 : vector<128xf32> to vector<1x128xf32>
    %33 = vector.broadcast %32 : vector<1x128xf32> to vector<160x128xf32>
    %34 = arith.mulf %29, %33 : vector<160x128xf32>
    %c0_36 = arith.constant 0 : index
    %c0_37 = arith.constant 0 : index
    %35 = vector.load %arg5[%c0_36, %c0_37] : memref<1x128xf32, #tpu.memory_space<vmem>>, vector<1x128xf32>
    %36 = vector.shape_cast %35 : vector<1x128xf32> to vector<128xf32>
    %37 = vector.shape_cast %36 : vector<128xf32> to vector<1x128xf32>
    %38 = vector.broadcast %37 : vector<1x128xf32> to vector<160x128xf32>
    %39 = arith.addf %34, %38 : vector<160x128xf32>
    %cst_38 = arith.constant 0.000000e+00 : f32
    %40 = vector.broadcast %cst_38 : f32 to vector<160x128xf32>
    %41 = arith.maximumf %39, %40 : vector<160x128xf32>
    %42 = vector.shape_cast %41 : vector<160x128xf32> to vector<10x16x128xf32>
    %43 = arith.truncf %42 : vector<10x16x128xf32> to vector<10x16x128xbf16>
    %c0_39 = arith.constant 0 : index
    %c1_40 = arith.constant 1 : index
    %c0_41 = arith.constant 0 : index
    %44 = vector.load %arg10[%c0_39, %c1_40, %c0_41] : memref<10x18x128xbf16, #tpu.memory_space<vmem>>, vector<10x16x128xbf16>
    tpu.vector_store %arg10[%c0_39, %c1_40, %c0_41], %43 {strides = array<i32>} : memref<10x18x128xbf16, #tpu.memory_space<vmem>>, vector<10x16x128xbf16>,
    %cst_42 = arith.constant 0.000000e+00 : bf16
    %45 = vector.broadcast %cst_42 : bf16 to vector<10x1x128xbf16>
    %c0_43 = arith.constant 0 : index
    %c0_44 = arith.constant 0 : index
    %c0_45 = arith.constant 0 : index
    %46 = vector.load %arg10[%c0_43, %c0_44, %c0_45] : memref<10x18x128xbf16, #tpu.memory_space<vmem>>, vector<10x1x128xbf16>
    tpu.vector_store %arg10[%c0_43, %c0_44, %c0_45], %45 {strides = array<i32>} : memref<10x18x128xbf16, #tpu.memory_space<vmem>>, vector<10x1x128xbf16>,
    %c0_46 = arith.constant 0 : index
    %c17 = arith.constant 17 : index
    %c0_47 = arith.constant 0 : index
    %47 = vector.load %arg10[%c0_46, %c17, %c0_47] : memref<10x18x128xbf16, #tpu.memory_space<vmem>>, vector<10x1x128xbf16>
    tpu.vector_store %arg10[%c0_46, %c17, %c0_47], %45 {strides = array<i32>} : memref<10x18x128xbf16, #tpu.memory_space<vmem>>, vector<10x1x128xbf16>,
    %cst_48 = arith.constant 0.000000e+00 : bf16
    %48 = vector.broadcast %cst_48 : bf16 to vector<1x18x128xbf16>
    %c0_i32 = arith.constant 0 : i32
    %49 = arith.cmpi eq, %arg1, %c0_i32 : i32
    %50 = arith.extui %49 : i1 to i32
    %c0_i32_49 = arith.constant 0 : i32
    %51 = arith.cmpi ne, %50, %c0_i32_49 : i32
    scf.if %51 {
      %c0_94 = arith.constant 0 : index
      %c0_95 = arith.constant 0 : index
      %c0_96 = arith.constant 0 : index
      %97 = vector.load %arg10[%c0_94, %c0_95, %c0_96] : memref<10x18x128xbf16, #tpu.memory_space<vmem>>, vector<1x18x128xbf16>
      tpu.vector_store %arg10[%c0_94, %c0_95, %c0_96], %48 {strides = array<i32>} : memref<10x18x128xbf16, #tpu.memory_space<vmem>>, vector<1x18x128xbf16>,
    } else {
    }
    %c1_i32 = arith.constant 1 : i32
    %52 = arith.cmpi eq, %arg1, %c1_i32 : i32
    %53 = arith.extui %52 : i1 to i32
    %c0_i32_50 = arith.constant 0 : i32
    %54 = arith.cmpi ne, %53, %c0_i32_50 : i32
    scf.if %54 {
      %c9 = arith.constant 9 : index
      %c0_94 = arith.constant 0 : index
      %c0_95 = arith.constant 0 : index
      %97 = vector.load %arg10[%c9, %c0_94, %c0_95] : memref<10x18x128xbf16, #tpu.memory_space<vmem>>, vector<1x18x128xbf16>
      tpu.vector_store %arg10[%c9, %c0_94, %c0_95], %48 {strides = array<i32>} : memref<10x18x128xbf16, #tpu.memory_space<vmem>>, vector<1x18x128xbf16>,
    } else {
    }
    %c0_51 = arith.constant 0 : index
    %c0_52 = arith.constant 0 : index
    %c0_53 = arith.constant 0 : index
    %55 = vector.load %arg10[%c0_51, %c0_52, %c0_53] : memref<10x18x128xbf16, #tpu.memory_space<vmem>>, vector<8x16x128xbf16>
    %56 = vector.shape_cast %55 : vector<8x16x128xbf16> to vector<128x128xbf16>
    %c0_54 = arith.constant 0 : index
    %c1_55 = arith.constant 1 : index
    %c0_56 = arith.constant 0 : index
    %57 = vector.load %arg10[%c0_54, %c1_55, %c0_56] : memref<10x18x128xbf16, #tpu.memory_space<vmem>>, vector<8x16x128xbf16>
    %58 = vector.shape_cast %57 : vector<8x16x128xbf16> to vector<128x128xbf16>
    %c0_57 = arith.constant 0 : index
    %c2_58 = arith.constant 2 : index
    %c0_59 = arith.constant 0 : index
    %59 = vector.load %arg10[%c0_57, %c2_58, %c0_59] : memref<10x18x128xbf16, #tpu.memory_space<vmem>>, vector<8x16x128xbf16>
    %60 = vector.shape_cast %59 : vector<8x16x128xbf16> to vector<128x128xbf16>
    %c1_60 = arith.constant 1 : index
    %c0_61 = arith.constant 0 : index
    %c0_62 = arith.constant 0 : index
    %61 = vector.load %arg10[%c1_60, %c0_61, %c0_62] : memref<10x18x128xbf16, #tpu.memory_space<vmem>>, vector<8x16x128xbf16>
    %62 = vector.shape_cast %61 : vector<8x16x128xbf16> to vector<128x128xbf16>
    %c1_63 = arith.constant 1 : index
    %c1_64 = arith.constant 1 : index
    %c0_65 = arith.constant 0 : index
    %63 = vector.load %arg10[%c1_63, %c1_64, %c0_65] : memref<10x18x128xbf16, #tpu.memory_space<vmem>>, vector<8x16x128xbf16>
    %64 = vector.shape_cast %63 : vector<8x16x128xbf16> to vector<128x128xbf16>
    %c1_66 = arith.constant 1 : index
    %c2_67 = arith.constant 2 : index
    %c0_68 = arith.constant 0 : index
    %65 = vector.load %arg10[%c1_66, %c2_67, %c0_68] : memref<10x18x128xbf16, #tpu.memory_space<vmem>>, vector<8x16x128xbf16>
    %66 = vector.shape_cast %65 : vector<8x16x128xbf16> to vector<128x128xbf16>
    %c2_69 = arith.constant 2 : index
    %c0_70 = arith.constant 0 : index
    %c0_71 = arith.constant 0 : index
    %67 = vector.load %arg10[%c2_69, %c0_70, %c0_71] : memref<10x18x128xbf16, #tpu.memory_space<vmem>>, vector<8x16x128xbf16>
    %68 = vector.shape_cast %67 : vector<8x16x128xbf16> to vector<128x128xbf16>
    %c2_72 = arith.constant 2 : index
    %c1_73 = arith.constant 1 : index
    %c0_74 = arith.constant 0 : index
    %69 = vector.load %arg10[%c2_72, %c1_73, %c0_74] : memref<10x18x128xbf16, #tpu.memory_space<vmem>>, vector<8x16x128xbf16>
    %70 = vector.shape_cast %69 : vector<8x16x128xbf16> to vector<128x128xbf16>
    %c2_75 = arith.constant 2 : index
    %c2_76 = arith.constant 2 : index
    %c0_77 = arith.constant 0 : index
    %71 = vector.load %arg10[%c2_75, %c2_76, %c0_77] : memref<10x18x128xbf16, #tpu.memory_space<vmem>>, vector<8x16x128xbf16>
    %72 = vector.shape_cast %71 : vector<8x16x128xbf16> to vector<128x128xbf16>
    %73 = tpu.concatenate %56, %58, %60, %62, %64, %66, %68, %70, %72 in 1 : vector<128x128xbf16>, vector<128x128xbf16>, vector<128x128xbf16>, vector<128x128xbf16>, vector<128x128xbf16>, vector<128x128xbf16>, vector<128x128xbf16>, vector<128x128xbf16>, vector<128x128xbf16> -> vector<128x1152xbf16>
    %c0_78 = arith.constant 0 : index
    %c0_79 = arith.constant 0 : index
    %74 = vector.load %arg6[%c0_78, %c0_79] : memref<1152x128xbf16, #tpu.memory_space<vmem>>, vector<1152x128xbf16>
    %cst_80 = arith.constant dense<0.000000e+00> : vector<128x128xf32>
    %75 = tpu.matmul %73, %74, %cst_80 {dimension_numbers = #tpu.dot_dimension_numbers<[1], [0], [0], [1], [0, 0, 1, 1], [], []>} : vector<128x1152xbf16>, vector<1152x128xbf16>, vector<128x128xf32> -> vector<128x128xf32>
    %c0_81 = arith.constant 0 : index
    %c0_82 = arith.constant 0 : index
    %76 = vector.load %arg7[%c0_81, %c0_82] : memref<1x128xf32, #tpu.memory_space<vmem>>, vector<1x128xf32>
    %77 = vector.shape_cast %76 : vector<1x128xf32> to vector<128xf32>
    %78 = vector.shape_cast %77 : vector<128xf32> to vector<1x128xf32>
    %79 = vector.broadcast %78 : vector<1x128xf32> to vector<128x128xf32>
    %80 = arith.mulf %75, %79 : vector<128x128xf32>
    %c0_83 = arith.constant 0 : index
    %c0_84 = arith.constant 0 : index
    %81 = vector.load %arg8[%c0_83, %c0_84] : memref<1x128xf32, #tpu.memory_space<vmem>>, vector<1x128xf32>
    %82 = vector.shape_cast %81 : vector<1x128xf32> to vector<128xf32>
    %83 = vector.shape_cast %82 : vector<128xf32> to vector<1x128xf32>
    %84 = vector.broadcast %83 : vector<1x128xf32> to vector<128x128xf32>
    %85 = arith.addf %80, %84 : vector<128x128xf32>
    %c0_85 = arith.constant 0 : index
    %c2_86 = arith.constant 2 : index
    %c2_87 = arith.constant 2 : index
    %c0_88 = arith.constant 0 : index
    %86 = vector.load %arg2[%c0_85, %c2_86, %c2_87, %c0_88] : memref<1x12x20x128xbf16, #tpu.memory_space<vmem>>, vector<1x8x16x128xbf16>
    %87 = vector.shape_cast %86 : vector<1x8x16x128xbf16> to vector<8x16x128xbf16>
    %88 = vector.shape_cast %87 : vector<8x16x128xbf16> to vector<128x128xbf16>
    %89 = arith.extf %88 : vector<128x128xbf16> to vector<128x128xf32>
    %90 = arith.addf %85, %89 : vector<128x128xf32>
    %cst_89 = arith.constant 0.000000e+00 : f32
    %91 = vector.broadcast %cst_89 : f32 to vector<128x128xf32>
    %92 = arith.maximumf %90, %91 : vector<128x128xf32>
    %93 = vector.shape_cast %92 : vector<128x128xf32> to vector<8x16x128xf32>
    %c0_90 = arith.constant 0 : index
    %c0_91 = arith.constant 0 : index
    %c0_92 = arith.constant 0 : index
    %c0_93 = arith.constant 0 : index
    %94 = vector.load %arg9[%c0_90, %c0_91, %c0_92, %c0_93] : memref<1x8x16x128xf32, #tpu.memory_space<vmem>>, vector<1x8x16x128xf32>
    %95 = vector.shape_cast %94 : vector<1x8x16x128xf32> to vector<8x16x128xf32>
    %96 = vector.shape_cast %93 : vector<8x16x128xf32> to vector<1x8x16x128xf32>
    tpu.vector_store %arg9[%c0_90, %c0_91, %c0_92, %c0_93], %96 {strides = array<i32>} : memref<1x8x16x128xf32, #tpu.memory_space<vmem>>, vector<1x8x16x128xf32>,
    return
  }
  func.func @transform_0(%arg0: i32, %arg1: i32) -> (i32, i32, i32, i32) {
    %c2_i32 = arith.constant 2 : i32
    %0 = arith.muli %arg0, %c2_i32 : i32
    %1 = arith.addi %0, %arg1 : i32
    %c0_i32 = arith.constant 0 : i32
    %c0_i32_0 = arith.constant 0 : i32
    %c0_i32_1 = arith.constant 0 : i32
    %c0_i32_2 = arith.constant 0 : i32
    return %1, %c0_i32, %c0_i32_0, %c0_i32_1 : i32, i32, i32, i32
  }
  func.func @transform_1(%arg0: i32, %arg1: i32) -> (i32, i32) {
    %c0_i32 = arith.constant 0 : i32
    %c0_i32_0 = arith.constant 0 : i32
    %c0_i32_1 = arith.constant 0 : i32
    return %c0_i32, %c0_i32_0 : i32, i32
  }
  func.func @transform_2(%arg0: i32, %arg1: i32) -> (i32, i32) {
    %c0_i32 = arith.constant 0 : i32
    %c0_i32_0 = arith.constant 0 : i32
    %c0_i32_1 = arith.constant 0 : i32
    return %c0_i32, %c0_i32_0 : i32, i32
  }
  func.func @transform_3(%arg0: i32, %arg1: i32) -> (i32, i32) {
    %c0_i32 = arith.constant 0 : i32
    %c0_i32_0 = arith.constant 0 : i32
    %c0_i32_1 = arith.constant 0 : i32
    return %c0_i32, %c0_i32_0 : i32, i32
  }
  func.func @transform_4(%arg0: i32, %arg1: i32) -> (i32, i32) {
    %c0_i32 = arith.constant 0 : i32
    %c0_i32_0 = arith.constant 0 : i32
    %c0_i32_1 = arith.constant 0 : i32
    return %c0_i32, %c0_i32_0 : i32, i32
  }
  func.func @transform_5(%arg0: i32, %arg1: i32) -> (i32, i32) {
    %c0_i32 = arith.constant 0 : i32
    %c0_i32_0 = arith.constant 0 : i32
    %c0_i32_1 = arith.constant 0 : i32
    return %c0_i32, %c0_i32_0 : i32, i32
  }
  func.func @transform_6(%arg0: i32, %arg1: i32) -> (i32, i32) {
    %c0_i32 = arith.constant 0 : i32
    %c0_i32_0 = arith.constant 0 : i32
    %c0_i32_1 = arith.constant 0 : i32
    return %c0_i32, %c0_i32_0 : i32, i32
  }
  func.func @transform_7(%arg0: i32, %arg1: i32) -> (i32, i32, i32, i32) {
    %c0_i32 = arith.constant 0 : i32
    %c0_i32_0 = arith.constant 0 : i32
    %c0_i32_1 = arith.constant 0 : i32
    return %arg0, %arg1, %c0_i32, %c0_i32_0 : i32, i32, i32, i32
  }
}

</mosaic_0001>

<bundles_post_ra>
// kernel: tpu_custom_call.1
= control target key start
LH: loop header
LB: loop body
LE: loop exit
PB: predicated region body
PF: predicated region fallthrough
CT: control target
= control target key end

     0   :  { %12 = vsyncpa [#allocation4], 0  ;;  %s11103_s0 = inlined_call_operand.vmem [shape: bf16[4,12,20,128], index: 0, kind: input, shape index: {}]   ;;  %s11104_s1 = inlined_call_operand.vmem [shape: bf16[1152,128], index: 1, kind: input, shape index: {}]   ;;  %s11105_s2 = inlined_call_operand.vmem [shape: f32[1,128], index: 2, kind: input, shape index: {}]   ;;  %s11106_s3 = inlined_call_operand.vmem [shape: f32[1,128], index: 3, kind: input, shape index: {}]   ;;  %s11107_s4 = inlined_call_operand.hbm [shape: bf16[1152,128], index: 4, kind: input, shape index: {}]   ;;  %s11108_s5 = inlined_call_operand.vmem [shape: f32[1,128], index: 5, kind: input, shape index: {}]   ;;  %s11109_s6 = inlined_call_operand.vmem [shape: f32[1,128], index: 6, kind: input, shape index: {}]   ;;  %s11110_s7 = inlined_call_operand.hbm [shape: f32[2,16,16,128], index: 7, kind: output, shape index: {}]  }
   0x1   :  { %13 = vsyncpa [#allocation5], 0 }
   0x2   :  { %15 = vsyncpa [#allocation5 + $0x1], 0  ;;  %s8477_s24 = smov 0   ;;  %s8479_s25 = smov 0  }
   0x3   :  { %s8481_s26 = smov 0   ;;  %s8483_s27 = smov 0  }
   0x4   :  { %s8485_s28 = smov 0   ;;  %s8487_s29 = smov 0  }
   0x5   :  { %s8489_s30 = smov 0   ;;  %s8491_s8 = smov 0  }
   0x6 LB: > { %s6804_s9 = sadd.s32 4294967295, %s8427_s8   ;;  %s6805_s10 = sadd.s32 4294967294, %s8427_s8   ;;  %s8427_s8 = sphi %s8491_s8, %s21_s8   ;;  %s8423_s30 = sphi %s8489_s30, %s11216_s30   ;;  %s8419_s29 = sphi %s8487_s29, %s11215_s29   ;;  %s8415_s28 = sphi %s8485_s28, %s11214_s28   ;;  %s8411_s27 = sphi %s8483_s27, %s11213_s27   ;;  %s8407_s26 = sphi %s8481_s26, %s11212_s26   ;;  %s8403_s25 = sphi %s8479_s25, %s11211_s25   ;;  %s8399_s24 = sphi %s8477_s24, %s11210_s24  }
   0x7   : > { %s30_s11 = sadd.s32 1, %s8419_s29  ;;  %s33_s12 = sadd.s32 1, %s8423_s30 }
   0x8   : > { %p31_p0 = scmp.ge.s32.totalorder %s30_s11, 2  ;;  %s198_s13 = sadd.s32 1, %s8407_s26 }
   0x9   : > { %p208_p1 = scmp.ne.s32.totalorder %s8407_s26, %s8403_s25  ;;  %p209_p2 = scmp.eq.s32.totalorder %s6804_s9, 3 }
   0xa   : > { %s11218_s11 = smov (%p31_p0, %s30_s11), 0  ;;  %s11220_s12 = smov (!%p31_p0, %s33_s12), %s8423_s30 }
   0xb   : > { %11140 = sst [smem:[#allocation9_spill]] %s11218_s11  ;;  %s194_s14 = ssub.s32 %s8419_s29, %s11218_s11 }
   0xc   : > { %p8529_p3 = por %p209_p2, %p208_p1  ;;  %p35_p4 = scmp.ge.s32.totalorder %s11220_s12, 2 }
   0xd   : > { %p214_p5 = scmp.ne.s32.totalorder %s8403_s25, %s8399_s24  ;;  %p215_p6 = scmp.eq.s32.totalorder %s6805_s10, 3 }
   0xe   : > { %s11141_s15 = scalar_select %p8529_p3, 1, 0 }
   0xf   : > { %p6808_p7 = scmp.ge.s32.totalorder %s8427_s8, 1  ;;  %s11222_s12 = smov (%p35_p4, %s11220_s12), 0 }
  0x10   : > { %11142 = sst [smem:[#allocation10_spill]] %s11222_s12  ;;  %p8538_p8 = por %p215_p6, %p214_p5 }
  0x11   : > { %p222_p9 = scmp.lt.s32.totalorder %s8427_s8, 5  ;;  %s193_s17 = ssub.s32 %s8423_s30, %s11222_s12 }
  0x12   : > { %s11143_s16 = scalar_select %p8538_p8, 1, 0 }
  0x13   : > { %s195_s18 = sor.u32 %s194_s14, %s193_s17  ;;  %p8545_p10 = pnand %p6808_p7, %p222_p9 }
  0x14   : > { %p196_p11 = scmp.eq.s32.totalorder %s195_s18, 0  ;;  %p8549_p12 = scmp.eq.s32.totalorder %s6804_s9, 0 }
  0x15   : > { %s11144_s19 = scalar_select %p8545_p10, 1, 0 }
  0x16   : > { %s11145_s20 = scalar_select %p8549_p12, 1, 0 }
  0x17   : > { %p8031_p13 = pneg %p8545_p10  ;;  %s8429_s22 = smov [#allocation3]  }
  0x18   : > { %s8556_s21 = scalar_select %p196_p11, %s8407_s26, %s198_s13  }
  0x19   : > { %s243_s23 = sshll.u32 %s8429_s22, 4  ;;  %p8560_p0 = pnand %p8549_p12, %p8031_p13  ;;  %s244_s23 = int_to_ptr.vmem [resolvable:$true] %s243_s23 }
  0x1a   : > { %s8301_s9 = scalar_lea.hbm %s11107_s4, 9216 }
  0x1b   : > { %p8302_p1 = scmp.ne.s32.totalorder %s11107_s4, %s8301_s9  ;;  %p8303_p2 = pneg %p8560_p0 }
  0x1c   : > { %p8308_p6 = scmp.lt.u32.totalorder %s8301_s9, %s11107_s4 }
  0x1d   : > { %p8304_p4 = pnand %p8303_p2, %p8302_p1 }
  0x1f   : > { %p8305_p5 = pneg %p8304_p4 }
  0x21   : > { %p8310_p7 = pnand %p8308_p6, %p8305_p5 }
  0x23   : > { %8313 = shalt.err (!%p8310_p7)
}
  0x24   : > { %s8314_s11 = scalar_lea.vmem %s244_s23, 9216  ;;  %p8322_p8 = scmp.lt.s32.totalorder %s244_s23, %s244_s23 }
  0x25   : > { %p8315_p9 = scmp.ne.s32.totalorder %s244_s23, %s8314_s11  ;;  %p8323_p3 = scmp.lt.s32.totalorder %s8314_s11, %s8314_s11 }
  0x27   : > { %p8317_p11 = pnand %p8315_p9, %p8303_p2  ;;  %p8324_p12 = por %p8323_p3, %p8322_p8 }
  0x29   : > { %p8318_p13 = pneg %p8317_p11 }
  0x2b   : > { %p8325_p10 = pnand %p8324_p12, %p8318_p13 }
  0x2d   : > { %8328 = shalt.err (!%p8325_p10)
}
  0x2e   : > { %s8430_s12 = smov 64   ;;  %s8431_s14 = smov 4  }
  0x2f   : > { %8034 = dma.hbm_to_vmem [thread:$0]  (!%p8560_p0), %s11107_s4, 9216, %s244_s23, [#allocation4], %s8430_s12, %s8430_s12, %s8431_s14  }
  0x30   : > { %p11147_p1 = scmp.ne.s32.totalorder %s11144_s19, 0 }
  0x32   : > { %277 = sbr.rel (%p11147_p1) target bundleno = 1093 (0x445), region = 48 }
  0x39   : > { %p11148_p4 = scmp.ne.s32.totalorder %s11145_s20, 0 }
  0x3b   : > { %8390 = dma.done.wait (%p11148_p4), [#allocation4], 9216  }
  0x3c   : > { %8392 = vsyncadd (%p11148_p4), [#allocation4], 4294958080  ;;  %s11117_s11 = sand.u32 1, %s8403_s25   ;;  %v8113_v0 = vld [vmem:[%s11104_s1 + $0x40] sm:$0xff]   ;;  %v8117_v4 = vld [vmem:[%s11104_s1 + $0x48] sm:$0xff]   ;;  %s6814_s19 = sshll.u32 %s8415_s28, 1 }
  0x3d   : > { %s8589_s9 = sshll.u32 %s11117_s11, 7  ;;  %v8114_v1 = vld [vmem:[%s11104_s1 + $0xc0] sm:$0xff]   ;;  %7362 = vmatprep.subr.bf16.mxu0 %v8113_v0  ;;  %v8118_v5 = vld [vmem:[%s11104_s1 + $0xc8] sm:$0xff]   ;;  %v8121_v8 = vld [vmem:[%s11104_s1 + $0x50] sm:$0xff]   ;;  %s312_s13 = sadd.s32 %s8411_s27, %s6814_s19  ;;  %vm635_vm0 = vcmask 1042432   ;;  %vm636_vm3 = vcmask 1046532  }
  0x3e   : > { %v8115_v2 = vld [vmem:[%s11104_s1] sm:$0xff]   ;;  %7438 = vmatprep.subr.bf16.mxu1 %v8114_v1  ;;  %v8119_v6 = vld [vmem:[%s11104_s1 + $0x8] sm:$0xff]   ;;  %v8122_v9 = vld [vmem:[%s11104_s1 + $0xd0] sm:$0xff]   ;;  %p313_p3 = scmp.lt.s32.totalorder %s312_s13, 3  ;;  %vm352_vm1 = vsmask.f32 3328 }
  0x3f   : > { %v8116_v3 = vld [vmem:[%s11104_s1 + $0x80] sm:$0xff]   ;;  %7363 = vmatpush3.bf16.msra.mxu0 %v8115_v2  ;;  %v8120_v7 = vld [vmem:[%s11104_s1 + $0x88] sm:$0xff]   ;;  %v8123_v10 = vld [vmem:[%s11104_s1 + $0x10] sm:$0xff]   ;;  %vm353_vm2 = vsmask.f32 7440  ;;  %v11149_v38 = vmov 0 }
  0x40   : > { %7439 = vmatpush3.bf16.msra.mxu1 %v8116_v3  ;;  %7364 = vmatprep.subr.bf16.mxu0 %v8117_v4  ;;  %v8124_v11 = vld [vmem:[%s11104_s1 + $0x90] sm:$0xff]   ;;  %v8125_v12 = vld [vmem:[%s11104_s1 + $0x58] sm:$0xff]   ;;  %v8129_v16 = vld [vmem:[%s11104_s1 + $0x60] sm:$0xff]   ;;  %s11224_s13 = smov (!%p313_p3, %s312_s13), 3  ;;  %vm718_vm5 = vsmask.f32 2304 }
  0x41   : > { %7440 = vmatprep.subr.bf16.mxu1 %v8118_v5  ;;  %v8126_v13 = vld [vmem:[%s11104_s1 + $0xd8] sm:$0xff]   ;;  %v8130_v17 = vld [vmem:[%s11104_s1 + $0xe0] sm:$0xff]   ;;  %v8133_v20 = vld [vmem:[%s11104_s1 + $0x68] sm:$0xff]   ;;  %s8024_s22 = smul.u32 144, %s11224_s13  ;;  %vm719_vm6 = vsmask.f32 6416 }
  0x42   : > { %v8127_v14 = vld [vmem:[%s11104_s1 + $0x18] sm:$0xff]   ;;  %v8131_v18 = vld [vmem:[%s11104_s1 + $0x20] sm:$0xff]   ;;  %v8134_v21 = vld [vmem:[%s11104_s1 + $0xe8] sm:$0xff]   ;;  %v11152_v5 = vmov 0  ;;  %vm3828_vm9 = vsmask.f32 256 }
  0x43   : > { %7365 = vmatpush3.bf16.msra.mxu0 %v8119_v6  ;;  %v8128_v15 = vld [vmem:[%s11104_s1 + $0x98] sm:$0xff]   ;;  %v8132_v19 = vld [vmem:[%s11104_s1 + $0xa0] sm:$0xff]   ;;  %v8135_v22 = vld [vmem:[%s11104_s1 + $0x28] sm:$0xff]   ;;  %s8686_s12 = scalar_lea.vmem %s11103_s0, %s8024_s22  ;;  %vm4031_vm10 = vcmask 1043456   ;;  %vm4032_vm11 = vsmask.f32 7938 }
  0x44   : > { %7441 = vmatpush3.bf16.msra.mxu1 %v8120_v7  ;;  %7366 = vmatprep.subr.bf16.mxu0 %v8121_v8  ;;  %v8136_v23 = vld [vmem:[%s11104_s1 + $0xa8] sm:$0xff]   ;;  %v8137_v24 = vld [vmem:[%s11104_s1 + $0x70] sm:$0xff]   ;;  %v8141_v28 = vld [vmem:[%s11104_s1 + $0x78] sm:$0xff]   ;;  %vm4038_vm12 = vcmask 1040384   ;;  %vm3829_vm13 = vsmask.f32 4368 }
  0x45   : > { %7442 = vmatprep.subr.bf16.mxu1 %v8122_v9  ;;  %v8138_v25 = vld [vmem:[%s11104_s1 + $0xf0] sm:$0xff]   ;;  %v8142_v29 = vld [vmem:[%s11104_s1 + $0xf8] sm:$0xff]   ;;  %v8695_v32 = vld [vmem:[%s8686_s12 + $0x4] sm:$0xf]  ;;  %s10244_s13 = scalar_lea.vmem [#allocation6], %s8589_s9  ;;  %p7130_p8 = scmp.ne.s32.totalorder %s8411_s27, 0 }
  0x46   : > { %v8139_v26 = vld [vmem:[%s11104_s1 + $0x30] sm:$0xff]   ;;  %v8143_v30 = vld [vmem:[%s11104_s1 + $0x38] sm:$0xff]   ;;  %v324_v33 = vld [vmem:[%s8686_s12 + $0x8] sm:$0x1]  ;;  %v365_v35 = vshll.u32 %v8695_v32, 16  ;;  %v369_v36 = vshrl.u32 %v8695_v32, 16 }
  0x47   : > { %7367 = vmatpush3.bf16.msra.mxu0 %v8123_v10  ;;  %v8140_v27 = vld [vmem:[%s11104_s1 + $0xb0] sm:$0xff]   ;;  %v8144_v31 = vld [vmem:[%s11104_s1 + $0xb8] sm:$0xff]   ;;  %v595_v34 = vld [vmem:[%s8686_s12] sm:$0xe]  ;;  %v375_v37 = vshll.u32 %v324_v33, 16  ;;  %v640_v41 = vrot.slane %v8695_v32, 5 }
  0x48   : > { %7443 = vmatpush3.bf16.msra.mxu1 %v8124_v11  ;;  %7368 = vmatprep.subr.bf16.mxu0 %v8125_v12  ;;  %vm8702_vm4 = vmor %vm635_vm0, %vm636_vm3  ;;  %v6816_v39 = vrot.slane %v595_v34, 9  ;;  %v6826_v40 = vld [vmem:[%s8686_s12 + $0xc] sm:$0xf]  ;;  %v643_v42 = vrot.slane %v324_v33, 5  ;;  %v722_v43 = vshrl.u32 %v595_v34, 16  ;;  %v725_v44 = vshll.u32 %v595_v34, 16 }
  0x49   : > { %7444 = vmatprep.subr.bf16.mxu1 %v8126_v13  ;;  %v11150_v38 = vsel %vm8702_vm4, 4294967295, %v11149_v38  ;;  %v8709_v45 = vld [vmem:[%s8686_s12 + $0x10] sm:$0xf]  ;;  %v8711_v46 = vrot.slane %v375_v37, 5  ;;  %v6828_v47 = vld [vmem:[%s8686_s12 + $0x14] sm:$0x1]  ;;  %vm8731_vm7 = vmor %vm352_vm1, %vm353_vm2 }
  0x4a   : > { %11151 = vst [vmem:[#allocation11_spill] sm:$0xff] %v11150_v38  ;;  %v983_v48 = vshrl.u32 %v6826_v40, 16  ;;  %v986_v49 = vshll.u32 %v6826_v40, 16  ;;  %v992_v50 = vshll.u32 %v8709_v45, 16  ;;  %v641_v51 = vsel %vm8702_vm4, %v6816_v39, %v640_v41  ;;  %v8145_v55 = vld [vmem:[%s11104_s1 + $0x140] sm:$0xff]   ;;  %vm8758_vm8 = vmor %vm718_vm5, %vm719_vm6 }
  0x4b   : > { %7369 = vmatpush3.bf16.msra.mxu0 %v8127_v14  ;;  %v642_v52 = vrot.slane %v640_v41, 4  ;;  %v724_v53 = vrot.slane %v722_v43, 5  ;;  %v727_v54 = vrot.slane %v725_v44, 6  ;;  %v996_v59 = vshrl.u32 %v8709_v45, 16  ;;  %v322_v60 = vld [vmem:[%s8686_s12] sm:$0xf]  ;;  %vm10043_vm14 = vmand %vm4031_vm10, %vm4032_vm11 }
  0x4c   : > { %7445 = vmatpush3.bf16.msra.mxu1 %v8128_v15  ;;  %7370 = vmatprep.subr.bf16.mxu0 %v8129_v16  ;;  %v985_v56 = vrot.slane %v983_v48, 4  ;;  %v988_v57 = vrot.slane %v986_v49, 5  ;;  %v994_v58 = vrot.slane %v992_v50, 5  ;;  %v1002_v62 = vshll.u32 %v6828_v47, 16  ;;  %v708_v14 = vld [vmem:[%s8686_s12 + $0x8] sm:$0x3]  ;;  %vm10050_vm15 = vmand %vm4038_vm12, %vm3828_vm9 }
  0x4d   : > { %7446 = vmatprep.subr.bf16.mxu1 %v8130_v17  ;;  %v644_v61 = vsel %vm8702_vm4, %v642_v52, %v643_v42  ;;  %v1264_v63 = vrot.slane %v8709_v45, 5  ;;  %v1267_v0 = vrot.slane %v6828_v47, 5  ;;  %v998_v3 = vrot.slane %v996_v59, 4  ;;  %v8764_v37 = vld [vmem:[%s8686_s12 + $0x1c] sm:$0xf]  ;;  %v8146_v48 = vld [vmem:[%s11104_s1 + $0x100] sm:$0xff]   ;;  %vm10057_vm0 = vmor %vm3828_vm9, %vm3829_vm13 }
  0x4e   : > { %v6956_v1 = vcombine.low %v641_v51, %v644_v61  ;;  %v989_v2 = vor.u32 %v988_v57, %v985_v56  ;;  %v8727_v4 = vrot.slane %v992_v50, 6  ;;  %v11153_v5 = vsel %vm8731_vm7, 4294967295, %v11152_v5  ;;  %v6831_v42 = vld [vmem:[%s8686_s12 + $0x20] sm:$0x1]  ;;  %v325_v43 = vld [vmem:[%s8686_s12 + $0xc] sm:$0xf]  ;;  %vm10092_vm1 = vmand %vm4038_vm12, %vm4032_vm11 }
  0x4f   : > { %7371 = vmatpush3.bf16.msra.mxu0 %v8131_v18  ;;  %11154 = vst [vmem:[#allocation12_spill] sm:$0xff] %v11153_v5  ;;  %v1004_v6 = vrot.slane %v1002_v62, 5  ;;  %v1266_v7 = vrot.slane %v1264_v63, 4  ;;  %v356_v8 = vshrl.u32 %v322_v60, 16  ;;  %v359_v9 = vshll.u32 %v322_v60, 16 }
  0x50   : > { %7447 = vmatpush3.bf16.msra.mxu1 %v8132_v19  ;;  %7372 = vmatprep.subr.bf16.mxu0 %v8133_v20  ;;  %v990_v10 = vrot.slane %v989_v2, 4  ;;  %v999_v11 = vor.u32 %v998_v3, %v994_v58  ;;  %v367_v12 = vrot.slane %v365_v35, 5  ;;  %v371_v13 = vrot.slane %v369_v36, 4 }
  0x51   : > { %7448 = vmatprep.subr.bf16.mxu1 %v8134_v21  ;;  %3161 = vmatprep.mubr.bf16.mxu0 %v6956_v1  ;;  %v8740_v15 = vsel %vm8702_vm4, %v1266_v7, %v1267_v0  ;;  %v358_v16 = vrot.slane %v356_v8, 4  ;;  %v361_v17 = vrot.slane %v359_v9, 5  ;;  %v728_v18 = vor.u32 %v727_v54, %v724_v53 }
  0x52   : > { %v995_v19 = vsel %vm8731_vm7, %v990_v10, %v994_v58  ;;  %v1000_v20 = vrot.slane %v999_v11, 4  ;;  %v372_v21 = vor.u32 %v371_v13, %v367_v12  ;;  %v739_v34 = vshll.u32 %v708_v14, 16  ;;  %v8147_v58 = vld [vmem:[%s11104_s1 + $0x148] sm:$0xff]  }
  0x53   : > { %7373 = vmatpush3.bf16.msra.mxu0 %v8135_v22  ;;  %v730_v22 = vrot.slane %v369_v36, 5  ;;  %v1016_v62 = vshll.u32 %v8764_v37, 16  ;;  %v1020_v0 = vshrl.u32 %v8764_v37, 16  ;;  %v1026_v3 = vshll.u32 %v6831_v42, 16  ;;  %v8148_v11 = vld [vmem:[%s11104_s1 + $0x108] sm:$0xff]  }
  0x54   : > { %7449 = vmatpush3.bf16.msra.mxu1 %v8136_v23  ;;  %7374 = vmatprep.subr.bf16.mxu0 %v8137_v24  ;;  %v8745_v23 = vld [vmem:[%s8686_s12 + $0x14] sm:$0x1]  ;;  %v8748_v24 = vld [vmem:[%s8686_s12 + $0xc] sm:$0xe]  ;;  %v373_v32 = vrot.slane %v372_v21, 4  ;;  %v741_v47 = vrot.slane %v739_v34, 6 }
  0x55   : > { %7450 = vmatprep.subr.bf16.mxu1 %v8138_v25  ;;  %v362_v25 = vor.u32 %v361_v17, %v358_v16  ;;  %v6817_v36 = vrot.slane %v8748_v24, 9  ;;  %v650_v50 = vrot.slane %v8745_v23, 5  ;;  %v1018_v10 = vrot.slane %v1016_v62, 5  ;;  %v8149_v17 = vld [vmem:[%s11104_s1 + $0x150] sm:$0xff]  }
  0x56   : > { %v378_v44 = vsel %vm8731_vm7, %v373_v32, %v8711_v46  ;;  %v1028_v13 = vrot.slane %v1026_v3, 5  ;;  %v383_v16 = vshll.u32 %v325_v43, 16  ;;  %v399_v21 = vshll.u32 %v8745_v23, 16 }
  0x57   : > { %7375 = vmatpush3.bf16.msra.mxu0 %v8139_v26  ;;  %v729_v26 = vrot.slane %v728_v18, 4  ;;  %v363_v39 = vrot.slane %v362_v25, 4  ;;  %v8150_v25 = vld [vmem:[%s11104_s1 + $0x110] sm:$0xff]  }
  0x58   : > { %7451 = vmatpush3.bf16.msra.mxu1 %v8140_v27  ;;  %7376 = vmatprep.subr.bf16.mxu0 %v8141_v28  ;;  %v731_v27 = vrot.slane %v365_v35, 6  ;;  %v736_v28 = vshrl.u32 %v708_v14, 16 }
  0x59   : > { %7452 = vmatprep.subr.bf16.mxu1 %v8142_v29  ;;  %v8751_v29 = vld [vmem:[%s8686_s12 + $0x10] sm:$0xf]  ;;  %v368_v51 = vsel %vm8731_vm7, %v363_v39, %v367_v12  ;;  %v1022_v12 = vrot.slane %v1020_v0, 4 }
  0x5a   : > { %v732_v40 = vor.u32 %v731_v27, %v730_v22  ;;  %v738_v41 = vrot.slane %v736_v28, 5  ;;  %v647_v49 = vrot.slane %v8751_v29, 5  ;;  %v709_v22 = vld [vmem:[%s8686_s12 + $0x14] sm:$0x3]  ;;  %v385_v27 = vrot.slane %v383_v16, 5 }
  0x5b   : > { %7377 = vmatpush3.bf16.msra.mxu0 %v8143_v30  ;;  %v6829_v30 = vld [vmem:[%s8686_s12 + $0x18] sm:$0xf]  ;;  %v745_v28 = vshrl.u32 %v8748_v24, 16 }
  0x5c   : > { %7453 = vmatpush3.bf16.msra.mxu1 %v8144_v31  ;;  %7514 = vmatprep.subr.bf16.mxu0 %v8145_v55  ;;  %v1005_v31 = vsel %vm8731_vm7, %v1000_v20, %v1004_v6  ;;  %v733_v52 = vsel %vm8758_vm8, %v729_v26, %v732_v40  ;;  %v734_v53 = vrot.slane %v732_v40, 4  ;;  %v1007_v54 = vshrl.u32 %v6829_v30, 16 }
  0x5d   : > { %v6976_v35 = vcombine.low %v995_v19, %v1005_v31  ;;  %v6946_v55 = vcombine.low %v368_v51, %v378_v44  ;;  %v742_v46 = vor.u32 %v741_v47, %v738_v41  ;;  %v648_v56 = vsel %vm8702_vm4, %v6817_v36, %v647_v49  ;;  %v8151_v31 = vld [vmem:[%s11104_s1 + $0x158] sm:$0xff]   ;;  %v8154_v41 = vld [vmem:[%s11104_s1 + $0x180] sm:$0xff]  }
  0x5e   : > { %v649_v57 = vrot.slane %v647_v49, 4  ;;  %v1009_v60 = vrot.slane %v1007_v54, 4  ;;  %v1010_v61 = vshll.u32 %v6829_v30, 16  ;;  %v380_v6 = vshrl.u32 %v325_v43, 16  ;;  %v8830_v54 = vld [vmem:[%s8686_s12 + $0x18] sm:$0xe] }
  0x5f   : > { %3274 = vmatprep.mubr.bf16.mxu1 %v6976_v35  ;;  %3162 = vmatmul.mubr.bf16.vlgmr.msra.gmra.mrb[0].mxu0 %v6946_v55  ;;  %v743_v1 = vsel %vm8758_vm8, %v734_v53, %v742_v46  ;;  %v389_v19 = vshll.u32 %v8751_v29, 16  ;;  %v393_v20 = vshrl.u32 %v8751_v29, 16  ;;  %v1023_v26 = vor.u32 %v1022_v12, %v1018_v10  ;;  %v8153_v29 = vld [vmem:[%s11104_s1 + $0x1c0] sm:$0xff]   ;;  %v8827_v53 = vld [vmem:[%s8686_s12 + $0x1c] sm:$0xf] }
  0x60   : > { %v651_v2 = vsel %vm8702_vm4, %v649_v57, %v650_v50  ;;  %v6966_v7 = vcombine.low %v733_v52, %v743_v1  ;;  %7515 = vmatpush3.bf16.msra.mxu0 %v8146_v48  ;;  %v1012_v9 = vrot.slane %v1010_v61, 5  ;;  %v382_v14 = vrot.slane %v380_v6, 4  ;;  %7590 = vmatprep.subr.bf16.mxu1 %v8153_v29  ;;  %v8822_v48 = vld [vmem:[%s8686_s12 + $0x20] sm:$0x1]  ;;  %v6832_v55 = vld [vmem:[%s8686_s12 + $0x24] sm:$0xf] }
  0x61   : > { %v6957_v8 = vcombine.low %v648_v56, %v651_v2  ;;  %7516 = vmatprep.subr.bf16.mxu0 %v8147_v58  ;;  %v748_v30 = vshll.u32 %v8748_v24, 16  ;;  %v391_v32 = vrot.slane %v389_v19, 5  ;;  %v395_v34 = vrot.slane %v393_v20, 4  ;;  %v8152_v61 = vld [vmem:[%s11104_s1 + $0x118] sm:$0xff]  }
  0x62   : > { %3275 = vmatmul.mubr.bf16.vlgmr.msra.gmra.mrb[0].mxu1 %v6966_v7  ;;  %v1013_v18 = vor.u32 %v1012_v9, %v1009_v60  ;;  %v401_v36 = vrot.slane %v399_v21, 5  ;;  %v1024_v35 = vrot.slane %v1023_v26, 4  ;;  %v386_v39 = vor.u32 %v385_v27, %v382_v14  ;;  %v8834_v60 = vld [vmem:[%s8686_s12 + $0x28] sm:$0xf]  ;;  %v6834_v7 = vld [vmem:[%s8686_s12 + $0x2c] sm:$0x1] }
  0x63   : > { %3169 = vmatprep.mubr.bf16.mxu0 %v6957_v8  ;;  %v747_v40 = vrot.slane %v745_v28, 5  ;;  %v750_v24 = vrot.slane %v748_v30, 6  ;;  %v396_v43 = vor.u32 %v395_v34, %v391_v32  ;;  %v753_v44 = vrot.slane %v393_v20, 5  ;;  %7591 = vmatpush3.bf16.msra.mxu1 %v8154_v41  ;;  %v8155_v8 = vld [vmem:[%s11104_s1 + $0x160] sm:$0xff]  }
  0x64   : > { %v1014_v23 = vrot.slane %v1013_v18, 4  ;;  %7517 = vmatpush3.bf16.msra.mxu0 %v8148_v11  ;;  %v754_v47 = vrot.slane %v389_v19, 6  ;;  %v1029_v49 = vsel %vm8731_vm7, %v1024_v35, %v1028_v13  ;;  %v387_v50 = vrot.slane %v386_v39, 4  ;;  %v328_v13 = vld [vmem:[%s8686_s12 + $0x18] sm:$0xf] }
  0x65   : > { %7518 = vmatprep.subr.bf16.mxu0 %v8149_v17  ;;  %v751_v51 = vor.u32 %v750_v24, %v747_v40  ;;  %v759_v52 = vshrl.u32 %v709_v22, 16  ;;  %v397_v56 = vrot.slane %v396_v43, 4  ;;  %v762_v58 = vshll.u32 %v709_v22, 16  ;;  %v8157_v43 = vld [vmem:[%s11104_s1 + $0x1c8] sm:$0xff]  }
  0x66   : > { %v1019_v42 = vsel %vm8731_vm7, %v1014_v23, %v1018_v10  ;;  %v755_v57 = vor.u32 %v754_v47, %v753_v44  ;;  %v392_v1 = vsel %vm8731_vm7, %v387_v50, %v391_v32  ;;  %v6818_v6 = vrot.slane %v8830_v54, 9  ;;  %7592 = vmatprep.subr.bf16.mxu1 %v8157_v43 }
  0x67   : > { %v6977_v46 = vcombine.low %v1019_v42, %v1029_v49  ;;  %v752_v2 = vrot.slane %v751_v51, 4  ;;  %v761_v3 = vrot.slane %v759_v52, 5  ;;  %v402_v9 = vsel %vm8731_vm7, %v397_v56, %v401_v36  ;;  %v8158_v51 = vld [vmem:[%s11104_s1 + $0x188] sm:$0xff]  }
  0x68   : > { %7519 = vmatpush3.bf16.msra.mxu0 %v8150_v25  ;;  %v757_v10 = vrot.slane %v755_v57, 4  ;;  %v764_v11 = vrot.slane %v762_v58, 6  ;;  %v654_v12 = vrot.slane %v8827_v53, 5  ;;  %v6947_v14 = vcombine.low %v392_v1, %v402_v9  ;;  %v8156_v25 = vld [vmem:[%s11104_s1 + $0x120] sm:$0xff]   ;;  %7593 = vmatpush3.bf16.msra.mxu1 %v8158_v51 }
  0x69   : > { %7520 = vmatprep.subr.bf16.mxu0 %v8151_v31  ;;  %3282 = vmatprep.mubr.bf16.mxu1 %v6977_v46  ;;  %v756_v16 = vsel %vm8758_vm8, %v752_v2, %v755_v57  ;;  %v657_v17 = vrot.slane %v8822_v48, 5  ;;  %v1031_v18 = vshrl.u32 %v6832_v55, 16  ;;  %v1034_v22 = vshll.u32 %v6832_v55, 16  ;;  %v710_v46 = vld [vmem:[%s8686_s12 + $0x20] sm:$0x3] }
  0x6a   : > { %v765_v19 = vor.u32 %v764_v11, %v761_v3  ;;  %v655_v20 = vsel %vm8702_vm4, %v6818_v6, %v654_v12  ;;  %v656_v21 = vrot.slane %v654_v12, 4  ;;  %3170 = vmatmul.mubr.bf16.gmra.mrb[4].mxu0 %v6947_v14  ;;  %v1040_v27 = vshll.u32 %v8834_v60, 16  ;;  %v8888_v11 = vld [vmem:[%s8686_s12 + $0x2c] sm:$0x1] }
  0x6b   : > { %v1033_v26 = vrot.slane %v1031_v18, 4  ;;  %v1044_v28 = vshrl.u32 %v8834_v60, 16  ;;  %v1050_v30 = vshll.u32 %v6834_v7, 16  ;;  %v1036_v23 = vrot.slane %v1034_v22, 5  ;;  %v6835_v18 = vld [vmem:[%s8686_s12 + $0x30] sm:$0xf] }
  0x6c   : > { %7521 = vmatpush3.bf16.msra.mxu0 %v8152_v61  ;;  %v766_v31 = vsel %vm8758_vm8, %v757_v10, %v765_v19  ;;  %v658_v29 = vsel %vm8702_vm4, %v656_v21, %v657_v17  ;;  %v404_v32 = vshrl.u32 %v328_v13, 16  ;;  %v1042_v35 = vrot.slane %v1040_v27, 5  ;;  %v8885_v10 = vld [vmem:[%s8686_s12 + $0x28] sm:$0xf]  ;;  %v8891_v17 = vld [vmem:[%s8686_s12 + $0x24] sm:$0xe] }
  0x6d   : > { %7522 = vmatprep.subr.bf16.mxu0 %v8155_v8  ;;  %v6967_v34 = vcombine.low %v756_v16, %v766_v31  ;;  %v6958_v36 = vcombine.low %v655_v20, %v658_v29  ;;  %v1046_v39 = vrot.slane %v1044_v28, 4  ;;  %v1037_v40 = vor.u32 %v1036_v23, %v1033_v26  ;;  %v8159_v26 = vld [vmem:[%s11104_s1 + $0x168] sm:$0xff]  }
  0x6e   : > { %v1052_v24 = vrot.slane %v1050_v30, 5  ;;  %v406_v41 = vrot.slane %v404_v32, 4  ;;  %v407_v42 = vshll.u32 %v328_v13, 16  ;;  %v413_v47 = vshll.u32 %v8827_v53, 16  ;;  %v6837_v32 = vld [vmem:[%s8686_s12 + $0x38] sm:$0x1] }
  0x6f   : > { %3283 = vmatmul.mubr.bf16.gmra.mrb[4].mxu1 %v6967_v34  ;;  %3177 = vmatprep.mubr.bf16.mxu0 %v6958_v36  ;;  %v1047_v44 = vor.u32 %v1046_v39, %v1042_v35  ;;  %v417_v49 = vshrl.u32 %v8827_v53, 16  ;;  %v423_v50 = vshll.u32 %v8822_v48, 16  ;;  %v1038_v52 = vrot.slane %v1037_v40, 4  ;;  %v8160_v34 = vld [vmem:[%s11104_s1 + $0x128] sm:$0xff]  }
  0x70   : > { %7523 = vmatpush3.bf16.msra.mxu0 %v8156_v25  ;;  %v409_v55 = vrot.slane %v407_v42, 5  ;;  %v768_v56 = vshrl.u32 %v8830_v54, 16  ;;  %v771_v57 = vshll.u32 %v8830_v54, 16  ;;  %v415_v61 = vrot.slane %v413_v47, 5  ;;  %v8896_v25 = vld [vmem:[%s8686_s12 + $0x34] sm:$0xf] }
  0x71   : > { %v1048_v58 = vrot.slane %v1047_v44, 4  ;;  %v419_v1 = vrot.slane %v417_v49, 4  ;;  %v425_v53 = vrot.slane %v423_v50, 5  ;;  %v1043_v48 = vsel %vm8731_vm7, %v1038_v52, %v1042_v35  ;;  %7524 = vmatprep.subr.bf16.mxu0 %v8159_v26  ;;  %v8167_v26 = vld [vmem:[%s11104_s1 + $0x1e0] sm:$0xff]  }
  0x72   : > { %v410_v2 = vor.u32 %v409_v55, %v406_v41  ;;  %v770_v3 = vrot.slane %v768_v56, 5  ;;  %v773_v6 = vrot.slane %v771_v57, 6  ;;  %v776_v8 = vrot.slane %v417_v49, 5  ;;  %v8161_v41 = vld [vmem:[%s11104_s1 + $0x1d0] sm:$0xff]  }
  0x73   : > { %v1053_v7 = vsel %vm8731_vm7, %v1048_v58, %v1052_v24  ;;  %v420_v54 = vor.u32 %v419_v1, %v415_v61  ;;  %v777_v9 = vrot.slane %v413_v47, 6  ;;  %v782_v16 = vshrl.u32 %v710_v46, 16  ;;  %v331_v24 = vld [vmem:[%s8686_s12 + $0x24] sm:$0xf]  ;;  %v8162_v49 = vld [vmem:[%s11104_s1 + $0x190] sm:$0xff]   ;;  %7594 = vmatprep.subr.bf16.mxu1 %v8161_v41 }
  0x74   : > { %v6978_v12 = vcombine.low %v1043_v48, %v1053_v7  ;;  %v411_v13 = vrot.slane %v410_v2, 4  ;;  %v774_v14 = vor.u32 %v773_v6, %v770_v3  ;;  %v785_v21 = vshll.u32 %v710_v46, 16  ;;  %7525 = vmatpush3.bf16.msra.mxu0 %v8160_v34  ;;  %v8163_v46 = vld [vmem:[%s11104_s1 + $0x170] sm:$0xff]   ;;  %7595 = vmatpush3.bf16.msra.mxu1 %v8162_v49  ;;  %v8956_v41 = vld [vmem:[%s8686_s12 + $0x38] sm:$0x1] }
  0x75   : > { %v421_v19 = vrot.slane %v420_v54, 4  ;;  %v778_v20 = vor.u32 %v777_v9, %v776_v8  ;;  %v6819_v22 = vrot.slane %v8891_v17, 9  ;;  %v784_v29 = vrot.slane %v782_v16, 5  ;;  %v8164_v1 = vld [vmem:[%s11104_s1 + $0x130] sm:$0xff]   ;;  %7526 = vmatprep.subr.bf16.mxu0 %v8163_v46  ;;  %v8165_v9 = vld [vmem:[%s11104_s1 + $0x1d8] sm:$0xff]  }
  0x76   : > { %3290 = vmatprep.mubr.bf16.mxu1 %v6978_v12  ;;  %v416_v30 = vsel %vm8731_vm7, %v411_v13, %v415_v61  ;;  %v775_v31 = vrot.slane %v774_v14, 4  ;;  %v661_v23 = vrot.slane %v8885_v10, 5  ;;  %v787_v39 = vrot.slane %v785_v21, 6  ;;  %7596 = vmatprep.subr.bf16.mxu1 %v8165_v9  ;;  %v8964_v49 = vld [vmem:[%s8686_s12 + $0x34] sm:$0xf] }
  0x77   : > { %v426_v36 = vsel %vm8731_vm7, %v421_v19, %v425_v53  ;;  %v780_v35 = vrot.slane %v778_v20, 4  ;;  %v664_v40 = vrot.slane %v8888_v11, 5  ;;  %v1055_v51 = vshrl.u32 %v6835_v18, 16 }
  0x78   : > { %v6948_v42 = vcombine.low %v416_v30, %v426_v36  ;;  %v779_v43 = vsel %vm8758_vm8, %v775_v31, %v778_v20  ;;  %v662_v44 = vsel %vm8702_vm4, %v6819_v22, %v661_v23  ;;  %v663_v47 = vrot.slane %v661_v23, 4  ;;  %7527 = vmatpush3.bf16.msra.mxu0 %v8164_v1  ;;  %v711_v23 = vld [vmem:[%s8686_s12 + $0x2c] sm:$0x3] }
  0x79   : > { %v788_v50 = vor.u32 %v787_v39, %v784_v29  ;;  %v1058_v52 = vshll.u32 %v6835_v18, 16  ;;  %v1064_v55 = vshll.u32 %v8896_v25, 16  ;;  %v1068_v57 = vshrl.u32 %v8896_v25, 16  ;;  %v8166_v18 = vld [vmem:[%s11104_s1 + $0x198] sm:$0xff]  }
  0x7a   : > { %3178 = vmatmul.mubr.bf16.gmra.mrb[8].mxu0 %v6948_v42  ;;  %v665_v56 = vsel %vm8702_vm4, %v663_v47, %v664_v40  ;;  %v1074_v58 = vshll.u32 %v6837_v32, 16  ;;  %v428_v61 = vshrl.u32 %v331_v24, 16  ;;  %v1057_v2 = vrot.slane %v1055_v51, 4  ;;  %7597 = vmatpush3.bf16.msra.mxu1 %v8166_v18  ;;  %v8959_v42 = vld [vmem:[%s8686_s12 + $0x30] sm:$0xe] }
  0x7b   : > { %v789_v53 = vsel %vm8758_vm8, %v780_v35, %v788_v50  ;;  %v6959_v48 = vcombine.low %v662_v44, %v665_v56  ;;  %v1060_v3 = vrot.slane %v1058_v52, 5  ;;  %v1066_v7 = vrot.slane %v1064_v55, 5  ;;  %7598 = vmatprep.subr.bf16.mxu1 %v8167_v26  ;;  %v6838_v50 = vld [vmem:[%s8686_s12 + $0x3c] sm:$0xf] }
  0x7c   : > { %v6968_v6 = vcombine.low %v779_v43, %v789_v53  ;;  %v1070_v54 = vrot.slane %v1068_v57, 4  ;;  %v1076_v8 = vrot.slane %v1074_v58, 5  ;;  %v430_v13 = vrot.slane %v428_v61, 4  ;;  %v8968_v58 = vld [vmem:[%s8686_s12 + $0x40] sm:$0xf] }
  0x7d   : > { %3185 = vmatprep.mubr.bf16.mxu0 %v6959_v48  ;;  %v1061_v12 = vor.u32 %v1060_v3, %v1057_v2  ;;  %v431_v14 = vshll.u32 %v331_v24, 16  ;;  %v437_v16 = vshll.u32 %v8885_v10, 16  ;;  %v441_v20 = vshrl.u32 %v8885_v10, 16  ;;  %v6840_v2 = vld [vmem:[%s8686_s12 + $0x44] sm:$0x1] }
  0x7e   : > { %3291 = vmatmul.mubr.bf16.gmra.mrb[8].mxu1 %v6968_v6  ;;  %v1071_v19 = vor.u32 %v1070_v54, %v1066_v7  ;;  %v447_v21 = vshll.u32 %v8888_v11, 16  ;;  %v791_v22 = vshrl.u32 %v8891_v17, 16  ;;  %v794_v32 = vshll.u32 %v8891_v17, 16  ;;  %v334_v3 = vld [vmem:[%s8686_s12 + $0x30] sm:$0xf]  ;;  %v8168_v6 = vld [vmem:[%s11104_s1 + $0x1a0] sm:$0xff]  }
  0x7f   : > { %v1062_v30 = vrot.slane %v1061_v12, 4  ;;  %v433_v31 = vrot.slane %v431_v14, 5  ;;  %v439_v29 = vrot.slane %v437_v16, 5  ;;  %v443_v11 = vrot.slane %v441_v20, 4  ;;  %v8169_v12 = vld [vmem:[%s11104_s1 + $0x178] sm:$0xff]   ;;  %7599 = vmatpush3.bf16.msra.mxu1 %v8168_v6 }
  0x80   : > { %v1072_v10 = vrot.slane %v1071_v19, 4  ;;  %v449_v34 = vrot.slane %v447_v21, 5  ;;  %v793_v36 = vrot.slane %v791_v22, 5  ;;  %v796_v40 = vrot.slane %v794_v32, 6  ;;  %v8170_v19 = vld [vmem:[%s11104_s1 + $0x1e8] sm:$0xff]   ;;  %7528 = vmatprep.subr.bf16.mxu0 %v8169_v12 }
  0x81   : > { %v1067_v35 = vsel %vm8731_vm7, %v1062_v30, %v1066_v7  ;;  %v434_v39 = vor.u32 %v433_v31, %v430_v13  ;;  %v799_v24 = vrot.slane %v441_v20, 5  ;;  %v444_v43 = vor.u32 %v443_v11, %v439_v29  ;;  %7600 = vmatprep.subr.bf16.mxu1 %v8170_v19  ;;  %v9023_v19 = vld [vmem:[%s8686_s12 + $0x44] sm:$0x1] }
  0x82   : > { %v1077_v17 = vsel %vm8731_vm7, %v1072_v10, %v1076_v8  ;;  %v800_v44 = vrot.slane %v437_v16, 6  ;;  %v805_v47 = vshrl.u32 %v711_v23, 16  ;;  %v797_v46 = vor.u32 %v796_v40, %v793_v36  ;;  %v8171_v36 = vld [vmem:[%s11104_s1 + $0x138] sm:$0xff]  }
  0x83   : > { %v6979_v51 = vcombine.low %v1067_v35, %v1077_v17  ;;  %v435_v52 = vrot.slane %v434_v39, 4  ;;  %v808_v56 = vshll.u32 %v711_v23, 16  ;;  %v445_v61 = vrot.slane %v444_v43, 4  ;;  %7529 = vmatpush3.bf16.msra.mxu0 %v8171_v36 }
  0x84   : > { %v801_v1 = vor.u32 %v800_v44, %v799_v24  ;;  %v807_v53 = vrot.slane %v805_v47, 5  ;;  %v6820_v48 = vrot.slane %v8959_v42, 9  ;;  %v798_v54 = vrot.slane %v797_v46, 4 }
  0x85   : > { %3298 = vmatprep.mubr.bf16.mxu1 %v6979_v51  ;;  %v440_v7 = vsel %vm8731_vm7, %v435_v52, %v439_v29  ;;  %v810_v8 = vrot.slane %v808_v56, 6  ;;  %v668_v9 = vrot.slane %v8964_v49, 5  ;;  %v450_v13 = vsel %vm8731_vm7, %v445_v61, %v449_v34  ;;  %v8173_v61 = vld [vmem:[%s11104_s1 + $0x1f0] sm:$0xff]  }
  0x86   : > { %v803_v14 = vrot.slane %v801_v1, 4  ;;  %v671_v16 = vrot.slane %v8956_v41, 5  ;;  %v1079_v18 = vshrl.u32 %v6838_v50, 16  ;;  %v6949_v20 = vcombine.low %v440_v7, %v450_v13 }
  0x87   : > { %v802_v21 = vsel %vm8758_vm8, %v798_v54, %v801_v1  ;;  %v811_v22 = vor.u32 %v810_v8, %v807_v53  ;;  %v669_v26 = vsel %vm8702_vm4, %v6820_v48, %v668_v9  ;;  %v670_v30 = vrot.slane %v668_v9, 4  ;;  %v712_v48 = vld [vmem:[%s8686_s12 + $0x38] sm:$0x3] }
  0x88   : > { %v1081_v31 = vrot.slane %v1079_v18, 4  ;;  %v1082_v29 = vshll.u32 %v6838_v50, 16  ;;  %v1088_v23 = vshll.u32 %v8968_v58, 16  ;;  %3186 = vmatmul.mubr.bf16.gmra.mrb[12].mxu0 %v6949_v20  ;;  %v1092_v10 = vshrl.u32 %v8968_v58, 16  ;;  %v8172_v50 = vld [vmem:[%s11104_s1 + $0x1a8] sm:$0xff]  }
  0x89   : > { %v812_v32 = vsel %vm8758_vm8, %v803_v14, %v811_v22  ;;  %v1098_v11 = vshll.u32 %v6840_v2, 16  ;;  %v452_v34 = vshrl.u32 %v334_v3, 16  ;;  %v672_v39 = vsel %vm8702_vm4, %v670_v30, %v671_v16  ;;  %7601 = vmatpush3.bf16.msra.mxu1 %v8172_v50  ;;  %v9026_v20 = vld [vmem:[%s8686_s12 + $0x3c] sm:$0xe]  ;;  %v9048_v50 = vld [vmem:[%s11104_s1 + $0x200] sm:$0xff]  }
  0x8a   : > { %v6969_v35 = vcombine.low %v802_v21, %v812_v32  ;;  %v1084_v40 = vrot.slane %v1082_v29, 5  ;;  %v1090_v24 = vrot.slane %v1088_v23, 5  ;;  %v6960_v17 = vcombine.low %v669_v26, %v672_v39  ;;  %7602 = vmatprep.subr.bf16.mxu1 %v8173_v61  ;;  %v8175_v21 = vld [vmem:[%s11104_s1 + $0x1f8] sm:$0xff]   ;;  %v9034_v29 = vld [vmem:[%s8686_s12 + $0x40] sm:$0xf]  ;;  %7956 = vmatprep.subr.bf16.mxu0 %v9048_v50 }
  0x8b   : > { %v1094_v43 = vrot.slane %v1092_v10, 4  ;;  %v1100_v44 = vrot.slane %v1098_v11, 5  ;;  %v454_v47 = vrot.slane %v452_v34, 4  ;;  %v455_v52 = vshll.u32 %v334_v3, 16  ;;  %v6841_v32 = vld [vmem:[%s8686_s12 + $0x48] sm:$0xf] }
  0x8c   : > { %3299 = vmatmul.mubr.bf16.gmra.mrb[12].mxu1 %v6969_v35  ;;  %v1085_v51 = vor.u32 %v1084_v40, %v1081_v31  ;;  %v461_v46 = vshll.u32 %v8964_v49, 16  ;;  %v465_v56 = vshrl.u32 %v8964_v49, 16  ;;  %3193 = vmatprep.mubr.bf16.mxu0 %v6960_v17  ;;  %v471_v53 = vshll.u32 %v8956_v41, 16  ;;  %v8174_v49 = vld [vmem:[%s11104_s1 + $0x1b0] sm:$0xff]   ;;  %v9038_v39 = vld [vmem:[%s8686_s12 + $0x4c] sm:$0xf] }
  0x8d   : > { %v1095_v1 = vor.u32 %v1094_v43, %v1090_v24  ;;  %v814_v2 = vshrl.u32 %v8959_v42, 16  ;;  %v817_v6 = vshll.u32 %v8959_v42, 16  ;;  %v457_v7 = vrot.slane %v455_v52, 5  ;;  %7603 = vmatpush3.bf16.msra.mxu1 %v8174_v49  ;;  %v6843_v40 = vld [vmem:[%s8686_s12 + $0x50] sm:$0x1] }
  0x8e   : > { %v1086_v3 = vrot.slane %v1085_v51, 4  ;;  %v463_v54 = vrot.slane %v461_v46, 5  ;;  %v467_v8 = vrot.slane %v465_v56, 4  ;;  %v473_v41 = vrot.slane %v471_v53, 5  ;;  %7604 = vmatprep.subr.bf16.mxu1 %v8175_v21 }
  0x8f   : > { %v1096_v9 = vrot.slane %v1095_v1, 4  ;;  %v816_v12 = vrot.slane %v814_v2, 5  ;;  %v819_v13 = vrot.slane %v817_v6, 6  ;;  %v458_v14 = vor.u32 %v457_v7, %v454_v47  ;;  %v337_v2 = vld [vmem:[%s8686_s12 + $0x3c] sm:$0xf] }
  0x90   : > { %v1091_v42 = vsel %vm8731_vm7, %v1086_v3, %v1090_v24  ;;  %v468_v16 = vor.u32 %v467_v8, %v463_v54  ;;  %v822_v18 = vrot.slane %v465_v56, 5  ;;  %v823_v30 = vrot.slane %v461_v46, 6  ;;  %v8176_v24 = vld [vmem:[%s11104_s1 + $0x1b8] sm:$0xff]  }
  0x91   : > { %v1101_v22 = vsel %vm8731_vm7, %v1096_v9, %v1100_v44  ;;  %v820_v26 = vor.u32 %v819_v13, %v816_v12  ;;  %v828_v31 = vshrl.u32 %v712_v48, 16  ;;  %v459_v34 = vrot.slane %v458_v14, 4  ;;  %7605 = vmatpush3.bf16.msra.mxu1 %v8176_v24 }
  0x92   : > { %v6980_v11 = vcombine.low %v1091_v42, %v1101_v22  ;;  %v469_v36 = vrot.slane %v468_v16, 4  ;;  %v831_v35 = vshll.u32 %v712_v48, 16  ;;  %v824_v43 = vor.u32 %v823_v30, %v822_v18 }
  0x93   : > { %v821_v17 = vrot.slane %v820_v26, 4  ;;  %v830_v44 = vrot.slane %v828_v31, 5  ;;  %v6821_v47 = vrot.slane %v9026_v20, 9  ;;  %v464_v51 = vsel %vm8731_vm7, %v459_v34, %v463_v54 }
  0x94   : > { %3306 = vmatprep.mubr.bf16.mxu1 %v6980_v11  ;;  %v474_v52 = vsel %vm8731_vm7, %v469_v36, %v473_v41  ;;  %v833_v46 = vrot.slane %v831_v35, 6  ;;  %v675_v56 = vrot.slane %v9034_v29, 5  ;;  %v826_v53 = vrot.slane %v824_v43, 4 }
  0x95   : > { %v6950_v61 = vcombine.low %v464_v51, %v474_v52  ;;  %v825_v1 = vsel %vm8758_vm8, %v821_v17, %v824_v43  ;;  %v678_v48 = vrot.slane %v9023_v19, 5  ;;  %v1103_v7 = vshrl.u32 %v6841_v32, 16 }
  0x96   : > { %v834_v6 = vor.u32 %v833_v46, %v830_v44  ;;  %v676_v49 = vsel %vm8702_vm4, %v6821_v47, %v675_v56  ;;  %v677_v3 = vrot.slane %v675_v56, 4  ;;  %v1106_v54 = vshll.u32 %v6841_v32, 16 }
  0x97   : > { %3194 = vmatmul.mubr.bf16.gmra.mrb[16].mxu0 %v6950_v61  ;;  %v1112_v8 = vshll.u32 %v9038_v39, 16  ;;  %v1116_v9 = vshrl.u32 %v9038_v39, 16  ;;  %v1122_v41 = vshll.u32 %v6843_v40, 16  ;;  %v1105_v42 = vrot.slane %v1103_v7, 4  ;;  %v713_v40 = vld [vmem:[%s8686_s12 + $0x44] sm:$0x3] }
  0x98   : > { %v835_v12 = vsel %vm8758_vm8, %v826_v53, %v834_v6  ;;  %v679_v13 = vsel %vm8702_vm4, %v677_v3, %v678_v48  ;;  %v476_v14 = vshrl.u32 %v337_v2, 16  ;;  %v1108_v21 = vrot.slane %v1106_v54, 5  ;;  %v9081_v6 = vld [vmem:[%s8686_s12 + $0x50] sm:$0x1]  ;;  %v9086_v54 = vld [vmem:[%s8686_s12 + $0x4c] sm:$0xf] }
  0x99   : > { %v6970_v16 = vcombine.low %v825_v1, %v835_v12  ;;  %v6961_v18 = vcombine.low %v676_v49, %v679_v13  ;;  %v1114_v22 = vrot.slane %v1112_v8, 5  ;;  %v1118_v26 = vrot.slane %v1116_v9, 4 }
  0x9a   : > { %v1124_v30 = vrot.slane %v1122_v41, 5  ;;  %v478_v31 = vrot.slane %v476_v14, 4  ;;  %v479_v32 = vshll.u32 %v337_v2, 16  ;;  %v1109_v11 = vor.u32 %v1108_v21, %v1105_v42  ;;  %v601_v14 = vld [vmem:[%s8686_s12 + $0x48] sm:$0xe] }
  0x9b   : > { %3307 = vmatmul.mubr.bf16.gmra.mrb[16].mxu1 %v6970_v16  ;;  %3201 = vmatprep.mubr.bf16.mxu0 %v6961_v18  ;;  %v485_v34 = vshll.u32 %v9034_v29, 16  ;;  %v489_v36 = vshrl.u32 %v9034_v29, 16  ;;  %v495_v35 = vshll.u32 %v9023_v19, 16  ;;  %v1119_v24 = vor.u32 %v1118_v26, %v1114_v22  ;;  %v6844_v16 = vld [vmem:[%s8686_s12 + $0x54] sm:$0xf] }
  0x9c   : > { %v481_v17 = vrot.slane %v479_v32, 5  ;;  %v837_v43 = vshrl.u32 %v9026_v20, 16  ;;  %v840_v44 = vshll.u32 %v9026_v20, 16  ;;  %v1110_v47 = vrot.slane %v1109_v11, 4 }
  0x9d   : > { %v487_v51 = vrot.slane %v485_v34, 5  ;;  %v491_v52 = vrot.slane %v489_v36, 4  ;;  %v497_v46 = vrot.slane %v495_v35, 5  ;;  %v1120_v56 = vrot.slane %v1119_v24, 4 }
  0x9e   : > { %v482_v61 = vor.u32 %v481_v17, %v478_v31  ;;  %v839_v1 = vrot.slane %v837_v43, 5  ;;  %v842_v29 = vrot.slane %v840_v44, 6  ;;  %v1115_v19 = vsel %vm8731_vm7, %v1110_v47, %v1114_v22  ;;  %v340_v43 = vld [vmem:[%s8686_s12 + $0x48] sm:$0xf] }
  0x9f   : > { %v492_v53 = vor.u32 %v491_v52, %v487_v51  ;;  %v845_v48 = vrot.slane %v489_v36, 5  ;;  %v846_v2 = vrot.slane %v485_v34, 6  ;;  %v1125_v20 = vsel %vm8731_vm7, %v1120_v56, %v1124_v30  ;;  %v9093_v30 = vld [vmem:[%s8686_s12 + $0x58] sm:$0xf]  ;;  %v6846_v36 = vld [vmem:[%s8686_s12 + $0x5c] sm:$0x1] }
  0xa0   : > { %v483_v49 = vrot.slane %v482_v61, 4  ;;  %v843_v3 = vor.u32 %v842_v29, %v839_v1  ;;  %v851_v7 = vshrl.u32 %v713_v40, 16  ;;  %v6981_v41 = vcombine.low %v1115_v19, %v1125_v20 }
  0xa1   : > { %v493_v12 = vrot.slane %v492_v53, 4  ;;  %v847_v13 = vor.u32 %v846_v2, %v845_v48  ;;  %v854_v42 = vshll.u32 %v713_v40, 16  ;;  %v6822_v26 = vrot.slane %v601_v14, 9 }
  0xa2   : > { %v488_v18 = vsel %vm8731_vm7, %v483_v49, %v487_v51  ;;  %v844_v21 = vrot.slane %v843_v3, 4  ;;  %v853_v22 = vrot.slane %v851_v7, 5  ;;  %3314 = vmatprep.mubr.bf16.mxu1 %v6981_v41  ;;  %v682_v34 = vrot.slane %v9086_v54, 5 }
  0xa3   : > { %v498_v31 = vsel %vm8731_vm7, %v493_v12, %v497_v46  ;;  %v849_v32 = vrot.slane %v847_v13, 4  ;;  %v856_v11 = vrot.slane %v854_v42, 6  ;;  %v685_v24 = vrot.slane %v9081_v6, 5 }
  0xa4   : > { %v6951_v35 = vcombine.low %v488_v18, %v498_v31  ;;  %v848_v40 = vsel %vm8758_vm8, %v844_v21, %v847_v13  ;;  %v1127_v17 = vshrl.u32 %v6844_v16, 16  ;;  %v683_v47 = vsel %vm8702_vm4, %v6822_v26, %v682_v34 }
  0xa5   : > { %v857_v44 = vor.u32 %v856_v11, %v853_v22  ;;  %v684_v51 = vrot.slane %v682_v34, 4  ;;  %v1130_v52 = vshll.u32 %v6844_v16, 16  ;;  %v1136_v56 = vshll.u32 %v9093_v30, 16  ;;  %v714_v22 = vld [vmem:[%s8686_s12 + $0x50] sm:$0x3] }
  0xa6   : > { %3202 = vmatmul.mubr.bf16.gmra.mrb[20].mxu0 %v6951_v35  ;;  %v1129_v46 = vrot.slane %v1127_v17, 4  ;;  %v1140_v61 = vshrl.u32 %v9093_v30, 16  ;;  %v1146_v1 = vshll.u32 %v6846_v36, 16  ;;  %v500_v48 = vshrl.u32 %v340_v43, 16 }
  0xa7   : > { %v858_v29 = vsel %vm8758_vm8, %v849_v32, %v857_v44  ;;  %v686_v19 = vsel %vm8702_vm4, %v684_v51, %v685_v24  ;;  %v1132_v53 = vrot.slane %v1130_v52, 5  ;;  %v1138_v49 = vrot.slane %v1136_v56, 5  ;;  %v9127_v52 = vld [vmem:[%s8686_s12 + $0x58] sm:$0xf] }
  0xa8   : > { %v6971_v2 = vcombine.low %v848_v40, %v858_v29  ;;  %v6962_v20 = vcombine.low %v683_v47, %v686_v19  ;;  %v1142_v3 = vrot.slane %v1140_v61, 4  ;;  %v1148_v41 = vrot.slane %v1146_v1, 5 }
  0xa9   : > { %v1133_v7 = vor.u32 %v1132_v53, %v1129_v46  ;;  %v502_v12 = vrot.slane %v500_v48, 4  ;;  %v503_v13 = vshll.u32 %v340_v43, 16  ;;  %v509_v16 = vshll.u32 %v9086_v54, 16  ;;  %v9130_v46 = vld [vmem:[%s8686_s12 + $0x54] sm:$0xe] }
  0xaa   : > { %3315 = vmatmul.mubr.bf16.gmra.mrb[20].mxu1 %v6971_v2  ;;  %3209 = vmatprep.mubr.bf16.mxu0 %v6962_v20  ;;  %v1143_v42 = vor.u32 %v1142_v3, %v1138_v49  ;;  %v513_v18 = vshrl.u32 %v9086_v54, 16  ;;  %v519_v21 = vshll.u32 %v9081_v6, 16  ;;  %v860_v32 = vshrl.u32 %v601_v14, 16  ;;  %v9122_v6 = vld [vmem:[%s8686_s12 + $0x5c] sm:$0x1] }
  0xab   : > { %v1134_v26 = vrot.slane %v1133_v7, 4  ;;  %v505_v31 = vrot.slane %v503_v13, 5  ;;  %v863_v11 = vshll.u32 %v601_v14, 16  ;;  %v511_v36 = vrot.slane %v509_v16, 5  ;;  %v6847_v48 = vld [vmem:[%s8686_s12 + $0x60] sm:$0xf] }
  0xac   : > { %v1144_v34 = vrot.slane %v1143_v42, 4  ;;  %v515_v35 = vrot.slane %v513_v18, 4  ;;  %v521_v40 = vrot.slane %v519_v21, 5  ;;  %v862_v54 = vrot.slane %v860_v32, 5  ;;  %v9134_v2 = vld [vmem:[%s8686_s12 + $0x64] sm:$0xf] }
  0xad   : > { %v1139_v24 = vsel %vm8731_vm7, %v1134_v26, %v1138_v49  ;;  %v506_v17 = vor.u32 %v505_v31, %v502_v12  ;;  %v865_v43 = vrot.slane %v863_v11, 6  ;;  %v868_v51 = vrot.slane %v513_v18, 5  ;;  %v343_v32 = vld [vmem:[%s8686_s12 + $0x54] sm:$0xf] }
  0xae   : > { %v1149_v44 = vsel %vm8731_vm7, %v1144_v34, %v1148_v41  ;;  %v516_v47 = vor.u32 %v515_v35, %v511_v36  ;;  %v869_v14 = vrot.slane %v509_v16, 6  ;;  %v874_v53 = vshrl.u32 %v714_v22, 16  ;;  %v6849_v16 = vld [vmem:[%s8686_s12 + $0x68] sm:$0x1] }
  0xaf   : > { %v6982_v1 = vcombine.low %v1139_v24, %v1149_v44  ;;  %v507_v29 = vrot.slane %v506_v17, 4  ;;  %v866_v19 = vor.u32 %v865_v43, %v862_v54  ;;  %v877_v3 = vshll.u32 %v714_v22, 16 }
  0xb0   : > { %v517_v20 = vrot.slane %v516_v47, 4  ;;  %v870_v49 = vor.u32 %v869_v14, %v868_v51  ;;  %v6823_v7 = vrot.slane %v9130_v46, 9  ;;  %v876_v13 = vrot.slane %v874_v53, 5 }
  0xb1   : > { %3322 = vmatprep.mubr.bf16.mxu1 %v6982_v1  ;;  %v512_v41 = vsel %vm8731_vm7, %v507_v29, %v511_v36  ;;  %v867_v12 = vrot.slane %v866_v19, 4  ;;  %v689_v42 = vrot.slane %v9127_v52, 5  ;;  %v879_v26 = vrot.slane %v877_v3, 6 }
  0xb2   : > { %v522_v18 = vsel %vm8731_vm7, %v517_v20, %v521_v40  ;;  %v872_v21 = vrot.slane %v870_v49, 4  ;;  %v692_v31 = vrot.slane %v9122_v6, 5  ;;  %v1151_v24 = vshrl.u32 %v6847_v48, 16 }
  0xb3   : > { %v6952_v22 = vcombine.low %v512_v41, %v522_v18  ;;  %v871_v11 = vsel %vm8758_vm8, %v867_v12, %v870_v49  ;;  %v690_v34 = vsel %vm8702_vm4, %v6823_v7, %v689_v42  ;;  %v691_v36 = vrot.slane %v689_v42, 4  ;;  %v715_v12 = vld [vmem:[%s8686_s12 + $0x5c] sm:$0x3] }
  0xb4   : > { %v880_v35 = vor.u32 %v879_v26, %v876_v13  ;;  %v1154_v17 = vshll.u32 %v6847_v48, 16  ;;  %v1160_v54 = vshll.u32 %v9134_v2, 16  ;;  %v1164_v43 = vshrl.u32 %v9134_v2, 16 }
  0xb5   : > { %3210 = vmatmul.mubr.bf16.gmra.mrb[24].mxu0 %v6952_v22  ;;  %v693_v40 = vsel %vm8702_vm4, %v691_v36, %v692_v31  ;;  %v1170_v44 = vshll.u32 %v6849_v16, 16  ;;  %v524_v47 = vshrl.u32 %v343_v32, 16  ;;  %v1153_v1 = vrot.slane %v1151_v24, 4 }
  0xb6   : > { %v881_v51 = vsel %vm8758_vm8, %v872_v21, %v880_v35  ;;  %v6963_v14 = vcombine.low %v690_v34, %v693_v40  ;;  %v1156_v29 = vrot.slane %v1154_v17, 5  ;;  %v1162_v53 = vrot.slane %v1160_v54, 5  ;;  %v9168_v17 = vld [vmem:[%s8686_s12 + $0x68] sm:$0x1] }
  0xb7   : > { %v6972_v19 = vcombine.low %v871_v11, %v881_v51  ;;  %v1166_v48 = vrot.slane %v1164_v43, 4  ;;  %v1172_v20 = vrot.slane %v1170_v44, 5  ;;  %v526_v3 = vrot.slane %v524_v47, 4  ;;  %v9173_v51 = vld [vmem:[%s8686_s12 + $0x64] sm:$0xf] }
  0xb8   : > { %3217 = vmatprep.mubr.bf16.mxu0 %v6963_v14  ;;  %v1157_v49 = vor.u32 %v1156_v29, %v1153_v1  ;;  %v527_v7 = vshll.u32 %v343_v32, 16  ;;  %v533_v41 = vshll.u32 %v9127_v52, 16  ;;  %v537_v42 = vshrl.u32 %v9127_v52, 16  ;;  %v603_v14 = vld [vmem:[%s8686_s12 + $0x60] sm:$0xe] }
  0xb9   : > { %3323 = vmatmul.mubr.bf16.gmra.mrb[24].mxu1 %v6972_v19  ;;  %v1167_v13 = vor.u32 %v1166_v48, %v1162_v53  ;;  %v543_v16 = vshll.u32 %v9122_v6, 16  ;;  %v883_v18 = vshrl.u32 %v9130_v46, 16  ;;  %v886_v22 = vshll.u32 %v9130_v46, 16  ;;  %v6850_v1 = vld [vmem:[%s8686_s12 + $0x6c] sm:$0xf] }
  0xba   : > { %v1158_v21 = vrot.slane %v1157_v49, 4  ;;  %v529_v26 = vrot.slane %v527_v7, 5  ;;  %v535_v31 = vrot.slane %v533_v41, 5  ;;  %v539_v11 = vrot.slane %v537_v42, 4  ;;  %v9178_v49 = vld [vmem:[%s8686_s12 + $0x70] sm:$0xf] }
  0xbb   : > { %v1168_v32 = vrot.slane %v1167_v13, 4  ;;  %v545_v34 = vrot.slane %v543_v16, 5  ;;  %v885_v36 = vrot.slane %v883_v18, 5  ;;  %v888_v6 = vrot.slane %v886_v22, 6 }
  0xbc   : > { %v1163_v35 = vsel %vm8731_vm7, %v1158_v21, %v1162_v53  ;;  %v530_v52 = vor.u32 %v529_v26, %v526_v3  ;;  %v891_v24 = vrot.slane %v537_v42, 5  ;;  %v540_v44 = vor.u32 %v539_v11, %v535_v31  ;;  %v6852_v21 = vld [vmem:[%s8686_s12 + $0x74] sm:$0x1]  ;;  %v346_v11 = vld [vmem:[%s8686_s12 + $0x60] sm:$0xf] }
  0xbd   : > { %v1173_v40 = vsel %vm8731_vm7, %v1168_v32, %v1172_v20  ;;  %v892_v47 = vrot.slane %v533_v41, 6  ;;  %v897_v46 = vshrl.u32 %v715_v12, 16  ;;  %v889_v53 = vor.u32 %v888_v6, %v885_v36 }
  0xbe   : > { %v6983_v29 = vcombine.low %v1163_v35, %v1173_v40  ;;  %v531_v19 = vrot.slane %v530_v52, 4  ;;  %v900_v48 = vshll.u32 %v715_v12, 16  ;;  %v541_v3 = vrot.slane %v540_v44, 4 }
  0xbf   : > { %v893_v7 = vor.u32 %v892_v47, %v891_v24  ;;  %v899_v13 = vrot.slane %v897_v46, 5  ;;  %v6824_v42 = vrot.slane %v603_v14, 9  ;;  %v890_v41 = vrot.slane %v889_v53, 4 }
  0xc0   : > { %3330 = vmatprep.mubr.bf16.mxu1 %v6983_v29  ;;  %v536_v20 = vsel %vm8731_vm7, %v531_v19, %v535_v31  ;;  %v902_v16 = vrot.slane %v900_v48, 6  ;;  %v696_v18 = vrot.slane %v9173_v51, 5  ;;  %v546_v26 = vsel %vm8731_vm7, %v541_v3, %v545_v34 }
  0xc1   : > { %v895_v12 = vrot.slane %v893_v7, 4  ;;  %v699_v22 = vrot.slane %v9168_v17, 5  ;;  %v1175_v32 = vshrl.u32 %v6850_v1, 16  ;;  %v6953_v36 = vcombine.low %v536_v20, %v546_v26 }
  0xc2   : > { %v894_v35 = vsel %vm8758_vm8, %v890_v41, %v893_v7  ;;  %v903_v52 = vor.u32 %v902_v16, %v899_v13  ;;  %v697_v31 = vsel %vm8702_vm4, %v6824_v42, %v696_v18  ;;  %v698_v6 = vrot.slane %v696_v18, 4 }
  0xc3   : > { %v1177_v24 = vrot.slane %v1175_v32, 4  ;;  %v1178_v40 = vshll.u32 %v6850_v1, 16  ;;  %v1184_v44 = vshll.u32 %v9178_v49, 16  ;;  %3218 = vmatmul.mubr.bf16.gmra.mrb[28].mxu0 %v6953_v36  ;;  %v1188_v47 = vshrl.u32 %v9178_v49, 16  ;;  %v9618_v49 = vld [vmem:[%s8686_s12 + $0x78] sm:$0xe] }
  0xc4   : > { %v904_v34 = vsel %vm8758_vm8, %v895_v12, %v903_v52  ;;  %v1194_v46 = vshll.u32 %v6852_v21, 16  ;;  %v548_v29 = vshrl.u32 %v346_v11, 16  ;;  %v700_v53 = vsel %vm8702_vm4, %v698_v6, %v699_v22 }
  0xc5   : > { %v6973_v19 = vcombine.low %v894_v35, %v904_v34  ;;  %v1180_v48 = vrot.slane %v1178_v40, 5  ;;  %v1186_v3 = vrot.slane %v1184_v44, 5  ;;  %v6964_v7 = vcombine.low %v697_v31, %v700_v53  ;;  %v716_v31 = vld [vmem:[%s8686_s12 + $0x68] sm:$0x3] }
  0xc6   : > { %v1190_v1 = vrot.slane %v1188_v47, 4  ;;  %v1196_v13 = vrot.slane %v1194_v46, 5  ;;  %v550_v42 = vrot.slane %v548_v29, 4  ;;  %v551_v41 = vshll.u32 %v346_v11, 16  ;;  %v351_v29 = vld [vmem:[%s8686_s12 + $0x74] sm:$0x1] }
  0xc7   : > { %3331 = vmatmul.mubr.bf16.gmra.mrb[28].mxu1 %v6973_v19  ;;  %v1181_v20 = vor.u32 %v1180_v48, %v1177_v24  ;;  %v557_v16 = vshll.u32 %v9173_v51, 16  ;;  %v561_v18 = vshrl.u32 %v9173_v51, 16  ;;  %3225 = vmatprep.mubr.bf16.mxu0 %v6964_v7  ;;  %v567_v26 = vshll.u32 %v9168_v17, 16  ;;  %v9212_v7 = vld [vmem:[%s8686_s12 + $0x70] sm:$0xf] }
  0xc8   : > { %v1191_v21 = vor.u32 %v1190_v1, %v1186_v3  ;;  %v906_v12 = vshrl.u32 %v603_v14, 16  ;;  %v909_v22 = vshll.u32 %v603_v14, 16  ;;  %v553_v36 = vrot.slane %v551_v41, 5 }
  0xc9   : > { %v1182_v32 = vrot.slane %v1181_v20, 4  ;;  %v559_v35 = vrot.slane %v557_v16, 5  ;;  %v563_v52 = vrot.slane %v561_v18, 4  ;;  %v569_v24 = vrot.slane %v567_v26, 5 }
  0xca   : > { %v1192_v6 = vrot.slane %v1191_v21, 4  ;;  %v908_v11 = vrot.slane %v906_v12, 5  ;;  %v911_v40 = vrot.slane %v909_v22, 6  ;;  %v554_v34 = vor.u32 %v553_v36, %v550_v42  ;;  %v6853_v22 = vld [vmem:[%s8686_s12 + $0x78] sm:$0xf] }
  0xcb   : > { %v1187_v51 = vsel %vm8731_vm7, %v1182_v32, %v1186_v3  ;;  %v564_v46 = vor.u32 %v563_v52, %v559_v35  ;;  %v914_v17 = vrot.slane %v561_v18, 5  ;;  %v915_v53 = vrot.slane %v557_v16, 6  ;;  %v604_v3 = vld [vmem:[%s8686_s12 + $0x6c] sm:$0xe]  ;;  %v9222_v52 = vld [vmem:[%s8686_s12 + $0x7c] sm:$0xf] }
  0xcc   : > { %v1197_v14 = vsel %vm8731_vm7, %v1192_v6, %v1196_v13  ;;  %v912_v19 = vor.u32 %v911_v40, %v908_v11  ;;  %v920_v48 = vshrl.u32 %v716_v31, 16  ;;  %v555_v20 = vrot.slane %v554_v34, 4  ;;  %v349_v34 = vld [vmem:[%s8686_s12 + $0x6c] sm:$0xf] }
  0xcd   : > { %v6984_v1 = vcombine.low %v1187_v51, %v1197_v14  ;;  %v565_v41 = vrot.slane %v564_v46, 4  ;;  %v923_v21 = vshll.u32 %v716_v31, 16  ;;  %v916_v18 = vor.u32 %v915_v53, %v914_v17  ;;  %v6855_v31 = vld [vmem:[%s8686_s12 + $0x80] sm:$0x1] }
  0xce   : > { %v913_v42 = vrot.slane %v912_v19, 4  ;;  %v922_v26 = vrot.slane %v920_v48, 5  ;;  %v6825_v12 = vrot.slane %v604_v3, 9  ;;  %v560_v13 = vsel %vm8731_vm7, %v555_v20, %v559_v35 }
  0xcf   : > { %3338 = vmatprep.mubr.bf16.mxu1 %v6984_v1  ;;  %v570_v16 = vsel %vm8731_vm7, %v565_v41, %v569_v24  ;;  %v925_v32 = vrot.slane %v923_v21, 6  ;;  %v703_v36 = vrot.slane %v9212_v7, 5  ;;  %v918_v40 = vrot.slane %v916_v18, 4 }
  0xd0   : > { %v6954_v6 = vcombine.low %v560_v13, %v570_v16  ;;  %v917_v11 = vsel %vm8758_vm8, %v913_v42, %v916_v18  ;;  %v706_v51 = vrot.slane %v351_v29, 5  ;;  %v1199_v14 = vshrl.u32 %v6853_v22, 16 }
  0xd1   : > { %v926_v46 = vor.u32 %v925_v32, %v922_v26  ;;  %v704_v35 = vsel %vm8702_vm4, %v6825_v12, %v703_v36  ;;  %v705_v17 = vrot.slane %v703_v36, 4  ;;  %v1202_v24 = vshll.u32 %v6853_v22, 16 }
  0xd2   : > { %3226 = vmatmul.mubr.bf16.gmra.mrb[32].mxu0 %v6954_v6  ;;  %v1208_v19 = vshll.u32 %v9222_v52, 16  ;;  %v1212_v53 = vshrl.u32 %v9222_v52, 16  ;;  %v1218_v48 = vshll.u32 %v6855_v31, 16  ;;  %v1201_v41 = vrot.slane %v1199_v14, 4 }
  0xd3   : > { %v927_v1 = vsel %vm8758_vm8, %v918_v40, %v926_v46  ;;  %v707_v20 = vsel %vm8702_vm4, %v705_v17, %v706_v51  ;;  %v572_v21 = vshrl.u32 %v349_v34, 16  ;;  %v1204_v26 = vrot.slane %v1202_v24, 5 }
  0xd4   : > { %v6974_v42 = vcombine.low %v917_v11, %v927_v1  ;;  %v6965_v18 = vcombine.low %v704_v35, %v707_v20  ;;  %v1210_v12 = vrot.slane %v1208_v19, 5  ;;  %v1214_v22 = vrot.slane %v1212_v53, 4  ;;  %v717_v1 = vld [vmem:[%s8686_s12 + $0x74] sm:$0x3] }
  0xd5   : > { %v1220_v13 = vrot.slane %v1218_v48, 5  ;;  %v574_v16 = vrot.slane %v572_v21, 4  ;;  %v575_v32 = vshll.u32 %v349_v34, 16  ;;  %v1205_v36 = vor.u32 %v1204_v26, %v1201_v41 }
  0xd6   : > { %3339 = vmatmul.mubr.bf16.gmra.mrb[32].mxu1 %v6974_v42  ;;  %3233 = vmatprep.mubr.bf16.mxu0 %v6965_v18  ;;  %v581_v31 = vshll.u32 %v9212_v7, 16  ;;  %v585_v6 = vshrl.u32 %v9212_v7, 16  ;;  %v591_v11 = vshll.u32 %v351_v29, 16  ;;  %v1215_v40 = vor.u32 %v1214_v22, %v1210_v12 }
  0xd7   : > { %v577_v51 = vrot.slane %v575_v32, 5  ;;  %v929_v46 = vshrl.u32 %v604_v3, 16  ;;  %v932_v35 = vshll.u32 %v604_v3, 16  ;;  %v1206_v17 = vrot.slane %v1205_v36, 4  ;;  %v6856_v36 = vld [vmem:[%s8686_s12 + $0xc] sm:$0xe] }
  0xd8   : > { %v583_v14 = vrot.slane %v581_v31, 5  ;;  %v587_v24 = vrot.slane %v585_v6, 4  ;;  %v593_v48 = vrot.slane %v591_v11, 5  ;;  %v1216_v20 = vrot.slane %v1215_v40, 4 }
  0xd9   : > { %v578_v34 = vor.u32 %v577_v51, %v574_v16  ;;  %v931_v21 = vrot.slane %v929_v46, 5  ;;  %v934_v42 = vrot.slane %v932_v35, 6  ;;  %v1211_v41 = vsel %vm8731_vm7, %v1206_v17, %v1210_v12 }
  0xda   : > { %v588_v18 = vor.u32 %v587_v24, %v583_v14  ;;  %v937_v29 = vrot.slane %v585_v6, 5  ;;  %v938_v7 = vrot.slane %v581_v31, 6  ;;  %v1221_v3 = vsel %vm8731_vm7, %v1216_v20, %v1220_v13  ;;  %v6876_v6 = vld [vmem:[%s8686_s12 + $0x14] sm:$0x3] }
  0xdb   : > { %v579_v26 = vrot.slane %v578_v34, 4  ;;  %v935_v22 = vor.u32 %v934_v42, %v931_v21  ;;  %v943_v32 = vshrl.u32 %v717_v1, 16  ;;  %v6985_v11 = vcombine.low %v1211_v41, %v1221_v3  ;;  %v9254_v34 = vld [vmem:[%s8686_s12 + $0x1c] sm:$0xf] }
  0xdc   : > { %v589_v40 = vrot.slane %v588_v18, 4  ;;  %v939_v16 = vor.u32 %v938_v7, %v937_v29  ;;  %v946_v51 = vshll.u32 %v717_v1, 16  ;;  %v6866_v17 = vrot.slane %v6856_v36, 9 }
  0xdd   : > { %v584_v46 = vsel %vm8731_vm7, %v579_v26, %v583_v14  ;;  %v936_v12 = vrot.slane %v935_v22, 4  ;;  %v945_v35 = vrot.slane %v943_v32, 5  ;;  %3346 = vmatprep.mubr.bf16.mxu1 %v6985_v11  ;;  %v1343_v20 = vshrl.u32 %v6856_v36, 16  ;;  %v6888_v22 = vld [vmem:[%s8686_s12 + $0x20] sm:$0x1] }
  0xde   : > { %v594_v13 = vsel %vm8731_vm7, %v589_v40, %v593_v48  ;;  %v941_v31 = vrot.slane %v939_v16, 4  ;;  %v948_v24 = vrot.slane %v946_v51, 6  ;;  %v1346_v14 = vshll.u32 %v6856_v36, 16  ;;  %v6916_v36 = vld [vmem:[%s8686_s12 + $0x18] sm:$0xe] }
  0xdf   : > { %v6955_v21 = vcombine.low %v584_v46, %v594_v13  ;;  %v940_v1 = vsel %vm8758_vm8, %v936_v12, %v939_v16  ;;  %v1351_v42 = vrot.slane %v996_v59, 5  ;;  %v1345_v18 = vrot.slane %v1343_v20, 5  ;;  %v6886_v51 = vld [vmem:[%s8686_s12 + $0x18] sm:$0xf] }
  0xe0   : > { %v949_v41 = vor.u32 %v948_v24, %v945_v35  ;;  %v1357_v29 = vshrl.u32 %v6876_v6, 16  ;;  %v1360_v48 = vshll.u32 %v6876_v6, 16  ;;  %v1348_v7 = vrot.slane %v1346_v14, 6 }
  0xe1   : > { %3234 = vmatmul.mubr.bf16.gmra.mrb[36].mxu0 %v6955_v21  ;;  %v1353_v3 = vor.u32 %v8727_v4, %v1351_v42  ;;  %v1265_v26 = vsel %vm8702_vm4, %v6866_v17, %v1264_v63  ;;  %v11130_v32 = vshll.u32 %v9254_v34, 16  ;;  %v11133_v35 = vshrl.u32 %v9254_v34, 16 }
  0xe2   : > { %v950_v59 = vsel %vm8758_vm8, %v941_v31, %v949_v41  ;;  %v1359_v11 = vrot.slane %v1357_v29, 5  ;;  %v1362_v40 = vrot.slane %v1360_v48, 6  ;;  %v6986_v16 = vcombine.low %v1265_v26, %v8740_v15  ;;  %v6857_v15 = vld [vmem:[%s8686_s12 + $0x18] sm:$0xe] }
  0xe3   : > { %v6975_v46 = vcombine.low %v940_v1, %v950_v59  ;;  %v1349_v4 = vor.u32 %v1348_v7, %v1345_v18  ;;  %v1355_v12 = vrot.slane %v1353_v3, 4  ;;  %v1615_v45 = vrot.slane %v11130_v32, 5 }
  0xe4   : > { %v1363_v63 = vor.u32 %v1362_v40, %v1359_v11  ;;  %v1623_v17 = vshll.u32 %v6888_v22, 16  ;;  %v6926_v6 = vrot.slane %v6916_v36, 9  ;;  %v1885_v31 = vrot.slane %v9254_v34, 5  ;;  %v6877_v36 = vld [vmem:[%s8686_s12 + $0x20] sm:$0x3] }
  0xe5   : > { %3347 = vmatmul.mubr.bf16.gmra.mrb[36].mxu1 %v6975_v46  ;;  %v1350_v13 = vrot.slane %v1349_v4, 4  ;;  %v1888_v24 = vrot.slane %v6888_v22, 5  ;;  %v1604_v20 = vshrl.u32 %v6886_v51, 16  ;;  %v1619_v1 = vrot.slane %v11133_v35, 4  ;;  %v8178_v46 = vld [vmem:[%s11104_s1 + $0x208] sm:$0xff]  }
  0xe6   : > { %v1364_v21 = vsel %vm8758_vm8, %v1355_v12, %v1363_v63  ;;  %v1625_v14 = vrot.slane %v1623_v17, 5  ;;  %v1607_v42 = vshll.u32 %v6886_v51, 16  ;;  %v1886_v18 = vsel %vm8702_vm4, %v6926_v6, %v1885_v31 }
  0xe7   : > { %v1354_v41 = vsel %vm8758_vm8, %v1350_v13, %v1353_v3  ;;  %v1887_v29 = vrot.slane %v1885_v31, 4  ;;  %v1606_v48 = vrot.slane %v1604_v20, 4  ;;  %v1620_v22 = vor.u32 %v1619_v1, %v1615_v45  ;;  %v8185_v20 = vld [vmem:[%s8686_s12 + $0x1c] sm:$0xf]  ;;  %v6917_v1 = vld [vmem:[%s8686_s12 + $0x24] sm:$0xe] }
  0xe8   : > { %v6996_v7 = vcombine.low %v1354_v41, %v1364_v21  ;;  %v1609_v26 = vrot.slane %v1607_v42, 5  ;;  %v1366_v59 = vshrl.u32 %v6857_v15, 16  ;;  %v1369_v40 = vshll.u32 %v6857_v15, 16 }
  0xe9   : > { %v1889_v11 = vsel %vm8702_vm4, %v1887_v29, %v1888_v24  ;;  %v1374_v51 = vrot.slane %v1020_v0, 5  ;;  %v1375_v3 = vrot.slane %v1016_v62, 6  ;;  %v1621_v63 = vrot.slane %v1620_v22, 4  ;;  %v6891_v29 = vld [vmem:[%s8686_s12 + $0x2c] sm:$0x1] }
  0xea   : > { %3387 = vmatprep.mubr.bf16.mxu0 %v6996_v7  ;;  %v7016_v4 = vcombine.low %v1886_v18, %v1889_v11  ;;  %v1610_v12 = vor.u32 %v1609_v26, %v1606_v48  ;;  %v1368_v17 = vrot.slane %v1366_v59, 5  ;;  %v1371_v6 = vrot.slane %v1369_v40, 6  ;;  %v8186_v7 = vld [vmem:[%s8686_s12 + $0x20] sm:$0x1]  ;;  %v6890_v11 = vld [vmem:[%s8686_s12 + $0x28] sm:$0xf] }
  0xeb   : > { %3388 = vmatmul.mubr.bf16.vlgmr.msra.gmra.mrb[40].mxu0 %v6986_v16  ;;  %v1376_v13 = vor.u32 %v1375_v3, %v1374_v51  ;;  %v1380_v31 = vshrl.u32 %v6877_v36, 16  ;;  %v1383_v0 = vshll.u32 %v6877_v36, 16  ;;  %v1626_v62 = vsel %vm8731_vm7, %v1621_v63, %v1625_v14  ;;  %v6889_v63 = vld [vmem:[%s8686_s12 + $0x24] sm:$0xf] }
  0xec   : > { %3500 = vmatprep.mubr.bf16.mxu1 %v7016_v4  ;;  %7957 = vmatpush3.bf16.msra.mxu0 %v9048_v50  ;;  %v1611_v37 = vrot.slane %v1610_v12, 4  ;;  %v6867_v24 = vrot.slane %v6857_v15, 9  ;;  %v1271_v21 = vrot.slane %v8185_v20, 5  ;;  %v1372_v42 = vor.u32 %v1371_v6, %v1368_v17  ;;  %v8179_v50 = vld [vmem:[%s11104_s1 + $0x210] sm:$0xff]  }
  0xed   : > { %v1378_v16 = vrot.slane %v1376_v13, 4  ;;  %v1382_v41 = vrot.slane %v1380_v31, 5  ;;  %v1385_v18 = vrot.slane %v1383_v0, 6  ;;  %7958 = vmatprep.subr.bf16.mxu0 %v8178_v46  ;;  %v1274_v26 = vrot.slane %v8186_v7, 5  ;;  %v9318_v0 = vld [vmem:[%s8686_s12 + $0x24] sm:$0xe] }
  0xee   : > { %v1616_v48 = vsel %vm8731_vm7, %v1611_v37, %v1615_v45  ;;  %v1272_v15 = vsel %vm8702_vm4, %v6867_v24, %v1271_v21  ;;  %v1273_v14 = vrot.slane %v1271_v21, 4  ;;  %v1373_v36 = vrot.slane %v1372_v42, 4  ;;  %v8180_v37 = vld [vmem:[%s11104_s1 + $0x218] sm:$0xff]  }
  0xef   : > { %v7006_v22 = vcombine.low %v1616_v48, %v1626_v62  ;;  %v1386_v59 = vor.u32 %v1385_v18, %v1382_v41  ;;  %v6927_v40 = vrot.slane %v6917_v1, 9  ;;  %v1892_v3 = vrot.slane %v6890_v11, 5 }
  0xf0   : > { %v1275_v51 = vsel %vm8702_vm4, %v1273_v14, %v1274_v26  ;;  %v1895_v4 = vrot.slane %v6891_v29, 5  ;;  %v1987_v12 = vshrl.u32 %v6917_v1, 16  ;;  %7959 = vmatpush3.bf16.msra.mxu0 %v8178_v46  ;;  %v1377_v45 = vsel %vm8758_vm8, %v1373_v36, %v1376_v13 }
  0xf1   : > { %3501 = vmatmul.mubr.bf16.vlgmr.msra.gmra.mrb[40].mxu1 %v7006_v22  ;;  %v1387_v17 = vsel %vm8758_vm8, %v1378_v16, %v1386_v59  ;;  %v6987_v6 = vcombine.low %v1272_v15, %v1275_v51  ;;  %v1990_v31 = vshll.u32 %v6917_v1, 16  ;;  %7960 = vmatprep.subr.bf16.mxu0 %v8179_v50  ;;  %v1893_v46 = vsel %vm8702_vm4, %v6927_v40, %v1892_v3  ;;  %v8181_v22 = vld [vmem:[%s11104_s1 + $0x220] sm:$0xff]  }
  0xf2   : > { %v6997_v62 = vcombine.low %v1377_v45, %v1387_v17  ;;  %v1894_v24 = vrot.slane %v1892_v3, 4  ;;  %v1989_v20 = vrot.slane %v1987_v12, 5  ;;  %v1628_v13 = vshrl.u32 %v6889_v63, 16  ;;  %v6878_v3 = vld [vmem:[%s8686_s12 + $0x2c] sm:$0x3] }
  0xf3   : > { %v1992_v21 = vrot.slane %v1990_v31, 6  ;;  %v1631_v42 = vshll.u32 %v6889_v63, 16  ;;  %v1637_v41 = vshll.u32 %v6890_v11, 16  ;;  %v1641_v16 = vshrl.u32 %v6890_v11, 16 }
  0xf4   : > { %3395 = vmatprep.mubr.bf16.mxu0 %v6997_v62  ;;  %v1896_v1 = vsel %vm8702_vm4, %v1894_v24, %v1895_v4  ;;  %v1647_v18 = vshll.u32 %v6891_v29, 16  ;;  %v1389_v48 = vshrl.u32 %v9318_v0, 16  ;;  %7961 = vmatpush3.bf16.msra.mxu0 %v8179_v50  ;;  %v1630_v7 = vrot.slane %v1628_v13, 4  ;;  %v8182_v24 = vld [vmem:[%s11104_s1 + $0x228] sm:$0xff]  }
  0xf5   : > { %3396 = vmatmul.mubr.bf16.gmra.mrb[44].mxu0 %v6987_v6  ;;  %v1993_v15 = vor.u32 %v1992_v21, %v1989_v20  ;;  %v7017_v14 = vcombine.low %v1893_v46, %v1896_v1  ;;  %v1633_v26 = vrot.slane %v1631_v42, 5  ;;  %7962 = vmatprep.subr.bf16.mxu0 %v8180_v37  ;;  %v1639_v36 = vrot.slane %v1637_v41, 5 }
  0xf6   : > { %v1643_v59 = vrot.slane %v1641_v16, 4  ;;  %v1649_v40 = vrot.slane %v1647_v18, 5  ;;  %v1995_v51 = vrot.slane %v1641_v16, 5  ;;  %v1996_v50 = vrot.slane %v1637_v41, 6  ;;  %v8187_v41 = vld [vmem:[%s8686_s12 + $0x28] sm:$0xf] }
  0xf7   : > { %v9332_v11 = vrot.slane %v1993_v15, 4  ;;  %3508 = vmatprep.mubr.bf16.mxu1 %v7017_v14  ;;  %v1634_v29 = vor.u32 %v1633_v26, %v1630_v7  ;;  %v1391_v4 = vrot.slane %v1389_v48, 5  ;;  %v1392_v63 = vshll.u32 %v9318_v0, 16  ;;  %v6918_v16 = vld [vmem:[%s8686_s12 + $0x30] sm:$0xe] }
  0xf8   : > { %v1644_v12 = vor.u32 %v1643_v59, %v1639_v36  ;;  %v1397_v45 = vrot.slane %v1044_v28, 5  ;;  %v1398_v17 = vrot.slane %v1040_v27, 6  ;;  %7963 = vmatpush3.bf16.msra.mxu0 %v8180_v37  ;;  %v9339_v31 = vor.u32 %v1996_v50, %v1995_v51  ;;  %v6894_v27 = vld [vmem:[%s8686_s12 + $0x38] sm:$0x1]  ;;  %v8188_v14 = vld [vmem:[%s8686_s12 + $0x2c] sm:$0x1] }
  0xf9   : > { %v1635_v6 = vrot.slane %v1634_v29, 4  ;;  %v1403_v62 = vshrl.u32 %v6878_v3, 16  ;;  %v1406_v46 = vshll.u32 %v6878_v3, 16  ;;  %7964 = vmatprep.subr.bf16.mxu0 %v8181_v22  ;;  %v1394_v28 = vrot.slane %v1392_v63, 6  ;;  %v6892_v26 = vld [vmem:[%s8686_s12 + $0x30] sm:$0xf] }
  0xfa   : > { %v1645_v20 = vrot.slane %v1644_v12, 4  ;;  %v1399_v21 = vor.u32 %v1398_v17, %v1397_v45  ;;  %v6868_v60 = vrot.slane %v9318_v0, 9  ;;  %v1278_v1 = vrot.slane %v8187_v41, 5  ;;  %v9357_v3 = vld [vmem:[%s8686_s12 + $0x34] sm:$0xf] }
  0xfb   : > { %v1640_v37 = vsel %vm8731_vm7, %v1635_v6, %v1639_v36  ;;  %v1405_v13 = vrot.slane %v1403_v62, 5  ;;  %v1408_v42 = vrot.slane %v1406_v46, 6  ;;  %v1395_v48 = vor.u32 %v1394_v28, %v1391_v4  ;;  %v6859_v6 = vld [vmem:[%s8686_s12 + $0x30] sm:$0xe] }
  0xfc   : > { %v1650_v18 = vsel %vm8731_vm7, %v1645_v20, %v1649_v40  ;;  %v1401_v15 = vrot.slane %v1399_v21, 4  ;;  %v1281_v7 = vrot.slane %v8188_v14, 5  ;;  %7965 = vmatpush3.bf16.msra.mxu0 %v8181_v22  ;;  %v1279_v36 = vsel %vm8702_vm4, %v6868_v60, %v1278_v1  ;;  %v8183_v40 = vld [vmem:[%s11104_s1 + $0x230] sm:$0xff]  }
  0xfd   : > { %v7007_v0 = vcombine.low %v1640_v37, %v1650_v18  ;;  %v1409_v59 = vor.u32 %v1408_v42, %v1405_v13  ;;  %v1280_v51 = vrot.slane %v1278_v1, 4  ;;  %7966 = vmatprep.subr.bf16.mxu0 %v8182_v24  ;;  %v1396_v29 = vrot.slane %v1395_v48, 4  ;;  %v6879_v18 = vld [vmem:[%s8686_s12 + $0x38] sm:$0x3] }
  0xfe   : > { %v6928_v50 = vrot.slane %v6918_v16, 9  ;;  %v1899_v4 = vrot.slane %v9357_v3, 5  ;;  %v1902_v12 = vrot.slane %v6894_v27, 5  ;;  %v1652_v45 = vshrl.u32 %v6892_v26, 16  ;;  %v8184_v48 = vld [vmem:[%s11104_s1 + $0x238] sm:$0xff]  }
  0xff   : > { %3509 = vmatmul.mubr.bf16.gmra.mrb[44].mxu1 %v7007_v0  ;;  %v1410_v22 = vsel %vm8758_vm8, %v1401_v15, %v1409_v59  ;;  %v1282_v63 = vsel %vm8702_vm4, %v1280_v51, %v1281_v7  ;;  %v1655_v17 = vshll.u32 %v6892_v26, 16  ;;  %v1400_v62 = vsel %vm8758_vm8, %v1396_v29, %v1399_v21 }
 0x100   : > { %v6988_v46 = vcombine.low %v1279_v36, %v1282_v63  ;;  %v1900_v20 = vsel %vm8702_vm4, %v6928_v50, %v1899_v4  ;;  %v1901_v28 = vrot.slane %v1899_v4, 4  ;;  %7967 = vmatpush3.bf16.msra.mxu0 %v8182_v24  ;;  %v6998_v60 = vcombine.low %v1400_v62, %v1410_v22  ;;  %v8189_v63 = vld [vmem:[%s8686_s12 + $0x34] sm:$0xf] }
 0x101   : > { %v1654_v37 = vrot.slane %v1652_v45, 4  ;;  %v1657_v13 = vrot.slane %v1655_v17, 5  ;;  %v11128_v42 = vshll.u32 %v9357_v3, 16  ;;  %7968 = vmatprep.subr.bf16.mxu0 %v8183_v40  ;;  %v11129_v1 = vshrl.u32 %v9357_v3, 16  ;;  %v9390_v17 = vld [vmem:[%s8686_s12 + $0x3c] sm:$0xe] }
 0x102   : > { %v1903_v41 = vsel %vm8702_vm4, %v1901_v28, %v1902_v12  ;;  %v1671_v16 = vshll.u32 %v6894_v27, 16  ;;  %v1412_v21 = vshrl.u32 %v6859_v6, 16  ;;  %3403 = vmatprep.mubr.bf16.mxu0 %v6998_v60  ;;  %v1415_v7 = vshll.u32 %v6859_v6, 16  ;;  %v6895_v60 = vld [vmem:[%s8686_s12 + $0x3c] sm:$0xf] }
 0x103   : > { %v7018_v24 = vcombine.low %v1900_v20, %v1903_v41  ;;  %v1658_v15 = vor.u32 %v1657_v13, %v1654_v37  ;;  %v1663_v14 = vrot.slane %v11128_v42, 5  ;;  %3404 = vmatmul.mubr.bf16.gmra.mrb[48].mxu0 %v6988_v46  ;;  %v1667_v26 = vrot.slane %v11129_v1, 4  ;;  %v8190_v41 = vld [vmem:[%s8686_s12 + $0x38] sm:$0x1]  ;;  %v6885_v1 = vld [vmem:[%s8686_s12 + $0x80] sm:$0x3] }
 0x104   : > { %v1673_v27 = vrot.slane %v1671_v16, 5  ;;  %v1414_v0 = vrot.slane %v1412_v21, 5  ;;  %v1420_v59 = vrot.slane %v1068_v57, 5  ;;  %v1417_v51 = vrot.slane %v1415_v7, 6  ;;  %7969 = vmatpush3.bf16.msra.mxu0 %v8183_v40 }
 0x105   : > { %3516 = vmatprep.mubr.bf16.mxu1 %v7018_v24  ;;  %v1659_v36 = vrot.slane %v1658_v15, 4  ;;  %v1421_v29 = vrot.slane %v1064_v55, 6  ;;  %v1426_v50 = vshrl.u32 %v6879_v18, 16  ;;  %v1668_v4 = vor.u32 %v1667_v26, %v1663_v14  ;;  %7970 = vmatprep.subr.bf16.mxu0 %v8184_v48  ;;  %v6897_v55 = vld [vmem:[%s8686_s12 + $0x44] sm:$0x1] }
 0x106   : > { %v1429_v12 = vshll.u32 %v6879_v18, 16  ;;  %v6869_v22 = vrot.slane %v6859_v6, 9  ;;  %v1285_v45 = vrot.slane %v8189_v63, 5  ;;  %v1418_v62 = vor.u32 %v1417_v51, %v1414_v0  ;;  %v9400_v18 = vld [vmem:[%s8686_s12 + $0x40] sm:$0xf] }
 0x107   : > { %v1664_v57 = vsel %vm8731_vm7, %v1659_v36, %v1663_v14  ;;  %v1422_v46 = vor.u32 %v1421_v29, %v1420_v59  ;;  %v1428_v25 = vrot.slane %v1426_v50, 5  ;;  %v1669_v20 = vrot.slane %v1668_v4, 4  ;;  %v6860_v51 = vld [vmem:[%s8686_s12 + $0x3c] sm:$0xe] }
 0x108   : > { %v1431_v40 = vrot.slane %v1429_v12, 6  ;;  %v1286_v28 = vsel %vm8702_vm4, %v6869_v22, %v1285_v45  ;;  %v1287_v6 = vrot.slane %v1285_v45, 4  ;;  %v1419_v37 = vrot.slane %v1418_v62, 4  ;;  %7971 = vmatpush3.bf16.msra.mxu0 %v8184_v48 }
 0x109   : > { %v1424_v13 = vrot.slane %v1422_v46, 4  ;;  %v1288_v16 = vrot.slane %v8190_v41, 5  ;;  %v6929_v21 = vrot.slane %v9390_v17, 9  ;;  %v1674_v24 = vsel %vm8731_vm7, %v1669_v20, %v1673_v27 }
 0x10a   : > { %v1432_v15 = vor.u32 %v1431_v40, %v1428_v25  ;;  %v1906_v14 = vrot.slane %v9400_v18, 5  ;;  %v1909_v7 = vrot.slane %v6897_v55, 5  ;;  %v7008_v26 = vcombine.low %v1664_v57, %v1674_v24 }
 0x10b   : > { %v1423_v0 = vsel %vm8758_vm8, %v1419_v37, %v1422_v46  ;;  %v1289_v59 = vsel %vm8702_vm4, %v1287_v6, %v1288_v16  ;;  %v1676_v36 = vshrl.u32 %v6895_v60, 16  ;;  %v1679_v22 = vshll.u32 %v6895_v60, 16  ;;  %v6880_v46 = vld [vmem:[%s8686_s12 + $0x44] sm:$0x3] }
 0x10c   : > { %v1433_v48 = vsel %vm8758_vm8, %v1424_v13, %v1432_v15  ;;  %v6989_v29 = vcombine.low %v1286_v28, %v1289_v59  ;;  %v1907_v27 = vsel %vm8702_vm4, %v6929_v21, %v1906_v14  ;;  %v1908_v50 = vrot.slane %v1906_v14, 4  ;;  %3517 = vmatmul.mubr.bf16.gmra.mrb[48].mxu1 %v7008_v26  ;;  %v8191_v26 = vld [vmem:[%s8686_s12 + $0x40] sm:$0xf] }
 0x10d   : > { %v6999_v4 = vcombine.low %v1423_v0, %v1433_v48  ;;  %v1678_v12 = vrot.slane %v1676_v36, 4  ;;  %v11126_v63 = vshll.u32 %v9400_v18, 16  ;;  %v11127_v57 = vshrl.u32 %v9400_v18, 16 }
 0x10e   : > { %v1910_v45 = vsel %vm8702_vm4, %v1908_v50, %v1909_v7  ;;  %v1695_v62 = vshll.u32 %v6897_v55, 16  ;;  %v1435_v25 = vshrl.u32 %v6860_v51, 16  ;;  %v1681_v40 = vrot.slane %v1679_v22, 5 }
 0x10f   : > { %3411 = vmatprep.mubr.bf16.mxu0 %v6999_v4  ;;  %v7019_v20 = vcombine.low %v1907_v27, %v1910_v45  ;;  %v1687_v28 = vrot.slane %v11126_v63, 5  ;;  %v1438_v6 = vshll.u32 %v6860_v51, 16  ;;  %v1691_v60 = vrot.slane %v11127_v57, 4  ;;  %v6900_v4 = vld [vmem:[%s8686_s12 + $0x50] sm:$0x1] }
 0x110   : > { %3412 = vmatmul.mubr.bf16.gmra.mrb[52].mxu0 %v6989_v29  ;;  %v1697_v37 = vrot.slane %v1695_v62, 5  ;;  %v1437_v13 = vrot.slane %v1435_v25, 5  ;;  %v1443_v55 = vrot.slane %v1092_v10, 5  ;;  %v1682_v41 = vor.u32 %v1681_v40, %v1678_v12  ;;  %v9430_v10 = vld [vmem:[%s8686_s12 + $0x48] sm:$0xe] }
 0x111   : > { %3524 = vmatprep.mubr.bf16.mxu1 %v7019_v20  ;;  %v1440_v16 = vrot.slane %v1438_v6, 6  ;;  %v1444_v21 = vrot.slane %v1088_v23, 6  ;;  %v1449_v24 = vshrl.u32 %v6880_v46, 16  ;;  %v1692_v15 = vor.u32 %v1691_v60, %v1687_v28  ;;  %v8192_v45 = vld [vmem:[%s8686_s12 + $0x44] sm:$0x1] }
 0x112   : > { %v1452_v14 = vshll.u32 %v6880_v46, 16  ;;  %v6870_v7 = vrot.slane %v6860_v51, 9  ;;  %v1292_v0 = vrot.slane %v8191_v26, 5  ;;  %v1683_v59 = vrot.slane %v1682_v41, 4  ;;  %v9439_v46 = vld [vmem:[%s8686_s12 + $0x4c] sm:$0xf] }
 0x113   : > { %v1441_v36 = vor.u32 %v1440_v16, %v1437_v13  ;;  %v1445_v48 = vor.u32 %v1444_v21, %v1443_v55  ;;  %v1451_v29 = vrot.slane %v1449_v24, 5  ;;  %v1693_v27 = vrot.slane %v1692_v15, 4  ;;  %v6898_v60 = vld [vmem:[%s8686_s12 + $0x48] sm:$0xf]  ;;  %v6865_v57 = vld [vmem:[%s8686_s12 + $0x78] sm:$0xe] }
 0x114   : > { %v1454_v50 = vrot.slane %v1452_v14, 6  ;;  %v1293_v58 = vsel %vm8702_vm4, %v6870_v7, %v1292_v0  ;;  %v1294_v23 = vrot.slane %v1292_v0, 4  ;;  %v1688_v51 = vsel %vm8731_vm7, %v1683_v59, %v1687_v28  ;;  %v6861_v16 = vld [vmem:[%s8686_s12 + $0x48] sm:$0xe] }
 0x115   : > { %v1442_v12 = vrot.slane %v1441_v36, 4  ;;  %v1447_v22 = vrot.slane %v1445_v48, 4  ;;  %v1295_v62 = vrot.slane %v8192_v45, 5  ;;  %v1698_v25 = vsel %vm8731_vm7, %v1693_v27, %v1697_v37 }
 0x116   : > { %v1455_v20 = vor.u32 %v1454_v50, %v1451_v29  ;;  %v6930_v40 = vrot.slane %v9430_v10, 9  ;;  %v1913_v6 = vrot.slane %v9439_v46, 5  ;;  %v7009_v13 = vcombine.low %v1688_v51, %v1698_v25  ;;  %v6881_v29 = vld [vmem:[%s8686_s12 + $0x50] sm:$0x3] }
 0x117   : > { %v1446_v55 = vsel %vm8758_vm8, %v1442_v12, %v1445_v48  ;;  %v1296_v28 = vsel %vm8702_vm4, %v1294_v23, %v1295_v62  ;;  %v1916_v41 = vrot.slane %v6900_v4, 5  ;;  %v1700_v7 = vshrl.u32 %v6898_v60, 16 }
 0x118   : > { %v1456_v21 = vsel %vm8758_vm8, %v1447_v22, %v1455_v20  ;;  %v6990_v37 = vcombine.low %v1293_v58, %v1296_v28  ;;  %v1914_v24 = vsel %vm8702_vm4, %v6930_v40, %v1913_v6  ;;  %v1915_v15 = vrot.slane %v1913_v6, 4  ;;  %3525 = vmatmul.mubr.bf16.gmra.mrb[52].mxu1 %v7009_v13 }
 0x119   : > { %v7000_v14 = vcombine.low %v1446_v55, %v1456_v21  ;;  %v1703_v26 = vshll.u32 %v6898_v60, 16  ;;  %v11124_v0 = vshll.u32 %v9439_v46, 16  ;;  %v11125_v36 = vshrl.u32 %v9439_v46, 16 }
 0x11a   : > { %v1917_v59 = vsel %vm8702_vm4, %v1915_v15, %v1916_v41  ;;  %v1719_v48 = vshll.u32 %v6900_v4, 16  ;;  %v1458_v27 = vshrl.u32 %v6861_v16, 16  ;;  %v1702_v58 = vrot.slane %v1700_v7, 4  ;;  %v9470_v15 = vld [vmem:[%s8686_s12 + $0x54] sm:$0xe] }
 0x11b   : > { %3419 = vmatprep.mubr.bf16.mxu0 %v7000_v14  ;;  %v7020_v50 = vcombine.low %v1914_v24, %v1917_v59  ;;  %v1705_v23 = vrot.slane %v1703_v26, 5  ;;  %v1711_v51 = vrot.slane %v11124_v0, 5  ;;  %v1715_v12 = vrot.slane %v11125_v36, 4  ;;  %v8194_v7 = vld [vmem:[%s8686_s12 + $0x50] sm:$0x1] }
 0x11c   : > { %3420 = vmatmul.mubr.bf16.gmra.mrb[56].mxu0 %v6990_v37  ;;  %v1721_v22 = vrot.slane %v1719_v48, 5  ;;  %v1460_v45 = vrot.slane %v1458_v27, 5  ;;  %v1461_v62 = vshll.u32 %v6861_v16, 16  ;;  %v1466_v25 = vrot.slane %v1116_v9, 5  ;;  %v8193_v37 = vld [vmem:[%s8686_s12 + $0x4c] sm:$0xf] }
 0x11d   : > { %3532 = vmatprep.mubr.bf16.mxu1 %v7020_v50  ;;  %v1706_v4 = vor.u32 %v1705_v23, %v1702_v58  ;;  %v1467_v20 = vrot.slane %v1112_v8, 6  ;;  %v1472_v40 = vshrl.u32 %v6881_v29, 16  ;;  %v1716_v6 = vor.u32 %v1715_v12, %v1711_v51  ;;  %v6903_v26 = vld [vmem:[%s8686_s12 + $0x5c] sm:$0x1]  ;;  %v6901_v27 = vld [vmem:[%s8686_s12 + $0x54] sm:$0xf] }
 0x11e   : > { %v1463_v60 = vrot.slane %v1461_v62, 6  ;;  %v1475_v13 = vshll.u32 %v6881_v29, 16  ;;  %v6871_v55 = vrot.slane %v6861_v16, 9  ;;  %v1299_v24 = vrot.slane %v8193_v37, 5  ;;  %v9482_v12 = vld [vmem:[%s8686_s12 + $0x58] sm:$0xf] }
 0x11f   : > { %v1707_v28 = vrot.slane %v1706_v4, 4  ;;  %v1468_v41 = vor.u32 %v1467_v20, %v1466_v25  ;;  %v1474_v21 = vrot.slane %v1472_v40, 5  ;;  %v1717_v9 = vrot.slane %v1716_v6, 4  ;;  %v6912_v36 = vld [vmem:[%s8686_s12 + $0x80] sm:$0x1] }
 0x120   : > { %v1464_v14 = vor.u32 %v1463_v60, %v1460_v45  ;;  %v1477_v39 = vrot.slane %v1475_v13, 6  ;;  %v1302_v8 = vrot.slane %v8194_v7, 5  ;;  %v1300_v16 = vsel %vm8702_vm4, %v6871_v55, %v1299_v24  ;;  %v6862_v60 = vld [vmem:[%s8686_s12 + $0x54] sm:$0xe]  ;;  %v6882_v7 = vld [vmem:[%s8686_s12 + $0x5c] sm:$0x3] }
 0x121   : > { %v1712_v59 = vsel %vm8731_vm7, %v1707_v28, %v1711_v51  ;;  %v1470_v48 = vrot.slane %v1468_v41, 4  ;;  %v1301_v29 = vrot.slane %v1299_v24, 4  ;;  %v1722_v50 = vsel %vm8731_vm7, %v1717_v9, %v1721_v22 }
 0x122   : > { %v1465_v58 = vrot.slane %v1464_v14, 4  ;;  %v1478_v23 = vor.u32 %v1477_v39, %v1474_v21  ;;  %v6931_v45 = vrot.slane %v9470_v15, 9  ;;  %v7010_v62 = vcombine.low %v1712_v59, %v1722_v50 }
 0x123   : > { %v1303_v51 = vsel %vm8702_vm4, %v1301_v29, %v1302_v8  ;;  %v1920_v4 = vrot.slane %v9482_v12, 5  ;;  %v1923_v25 = vrot.slane %v6903_v26, 5  ;;  %v1724_v6 = vshrl.u32 %v6901_v27, 16 }
 0x124   : > { %v1469_v20 = vsel %vm8758_vm8, %v1465_v58, %v1468_v41  ;;  %v1479_v40 = vsel %vm8758_vm8, %v1470_v48, %v1478_v23  ;;  %v6991_v22 = vcombine.low %v1300_v16, %v1303_v51  ;;  %3533 = vmatmul.mubr.bf16.gmra.mrb[56].mxu1 %v7010_v62  ;;  %v1727_v21 = vshll.u32 %v6901_v27, 16 }
 0x125   : > { %v7001_v13 = vcombine.low %v1469_v20, %v1479_v40  ;;  %v1921_v55 = vsel %vm8702_vm4, %v6931_v45, %v1920_v4  ;;  %v1922_v28 = vrot.slane %v1920_v4, 4  ;;  %v1726_v37 = vrot.slane %v1724_v6, 4 }
 0x126   : > { %v11120_v24 = vshll.u32 %v9482_v12, 16  ;;  %v11122_v9 = vshrl.u32 %v9482_v12, 16  ;;  %v1743_v41 = vshll.u32 %v6903_v26, 16  ;;  %v1729_v39 = vrot.slane %v1727_v21, 5  ;;  %v9510_v21 = vld [vmem:[%s8686_s12 + $0x60] sm:$0xe] }
 0x127   : > { %3427 = vmatprep.mubr.bf16.mxu0 %v7001_v13  ;;  %v1924_v14 = vsel %vm8702_vm4, %v1922_v28, %v1923_v25  ;;  %v1481_v8 = vshrl.u32 %v6862_v60, 16  ;;  %v1484_v59 = vshll.u32 %v6862_v60, 16  ;;  %v1489_v23 = vrot.slane %v1140_v61, 5 }
 0x128   : > { %3428 = vmatmul.mubr.bf16.gmra.mrb[60].mxu0 %v6991_v22  ;;  %v7021_v48 = vcombine.low %v1921_v55, %v1924_v14  ;;  %v1735_v16 = vrot.slane %v11120_v24, 5  ;;  %v1739_v29 = vrot.slane %v11122_v9, 4  ;;  %v1745_v27 = vrot.slane %v1743_v41, 5  ;;  %v8195_v22 = vld [vmem:[%s8686_s12 + $0x58] sm:$0xf] }
 0x129   : > { %v1730_v50 = vor.u32 %v1729_v39, %v1726_v37  ;;  %v1483_v26 = vrot.slane %v1481_v8, 5  ;;  %v1486_v58 = vrot.slane %v1484_v59, 6  ;;  %v1490_v62 = vrot.slane %v1136_v56, 6  ;;  %v6906_v14 = vld [vmem:[%s8686_s12 + $0x68] sm:$0x1] }
 0x12a   : > { %3540 = vmatprep.mubr.bf16.mxu1 %v7021_v48  ;;  %v1740_v45 = vor.u32 %v1739_v29, %v1735_v16  ;;  %v1495_v51 = vshrl.u32 %v6882_v7, 16  ;;  %v1498_v4 = vshll.u32 %v6882_v7, 16  ;;  %v6872_v40 = vrot.slane %v6862_v60, 9  ;;  %v6904_v60 = vld [vmem:[%s8686_s12 + $0x60] sm:$0xf] }
 0x12b   : > { %v1731_v25 = vrot.slane %v1730_v50, 4  ;;  %v1487_v20 = vor.u32 %v1486_v58, %v1483_v26  ;;  %v1306_v6 = vrot.slane %v8195_v22, 5  ;;  %v1491_v55 = vor.u32 %v1490_v62, %v1489_v23  ;;  %v8196_v59 = vld [vmem:[%s8686_s12 + $0x5c] sm:$0x1]  ;;  %v9522_v29 = vld [vmem:[%s8686_s12 + $0x64] sm:$0xf] }
 0x12c   : > { %v1741_v13 = vrot.slane %v1740_v45, 4  ;;  %v1497_v28 = vrot.slane %v1495_v51, 5  ;;  %v1500_v61 = vrot.slane %v1498_v4, 6  ;;  %v1309_v48 = vrot.slane %v8196_v59, 5  ;;  %v6863_v51 = vld [vmem:[%s8686_s12 + $0x60] sm:$0xe] }
 0x12d   : > { %v1736_v30 = vsel %vm8731_vm7, %v1731_v25, %v1735_v16  ;;  %v1488_v56 = vrot.slane %v1487_v20, 4  ;;  %v1307_v37 = vsel %vm8702_vm4, %v6872_v40, %v1306_v6  ;;  %v1308_v41 = vrot.slane %v1306_v6, 4  ;;  %v6883_v6 = vld [vmem:[%s8686_s12 + $0x68] sm:$0x3] }
 0x12e   : > { %v1746_v39 = vsel %vm8731_vm7, %v1741_v13, %v1745_v27  ;;  %v1493_v7 = vrot.slane %v1491_v55, 4  ;;  %v1501_v8 = vor.u32 %v1500_v61, %v1497_v28  ;;  %v6932_v26 = vrot.slane %v9510_v21, 9 }
 0x12f   : > { %v7011_v50 = vcombine.low %v1736_v30, %v1746_v39  ;;  %v1492_v16 = vsel %vm8758_vm8, %v1488_v56, %v1491_v55  ;;  %v1927_v58 = vrot.slane %v9522_v29, 5  ;;  %v1310_v27 = vsel %vm8702_vm4, %v1308_v41, %v1309_v48 }
 0x130   : > { %v1502_v23 = vsel %vm8758_vm8, %v1493_v7, %v1501_v8  ;;  %v1930_v45 = vrot.slane %v6906_v14, 5  ;;  %v1748_v62 = vshrl.u32 %v6904_v60, 16  ;;  %v6992_v20 = vcombine.low %v1307_v37, %v1310_v27 }
 0x131   : > { %3541 = vmatmul.mubr.bf16.gmra.mrb[60].mxu1 %v7011_v50  ;;  %v7002_v25 = vcombine.low %v1492_v16, %v1502_v23  ;;  %v1928_v40 = vsel %vm8702_vm4, %v6932_v26, %v1927_v58  ;;  %v1929_v22 = vrot.slane %v1927_v58, 4  ;;  %v1751_v28 = vshll.u32 %v6904_v60, 16 }
 0x132   : > { %v9533_v4 = vpop.f32.mrb[0].mxu0  ;;  %v1750_v55 = vrot.slane %v1748_v62, 4  ;;  %v11118_v61 = vshll.u32 %v9522_v29, 16  ;;  %v11119_v30 = vshrl.u32 %v9522_v29, 16  ;;  %v1767_v37 = vshll.u32 %v6906_v14, 16 }
 0x133   : > { %v9538_v13 = vpop.f32.mrb[1].mxu0  ;;  %3435 = vmatprep.mubr.bf16.mxu0 %v7002_v25  ;;  %v1931_v41 = vsel %vm8702_vm4, %v1929_v22, %v1930_v45  ;;  %v1504_v39 = vshrl.u32 %v6863_v51, 16  ;;  %v1507_v7 = vshll.u32 %v6863_v51, 16  ;;  %v1753_v60 = vrot.slane %v1751_v28, 5 }
 0x134   : > { %v9542_v56 = vpop.f32.mrb[2].mxu0  ;;  %3436 = vmatmul.mubr.bf16.gmra.mrb[64].mxu0 %v6992_v20  ;;  %v7022_v48 = vcombine.low %v1928_v40, %v1931_v41  ;;  %v1759_v50 = vrot.slane %v11118_v61, 5  ;;  %v1763_v16 = vrot.slane %v11119_v30, 4  ;;  %v1769_v58 = vrot.slane %v1767_v37, 5 }
 0x135   : > { %v9546_v8 = vpop.f32.mrb[0].mxu1  ;;  %v9548_v59 = vpop.f32.mrb[3].mxu0  ;;  %v1506_v14 = vrot.slane %v1504_v39, 5  ;;  %v1509_v23 = vrot.slane %v1507_v7, 6  ;;  %v1512_v27 = vrot.slane %v1164_v43, 5  ;;  %v1754_v62 = vor.u32 %v1753_v60, %v1750_v55 }
 0x136   : > { %v9554_v26 = vpop.f32.mrb[1].mxu1  ;;  %3548 = vmatprep.mubr.bf16.mxu1 %v7022_v48  ;;  %v1764_v25 = vor.u32 %v1763_v16, %v1759_v50  ;;  %v1513_v20 = vrot.slane %v1160_v54, 6  ;;  %v1518_v40 = vshrl.u32 %v6883_v6, 16  ;;  %v1521_v41 = vshll.u32 %v6883_v6, 16  ;;  %v8197_v39 = vld [vmem:[%s8686_s12 + $0x64] sm:$0xf] }
 0x137   : > { %v9558_v45 = vpop.f32.mrb[2].mxu1  ;;  %v1510_v28 = vor.u32 %v1509_v23, %v1506_v14  ;;  %v6873_v37 = vrot.slane %v6863_v51, 9  ;;  %v1313_v7 = vrot.slane %v8197_v39, 5  ;;  %v6909_v43 = vld [vmem:[%s8686_s12 + $0x74] sm:$0x1]  ;;  %v1755_v61 = vrot.slane %v1754_v62, 4 }
 0x138   : > { %v9562_v22 = vpop.f32.mrb[3].mxu1  ;;  %v1765_v48 = vrot.slane %v1764_v25, 4  ;;  %v1514_v30 = vor.u32 %v1513_v20, %v1512_v27  ;;  %v1520_v55 = vrot.slane %v1518_v40, 5  ;;  %v9567_v60 = vld [vmem:[%s8686_s12 + $0x6c] sm:$0xe]  ;;  %v1523_v54 = vrot.slane %v1521_v41, 6 }
 0x139   : > { %v1511_v2 = vrot.slane %v1510_v28, 4  ;;  %v1314_v16 = vsel %vm8702_vm4, %v6873_v37, %v1313_v7  ;;  %v1315_v24 = vrot.slane %v1313_v7, 4  ;;  %v6907_v14 = vld [vmem:[%s8686_s12 + $0x6c] sm:$0xf]  ;;  %v1760_v51 = vsel %vm8731_vm7, %v1755_v61, %v1759_v50  ;;  %v8198_v62 = vld [vmem:[%s8686_s12 + $0x68] sm:$0x1] }
 0x13a   : > { %v1770_v6 = vsel %vm8731_vm7, %v1765_v48, %v1769_v58  ;;  %v1516_v23 = vrot.slane %v1514_v30, 4  ;;  %v1316_v27 = vrot.slane %v8198_v62, 5  ;;  %v9578_v25 = vld [vmem:[%s8686_s12 + $0x70] sm:$0xf]  ;;  %v1524_v28 = vor.u32 %v1523_v54, %v1520_v55 }
 0x13b   : > { %v7012_v20 = vcombine.low %v1760_v51, %v1770_v6  ;;  %v1515_v40 = vsel %vm8758_vm8, %v1511_v2, %v1514_v30  ;;  %v6933_v41 = vrot.slane %v9567_v60, 9  ;;  %v1934_v50 = vrot.slane %v9578_v25, 5  ;;  %v6864_v30 = vld [vmem:[%s8686_s12 + $0x6c] sm:$0xe] }
 0x13c   : > { %v1317_v61 = vsel %vm8702_vm4, %v1315_v24, %v1316_v27  ;;  %v1937_v58 = vrot.slane %v6909_v43, 5  ;;  %v1772_v37 = vshrl.u32 %v6907_v14, 16  ;;  %v1525_v39 = vsel %vm8758_vm8, %v1516_v23, %v1524_v28  ;;  %v6884_v24 = vld [vmem:[%s8686_s12 + $0x74] sm:$0x3] }
 0x13d   : > { %3549 = vmatmul.mubr.bf16.gmra.mrb[64].mxu1 %v7012_v20  ;;  %v6993_v7 = vcombine.low %v1314_v16, %v1317_v61  ;;  %v1775_v48 = vshll.u32 %v6907_v14, 16  ;;  %v11121_v51 = vshll.u32 %v9578_v25, 16  ;;  %v7003_v55 = vcombine.low %v1515_v40, %v1525_v39  ;;  %v9593_v62 = vpop.f32.mrb[4].mxu0 }
 0x13e   : > { %v1935_v2 = vsel %vm8702_vm4, %v6933_v41, %v1934_v50  ;;  %v1936_v54 = vrot.slane %v1934_v50, 4  ;;  %v1774_v6 = vrot.slane %v1772_v37, 4  ;;  %v11123_v23 = vshrl.u32 %v9578_v25, 16  ;;  %v9598_v14 = vpop.f32.mrb[5].mxu0 }
 0x13f   : > { %v1777_v27 = vrot.slane %v1775_v48, 5  ;;  %v1783_v20 = vrot.slane %v11121_v51, 5  ;;  %v1791_v16 = vshll.u32 %v6909_v43, 16  ;;  %3443 = vmatprep.mubr.bf16.mxu0 %v7003_v55  ;;  %v1527_v28 = vshrl.u32 %v6864_v30, 16  ;;  %v9604_v50 = vpop.f32.mrb[6].mxu0 }
 0x140   : > { %v1938_v40 = vsel %vm8702_vm4, %v1936_v54, %v1937_v58  ;;  %v1530_v41 = vshll.u32 %v6864_v30, 16  ;;  %v1535_v61 = vrot.slane %v1188_v47, 5  ;;  %3444 = vmatmul.mubr.bf16.gmra.mrb[68].mxu0 %v6993_v7  ;;  %v1787_v48 = vrot.slane %v11123_v23, 4  ;;  %v9608_v51 = vpop.f32.mrb[7].mxu0 }
 0x141   : > { %v7023_v37 = vcombine.low %v1935_v2, %v1938_v40  ;;  %v1778_v39 = vor.u32 %v1777_v27, %v1774_v6  ;;  %v1793_v43 = vrot.slane %v1791_v16, 5  ;;  %v1529_v55 = vrot.slane %v1527_v28, 5 }
 0x142   : > { %v1532_v58 = vrot.slane %v1530_v41, 6  ;;  %v1536_v54 = vrot.slane %v1184_v44, 6  ;;  %v1541_v9 = vshrl.u32 %v6884_v24, 16  ;;  %v9612_v47 = vpop.f32.mrb[4].mxu1  ;;  %v1788_v2 = vor.u32 %v1787_v48, %v1783_v20  ;;  %v8199_v41 = vld [vmem:[%s8686_s12 + $0x70] sm:$0xf] }
 0x143   : > { %3556 = vmatprep.mubr.bf16.mxu1 %v7023_v37  ;;  %v1779_v7 = vrot.slane %v1778_v39, 4  ;;  %v1544_v6 = vshll.u32 %v6884_v24, 16  ;;  %v6874_v27 = vrot.slane %v6864_v30, 9  ;;  %v9614_v16 = vpop.f32.mrb[5].mxu1  ;;  %v1320_v0 = vrot.slane %v8199_v41, 5 }
 0x144   : > { %v1533_v40 = vor.u32 %v1532_v58, %v1529_v55  ;;  %v1537_v23 = vor.u32 %v1536_v54, %v1535_v61  ;;  %v1543_v28 = vrot.slane %v1541_v9, 5  ;;  %v9620_v44 = vpop.f32.mrb[6].mxu1  ;;  %v1789_v39 = vrot.slane %v1788_v2, 4  ;;  %v8200_v24 = vld [vmem:[%s8686_s12 + $0x74] sm:$0x1] }
 0x145   : > { %v1784_v37 = vsel %vm8731_vm7, %v1779_v7, %v1783_v20  ;;  %v1546_v48 = vrot.slane %v1544_v6, 6  ;;  %v1323_v30 = vrot.slane %v8200_v24, 5  ;;  %v9626_v55 = vpop.f32.mrb[7].mxu1  ;;  %v1321_v58 = vsel %vm8702_vm4, %v6874_v27, %v1320_v0  ;;  %v9631_v41 = vld [vmem:[%s8686_s12 + $0x7c] sm:$0xf] }
 0x146   : > { %v1534_v9 = vrot.slane %v1533_v40, 4  ;;  %v1539_v61 = vrot.slane %v1537_v23, 4  ;;  %v1322_v54 = vrot.slane %v1320_v0, 4  ;;  %v1794_v20 = vsel %vm8731_vm7, %v1789_v39, %v1793_v43  ;;  %v6910_v24 = vld [vmem:[%s8686_s12 + $0x78] sm:$0xf] }
 0x147   : > { %v1547_v7 = vor.u32 %v1546_v48, %v1543_v28  ;;  %v6934_v2 = vrot.slane %v9618_v49, 9  ;;  %v1941_v6 = vrot.slane %v9631_v41, 5  ;;  %v7013_v63 = vcombine.low %v1784_v37, %v1794_v20 }
 0x148   : > { %v1538_v40 = vsel %vm8758_vm8, %v1534_v9, %v1537_v23  ;;  %v1324_v27 = vsel %vm8702_vm4, %v1322_v54, %v1323_v30  ;;  %v1944_v0 = vrot.slane %v6912_v36, 5  ;;  %v1796_v37 = vshrl.u32 %v6910_v24, 16 }
 0x149   : > { %v1548_v42 = vsel %vm8758_vm8, %v1539_v61, %v1547_v7  ;;  %v6994_v43 = vcombine.low %v1321_v58, %v1324_v27  ;;  %v1942_v28 = vsel %vm8702_vm4, %v6934_v2, %v1941_v6  ;;  %v1943_v39 = vrot.slane %v1941_v6, 4  ;;  %3557 = vmatmul.mubr.bf16.gmra.mrb[68].mxu1 %v7013_v63 }
 0x14a   : > { %v7004_v48 = vcombine.low %v1538_v40, %v1548_v42  ;;  %v1799_v20 = vshll.u32 %v6910_v24, 16  ;;  %v11131_v23 = vshll.u32 %v9631_v41, 16  ;;  %v11132_v30 = vshrl.u32 %v9631_v41, 16 }
 0x14b   : > { %v1945_v9 = vsel %vm8702_vm4, %v1943_v39, %v1944_v0  ;;  %v1815_v54 = vshll.u32 %v6912_v36, 16  ;;  %v1550_v32 = vshrl.u32 %v6865_v57, 16  ;;  %v1798_v58 = vrot.slane %v1796_v37, 4 }
 0x14c   : > { %3451 = vmatprep.mubr.bf16.mxu0 %v7004_v48  ;;  %v7024_v61 = vcombine.low %v1942_v28, %v1945_v9  ;;  %v1801_v7 = vrot.slane %v1799_v20, 5  ;;  %v1807_v63 = vrot.slane %v11131_v23, 5  ;;  %v1811_v42 = vrot.slane %v11132_v30, 4 }
 0x14d   : > { %3452 = vmatmul.mubr.bf16.gmra.mrb[72].mxu0 %v6994_v43  ;;  %v1817_v2 = vrot.slane %v1815_v54, 5  ;;  %v1552_v6 = vrot.slane %v1550_v32, 5  ;;  %v1553_v24 = vshll.u32 %v6865_v57, 16  ;;  %v9656_v40 = vpop.f32.mrb[8].mxu0  ;;  %v1558_v27 = vrot.slane %v1212_v53, 5 }
 0x14e   : > { %3564 = vmatprep.mubr.bf16.mxu1 %v7024_v61  ;;  %v1802_v36 = vor.u32 %v1801_v7, %v1798_v58  ;;  %v1559_v0 = vrot.slane %v1208_v19, 6  ;;  %v1564_v28 = vshrl.u32 %v6885_v1, 16  ;;  %v9662_v43 = vpop.f32.mrb[9].mxu0  ;;  %v1812_v39 = vor.u32 %v1811_v42, %v1807_v63  ;;  %v8201_v58 = vld [vmem:[%s8686_s12 + $0x7c] sm:$0xf] }
 0x14f   : > { %v1555_v48 = vrot.slane %v1553_v24, 6  ;;  %v1567_v32 = vshll.u32 %v6885_v1, 16  ;;  %v6875_v37 = vrot.slane %v6865_v57, 9  ;;  %v9664_v20 = vpop.f32.mrb[10].mxu0  ;;  %v1327_v53 = vrot.slane %v8201_v58, 5 }
 0x150   : > { %11157 = vst [vmem:[#allocation13_spill] sm:$0xff] %v9664_v20  ;;  %v1803_v9 = vrot.slane %v1802_v36, 4  ;;  %v1560_v54 = vor.u32 %v1559_v0, %v1558_v27  ;;  %v1566_v61 = vrot.slane %v1564_v28, 5  ;;  %v9668_v7 = vld [vmem:[%s8686_s12 + $0x84] sm:$0xe]  ;;  %v9670_v52 = vpop.f32.mrb[11].mxu0 }
 0x151   : > { %11158 = vst [vmem:[#allocation14_spill] sm:$0xff] %v9670_v52  ;;  %v1813_v19 = vrot.slane %v1812_v39, 4  ;;  %v1556_v23 = vor.u32 %v1555_v48, %v1552_v6  ;;  %v1569_v42 = vrot.slane %v1567_v32, 6  ;;  %v8202_v24 = vld [vmem:[%s8686_s12 + $0x80] sm:$0x1]  ;;  %v9674_v57 = vpop.f32.mrb[8].mxu1  ;;  %v1328_v0 = vsel %vm8702_vm4, %v6875_v37, %v1327_v53 }
 0x152   : > { %v1330_v30 = vrot.slane %v8202_v24, 5  ;;  %v6915_v1 = vld [vmem:[%s8686_s12 + $0x8c] sm:$0x1]  ;;  %v1808_v36 = vsel %vm8731_vm7, %v1803_v9, %v1807_v63  ;;  %v1562_v27 = vrot.slane %v1560_v54, 4  ;;  %v1329_v28 = vrot.slane %v1327_v53, 4  ;;  %v9681_v35 = vpop.f32.mrb[9].mxu1 }
 0x153   : > { %v6913_v58 = vld [vmem:[%s8686_s12 + $0x84] sm:$0xf]  ;;  %v1818_v6 = vsel %vm8731_vm7, %v1813_v19, %v1817_v2  ;;  %v1557_v39 = vrot.slane %v1556_v23, 4  ;;  %v1570_v48 = vor.u32 %v1569_v42, %v1566_v61  ;;  %v9686_v32 = vld [vmem:[%s8686_s12 + $0x88] sm:$0xf]  ;;  %v6935_v24 = vrot.slane %v9668_v7, 9 }
 0x154   : > { %v9689_v52 = vpop.f32.mrb[10].mxu1  ;;  %v7014_v63 = vcombine.low %v1808_v36, %v1818_v6  ;;  %v1331_v9 = vsel %vm8702_vm4, %v1329_v28, %v1330_v30  ;;  %v1948_v37 = vrot.slane %v9686_v32, 5  ;;  %v1951_v53 = vrot.slane %v6915_v1, 5 }
 0x155   : > { %11159 = vst [vmem:[#allocation15_spill] sm:$0xff] %v9689_v52  ;;  %v9694_v20 = vpop.f32.mrb[11].mxu1  ;;  %v1561_v2 = vsel %vm8758_vm8, %v1557_v39, %v1560_v54  ;;  %v1571_v23 = vsel %vm8758_vm8, %v1562_v27, %v1570_v48  ;;  %v6995_v61 = vcombine.low %v1328_v0, %v1331_v9  ;;  %v1820_v19 = vshrl.u32 %v6913_v58, 16  ;;  %v6936_v0 = vld [vmem:[%s8686_s12 + $0x20] sm:$0x3] }
 0x156   : > { %11160 = vst [vmem:[#allocation16_spill] sm:$0xff] %v9694_v20  ;;  %3565 = vmatmul.mubr.bf16.gmra.mrb[72].mxu1 %v7014_v63  ;;  %v7005_v42 = vcombine.low %v1561_v2, %v1571_v23  ;;  %v1949_v30 = vsel %vm8702_vm4, %v6935_v24, %v1948_v37  ;;  %v1950_v36 = vrot.slane %v1948_v37, 4  ;;  %v1823_v28 = vshll.u32 %v6913_v58, 16  ;;  %v8203_v48 = vld [vmem:[%s8686_s12 + $0x18] sm:$0xe] }
 0x157   : > { %v1822_v6 = vrot.slane %v1820_v19, 4  ;;  %v11136_v20 = vshll.u32 %v9686_v32, 16  ;;  %v11137_v52 = vshrl.u32 %v9686_v32, 16  ;;  %v1839_v54 = vshll.u32 %v6915_v1, 16 }
 0x158   : > { %3459 = vmatprep.mubr.bf16.mxu0 %v7005_v42  ;;  %v1952_v27 = vsel %vm8702_vm4, %v1950_v36, %v1951_v53  ;;  %v1825_v39 = vrot.slane %v1823_v28, 5  ;;  %v1964_v63 = vshrl.u32 %v8203_v48, 16  ;;  %v1967_v9 = vshll.u32 %v8203_v48, 16 }
 0x159   : > { %3460 = vmatmul.mubr.bf16.gmra.mrb[76].mxu0 %v6995_v61  ;;  %v7025_v24 = vcombine.low %v1949_v30, %v1952_v27  ;;  %v1831_v58 = vrot.slane %v11136_v20, 5  ;;  %v1835_v37 = vrot.slane %v11137_v52, 4  ;;  %v1841_v2 = vrot.slane %v1839_v54, 5  ;;  %v6937_v27 = vld [vmem:[%s8686_s12 + $0x2c] sm:$0x3] }
 0x15a   : > { %v1826_v1 = vor.u32 %v1825_v39, %v1822_v6  ;;  %v1966_v23 = vrot.slane %v1964_v63, 5  ;;  %v1969_v19 = vrot.slane %v1967_v9, 6  ;;  %v11161_v53 = vshrl.u32 %v9254_v34, 16  ;;  %v6938_v52 = vld [vmem:[%s8686_s12 + $0x38] sm:$0x3] }
 0x15b   : > { %3572 = vmatprep.mubr.bf16.mxu1 %v7025_v24  ;;  %v1836_v36 = vor.u32 %v1835_v37, %v1831_v58  ;;  %v11162_v28 = vshll.u32 %v9254_v34, 16  ;;  %v1978_v61 = vshrl.u32 %v6936_v0, 16  ;;  %v1981_v30 = vshll.u32 %v6936_v0, 16  ;;  %v9722_v39 = vpop.f32.mrb[12].mxu0 }
 0x15c   : > { %v1972_v42 = vrot.slane %v11161_v53, 5  ;;  %v1827_v38 = vrot.slane %v1826_v1, 4  ;;  %v1970_v20 = vor.u32 %v1969_v19, %v1966_v23  ;;  %v1998_v6 = vsel %vm8758_vm8, %v9332_v11, %v9339_v31  ;;  %v9724_v37 = vpop.f32.mrb[13].mxu0 }
 0x15d   : > { %v1973_v48 = vrot.slane %v11162_v28, 6  ;;  %v1999_v54 = vrot.slane %v9339_v31, 4  ;;  %v1837_v63 = vrot.slane %v1836_v36, 4  ;;  %v1980_v34 = vrot.slane %v1978_v61, 5  ;;  %v9728_v53 = vpop.f32.mrb[14].mxu0 }
 0x15e   : > { %v1983_v24 = vrot.slane %v1981_v30, 6  ;;  %v1832_v0 = vsel %vm8731_vm7, %v1827_v38, %v1831_v58  ;;  %v1971_v1 = vrot.slane %v1970_v20, 4  ;;  %v2001_v23 = vshrl.u32 %v6937_v27, 16  ;;  %11163 = vst [vmem:[#allocation17_spill] sm:$0xff] %v9728_v53  ;;  %v8204_v36 = vld [vmem:[%s8686_s12 + $0x30] sm:$0xe] }
 0x15f   : > { %v1974_v9 = vor.u32 %v1973_v48, %v1972_v42  ;;  %v2004_v19 = vshll.u32 %v6937_v27, 16  ;;  %v1842_v11 = vsel %vm8731_vm7, %v1837_v63, %v1841_v2  ;;  %v2010_v42 = vshrl.u32 %v8204_v36, 16  ;;  %v9734_v48 = vpop.f32.mrb[12].mxu1  ;;  %v9736_v61 = vpop.f32.mrb[15].mxu0 }
 0x160   : > { %v1984_v28 = vor.u32 %v1983_v24, %v1980_v34  ;;  %11164 = vst [vmem:[#allocation18_spill] sm:$0xff] %v9734_v48  ;;  %11165 = vst [vmem:[#allocation19_spill] sm:$0xff] %v9736_v61  ;;  %v7015_v30 = vcombine.low %v1832_v0, %v1842_v11  ;;  %v2003_v20 = vrot.slane %v2001_v23, 5  ;;  %v9740_v27 = vpop.f32.mrb[13].mxu1  ;;  %v2013_v34 = vshll.u32 %v8204_v36, 16 }
 0x161   : > { %v1976_v31 = vrot.slane %v1974_v9, 4  ;;  %v1975_v38 = vsel %vm8758_vm8, %v1971_v1, %v1974_v9  ;;  %v2006_v58 = vrot.slane %v2004_v19, 6  ;;  %11166 = vst [vmem:[#allocation20_spill] sm:$0xff] %v9740_v27  ;;  %v2012_v63 = vrot.slane %v2010_v42, 5  ;;  %v9746_v53 = vpop.f32.mrb[14].mxu1 }
 0x162   : > { %v11167_v24 = vshrl.u32 %v9357_v3, 16  ;;  %11168 = vst [vmem:[#allocation21_spill] sm:$0xff] %v9746_v53  ;;  %3573 = vmatmul.mubr.bf16.gmra.mrb[76].mxu1 %v7015_v30  ;;  %v11169_v9 = vshll.u32 %v9357_v3, 16  ;;  %v2024_v23 = vshrl.u32 %v6938_v52, 16  ;;  %v9750_v19 = vpop.f32.mrb[15].mxu1  ;;  %v2015_v61 = vrot.slane %v2013_v34, 6 }
 0x163   : > { %v1985_v2 = vsel %vm8758_vm8, %v1976_v31, %v1984_v28  ;;  %v2007_v11 = vor.u32 %v2006_v58, %v2003_v20  ;;  %11170 = vst [vmem:[#allocation22_spill] sm:$0xff] %v9750_v19  ;;  %v2027_v27 = vshll.u32 %v6938_v52, 16  ;;  %v6939_v48 = vld [vmem:[%s8686_s12 + $0x44] sm:$0x3]  ;;  %v2033_v31 = vshrl.u32 %v9390_v17, 16 }
 0x164   : > { %v2018_v5 = vrot.slane %v11167_v24, 5  ;;  %v7026_v0 = vcombine.low %v1975_v38, %v1985_v2  ;;  %v2019_v1 = vrot.slane %v11169_v9, 6  ;;  %v2036_v28 = vshll.u32 %v9390_v17, 16 }
 0x165   : > { %v2008_v36 = vsel %vm8758_vm8, %v1999_v54, %v2007_v11  ;;  %v2026_v30 = vrot.slane %v2024_v23, 5  ;;  %v11171_v38 = vshrl.u32 %v9400_v18, 16  ;;  %v2016_v58 = vor.u32 %v2015_v61, %v2012_v63 }
 0x166   : > { %7972 = vmatprep.mubr.bf16.mxu0 %v7026_v0  ;;  %v2020_v42 = vor.u32 %v2019_v1, %v2018_v5  ;;  %v7027_v20 = vcombine.low %v1998_v6, %v2008_v36  ;;  %v2029_v2 = vrot.slane %v2027_v27, 6  ;;  %v2035_v34 = vrot.slane %v2033_v31, 5  ;;  %v6940_v6 = vld [vmem:[%s8686_s12 + $0x50] sm:$0x3] }
 0x167   : > { %v2041_v3 = vrot.slane %v11171_v38, 5  ;;  %v2038_v24 = vrot.slane %v2036_v28, 6  ;;  %v11172_v9 = vshll.u32 %v9400_v18, 16  ;;  %v2047_v17 = vshrl.u32 %v6939_v48, 16 }
 0x168   : > { %v2022_v52 = vrot.slane %v2020_v42, 4  ;;  %7973 = vmatmul.mubr.bf16.vlgmr.msra.gmra.mrb[80].mxu0 %v7027_v20  ;;  %v2017_v0 = vrot.slane %v2016_v58, 4  ;;  %v2030_v53 = vor.u32 %v2029_v2, %v2026_v30  ;;  %v2050_v54 = vshll.u32 %v6939_v48, 16 }
 0x169   : > { %v2042_v19 = vrot.slane %v11172_v9, 6  ;;  %v2056_v5 = vshrl.u32 %v9430_v10, 16  ;;  %v2039_v11 = vor.u32 %v2038_v24, %v2035_v34  ;;  %v2049_v23 = vrot.slane %v2047_v17, 5 }
 0x16a   : > { %v2059_v61 = vshll.u32 %v9430_v10, 16  ;;  %v2021_v27 = vsel %vm8758_vm8, %v2017_v0, %v2020_v42  ;;  %v2031_v18 = vsel %vm8758_vm8, %v2022_v52, %v2030_v53  ;;  %v2052_v63 = vrot.slane %v2050_v54, 6  ;;  %v9768_v38 = vpop.f32.mrb[16].mxu0 }
 0x16b   : > { %v2043_v1 = vor.u32 %v2042_v19, %v2041_v3  ;;  %v2058_v31 = vrot.slane %v2056_v5, 5  ;;  %v7028_v28 = vcombine.low %v2021_v27, %v2031_v18  ;;  %v2040_v36 = vrot.slane %v2039_v11, 4  ;;  %v9774_v2 = vpop.f32.mrb[17].mxu0 }
 0x16c   : > { %v2061_v48 = vrot.slane %v2059_v61, 6  ;;  %v2053_v19 = vor.u32 %v2052_v63, %v2049_v23  ;;  %v11173_v3 = vshrl.u32 %v9439_v46, 16  ;;  %v11174_v10 = vshll.u32 %v9439_v46, 16  ;;  %v9779_v9 = vpop.f32.mrb[18].mxu0  ;;  %v6941_v46 = vld [vmem:[%s8686_s12 + $0x5c] sm:$0x3] }
 0x16d   : > { %v2045_v30 = vrot.slane %v2043_v1, 4  ;;  %v2070_v42 = vshrl.u32 %v6940_v6, 16  ;;  %7976 = vmatprep.mubr.bf16.mxu0 %v7028_v28  ;;  %v2044_v53 = vsel %vm8758_vm8, %v2040_v36, %v2043_v1  ;;  %v2073_v52 = vshll.u32 %v6940_v6, 16  ;;  %v9785_v11 = vpop.f32.mrb[19].mxu0 }
 0x16e   : > { %v2064_v20 = vrot.slane %v11173_v3, 5  ;;  %v2065_v58 = vrot.slane %v11174_v10, 6  ;;  %v2062_v34 = vor.u32 %v2061_v48, %v2058_v31  ;;  %v2079_v24 = vshrl.u32 %v9470_v15, 16  ;;  %v9787_v6 = vpop.f32.mrb[16].mxu1 }
 0x16f   : > { %v2054_v17 = vsel %vm8758_vm8, %v2045_v30, %v2053_v19  ;;  %v2072_v54 = vrot.slane %v2070_v42, 5  ;;  %v2082_v5 = vshll.u32 %v9470_v15, 16  ;;  %v2075_v27 = vrot.slane %v2073_v52, 6  ;;  %v9793_v48 = vpop.f32.mrb[17].mxu1 }
 0x170   : > { %v2066_v0 = vor.u32 %v2065_v58, %v2064_v20  ;;  %v7029_v23 = vcombine.low %v2044_v53, %v2054_v17  ;;  %v2063_v61 = vrot.slane %v2062_v34, 4  ;;  %v2081_v1 = vrot.slane %v2079_v24, 5  ;;  %v9797_v10 = vpop.f32.mrb[18].mxu1  ;;  %v6942_v53 = vld [vmem:[%s8686_s12 + $0x68] sm:$0x3] }
 0x171   : > { %v2084_v63 = vrot.slane %v2082_v5, 6  ;;  %v11175_v31 = vshrl.u32 %v9482_v12, 16  ;;  %v11176_v36 = vshll.u32 %v9482_v12, 16  ;;  %v2076_v19 = vor.u32 %v2075_v27, %v2072_v54  ;;  %v9802_v12 = vpop.f32.mrb[19].mxu1 }
 0x172   : > { %v2068_v18 = vrot.slane %v2066_v0, 4  ;;  %7977 = vmatmul.mubr.bf16.gmra.mrb[84].mxu0 %v7029_v23  ;;  %v2067_v15 = vsel %vm8758_vm8, %v2063_v61, %v2066_v0  ;;  %v2093_v3 = vshrl.u32 %v6941_v46, 16  ;;  %v2096_v20 = vshll.u32 %v6941_v46, 16 }
 0x173   : > { %v2087_v28 = vrot.slane %v11175_v31, 5  ;;  %v2088_v30 = vrot.slane %v11176_v36, 6  ;;  %v2085_v58 = vor.u32 %v2084_v63, %v2081_v1  ;;  %v2102_v34 = vshrl.u32 %v9510_v21, 16 }
 0x174   : > { %v2105_v52 = vshll.u32 %v9510_v21, 16  ;;  %v2077_v24 = vsel %vm8758_vm8, %v2068_v18, %v2076_v19  ;;  %v2095_v17 = vrot.slane %v2093_v3, 5  ;;  %v2098_v5 = vrot.slane %v2096_v20, 6 }
 0x175   : > { %v2089_v42 = vor.u32 %v2088_v30, %v2087_v28  ;;  %v11177_v0 = vshrl.u32 %v9522_v29, 16  ;;  %v7030_v46 = vcombine.low %v2067_v15, %v2077_v24  ;;  %v2086_v23 = vrot.slane %v2085_v58, 4 }
 0x176   : > { %v2104_v27 = vrot.slane %v2102_v34, 5  ;;  %v2099_v1 = vor.u32 %v2098_v5, %v2095_v17  ;;  %v2107_v63 = vrot.slane %v2105_v52, 6  ;;  %v11178_v31 = vshll.u32 %v9522_v29, 16  ;;  %v6943_v34 = vld [vmem:[%s8686_s12 + $0x74] sm:$0x3] }
 0x177   : > { %v2110_v54 = vrot.slane %v11177_v0, 5  ;;  %v2091_v61 = vrot.slane %v2089_v42, 4  ;;  %v2116_v28 = vshrl.u32 %v6942_v53, 16  ;;  %7980 = vmatprep.mubr.bf16.mxu0 %v7030_v46  ;;  %v2090_v18 = vsel %vm8758_vm8, %v2086_v23, %v2089_v42 }
 0x178   : > { %v2111_v21 = vrot.slane %v11178_v31, 6  ;;  %v2119_v36 = vshll.u32 %v6942_v53, 16  ;;  %v2125_v30 = vshrl.u32 %v9567_v60, 16  ;;  %v2128_v19 = vshll.u32 %v9567_v60, 16 }
 0x179   : > { %v2100_v15 = vsel %vm8758_vm8, %v2091_v61, %v2099_v1  ;;  %v2108_v3 = vor.u32 %v2107_v63, %v2104_v27  ;;  %v2118_v58 = vrot.slane %v2116_v28, 5  ;;  %v11179_v42 = vshrl.u32 %v9578_v25, 16  ;;  %v9821_v1 = vpop.f32.mrb[20].mxu0 }
 0x17a   : > { %v2112_v20 = vor.u32 %v2111_v21, %v2110_v54  ;;  %v7031_v52 = vcombine.low %v2090_v18, %v2100_v15  ;;  %v2121_v29 = vrot.slane %v2119_v36, 6  ;;  %v2127_v24 = vrot.slane %v2125_v30, 5  ;;  %v9827_v18 = vpop.f32.mrb[21].mxu0  ;;  %v6944_v15 = vld [vmem:[%s8686_s12 + $0x80] sm:$0x3] }
 0x17b   : > { %v2130_v17 = vrot.slane %v2128_v19, 6  ;;  %v2109_v5 = vrot.slane %v2108_v3, 4  ;;  %v2133_v53 = vrot.slane %v11179_v42, 5  ;;  %v11180_v46 = vshll.u32 %v9578_v25, 16  ;;  %v9832_v3 = vpop.f32.mrb[22].mxu0 }
 0x17c   : > { %v2114_v0 = vrot.slane %v2112_v20, 4  ;;  %7981 = vmatmul.mubr.bf16.gmra.mrb[88].mxu0 %v7031_v52  ;;  %v2122_v60 = vor.u32 %v2121_v29, %v2118_v58  ;;  %v2139_v27 = vshrl.u32 %v6943_v34, 16  ;;  %v2142_v54 = vshll.u32 %v6943_v34, 16  ;;  %v9834_v29 = vpop.f32.mrb[23].mxu0 }
 0x17d   : > { %v2134_v23 = vrot.slane %v11180_v46, 6  ;;  %v2131_v61 = vor.u32 %v2130_v17, %v2127_v24  ;;  %v2113_v63 = vsel %vm8758_vm8, %v2109_v5, %v2112_v20  ;;  %v2148_v21 = vshrl.u32 %v9618_v49, 16 }
 0x17e   : > { %v2151_v28 = vshll.u32 %v9618_v49, 16  ;;  %v2123_v25 = vsel %vm8758_vm8, %v2114_v0, %v2122_v60  ;;  %v2141_v30 = vrot.slane %v2139_v27, 5  ;;  %v2144_v19 = vrot.slane %v2142_v54, 6 }
 0x17f   : > { %v2135_v31 = vor.u32 %v2134_v23, %v2133_v53  ;;  %v2132_v36 = vrot.slane %v2131_v61, 4  ;;  %v7032_v58 = vcombine.low %v2113_v63, %v2123_v25  ;;  %v2150_v52 = vrot.slane %v2148_v21, 5  ;;  %v9842_v53 = vpop.f32.mrb[20].mxu1 }
 0x180   : > { %v2153_v20 = vrot.slane %v2151_v28, 6  ;;  %v2145_v24 = vor.u32 %v2144_v19, %v2141_v30  ;;  %v11181_v17 = vshrl.u32 %v9631_v41, 16  ;;  %v11182_v0 = vshll.u32 %v9631_v41, 16  ;;  %v9845_v27 = vpop.f32.mrb[21].mxu1 }
 0x181   : > { %v2137_v34 = vrot.slane %v2135_v31, 4  ;;  %v2136_v49 = vsel %vm8758_vm8, %v2132_v36, %v2135_v31  ;;  %7984 = vmatprep.mubr.bf16.mxu0 %v7032_v58  ;;  %v2162_v23 = vshrl.u32 %v6944_v15, 16  ;;  %v2165_v60 = vshll.u32 %v6944_v15, 16  ;;  %v6945_v31 = vld [vmem:[%s8686_s12 + $0x8c] sm:$0x3]  ;;  %v9853_v25 = vpop.f32.mrb[22].mxu1 }
 0x182   : > { %v2156_v5 = vrot.slane %v11181_v17, 5  ;;  %v2157_v42 = vrot.slane %v11182_v0, 6  ;;  %v2154_v46 = vor.u32 %v2153_v20, %v2150_v52  ;;  %v2171_v61 = vshrl.u32 %v9668_v7, 16  ;;  %v9855_v58 = vpop.f32.mrb[23].mxu1 }
 0x183   : > { %v2146_v54 = vsel %vm8758_vm8, %v2137_v34, %v2145_v24  ;;  %v2174_v21 = vshll.u32 %v9668_v7, 16  ;;  %v11183_v41 = vshrl.u32 %v9686_v32, 16  ;;  %v2164_v19 = vrot.slane %v2162_v23, 5 }
 0x184   : > { %v2158_v63 = vor.u32 %v2157_v42, %v2156_v5  ;;  %v7033_v36 = vcombine.low %v2136_v49, %v2146_v54  ;;  %v2155_v30 = vrot.slane %v2154_v46, 4  ;;  %v2167_v15 = vrot.slane %v2165_v60, 6 }
 0x185   : > { %v2179_v28 = vrot.slane %v11183_v41, 5  ;;  %v2173_v20 = vrot.slane %v2171_v61, 5  ;;  %v2176_v17 = vrot.slane %v2174_v21, 6  ;;  %v11184_v34 = vshll.u32 %v9686_v32, 16 }
 0x186   : > { %v2160_v52 = vrot.slane %v2158_v63, 4  ;;  %7985 = vmatmul.mubr.bf16.gmra.mrb[92].mxu0 %v7033_v36  ;;  %v2159_v7 = vsel %vm8758_vm8, %v2155_v30, %v2158_v63  ;;  %v2168_v5 = vor.u32 %v2167_v15, %v2164_v19  ;;  %v2185_v0 = vshrl.u32 %v6945_v31, 16  ;;  %v11188_v15 = vld [vmem:[#allocation16_spill] sm:$0xff] }
 0x187   : > { %v2180_v24 = vrot.slane %v11184_v34, 6  ;;  %v2188_v42 = vshll.u32 %v6945_v31, 16  ;;  %v2177_v41 = vor.u32 %v2176_v17, %v2173_v20  ;;  %v7380_v46 = vadd.f32 %v9538_v13, %v9533_v4  ;;  %v11189_v20 = vld [vmem:[#allocation18_spill] sm:$0xff]  ;;  %v11190_v17 = vld [vmem:[#allocation20_spill] sm:$0xff] }
 0x188   : > { %v7456_v23 = vadd.f32 %v9554_v26, %v9546_v8  ;;  %v2169_v60 = vsel %vm8758_vm8, %v2160_v52, %v2168_v5  ;;  %v2187_v32 = vrot.slane %v2185_v0, 5  ;;  %v7383_v54 = vadd.f32 %v9548_v59, %v9542_v56  ;;  %v11193_v0 = vld [vmem:[#allocation21_spill] sm:$0xff] }
 0x189   : > { %v2181_v49 = vor.u32 %v2180_v24, %v2179_v28  ;;  %v2190_v61 = vrot.slane %v2188_v42, 6  ;;  %v7034_v63 = vcombine.low %v2159_v7, %v2169_v60  ;;  %v2178_v21 = vrot.slane %v2177_v41, 4  ;;  %v11194_v42 = vld [vmem:[#allocation22_spill] sm:$0xff] }
 0x18a   : > { %v9869_v31 = vadd.f32 %v7456_v23, %v7380_v46  ;;  %v7459_v4 = vadd.f32 %v9562_v22, %v9558_v45  ;;  %v7386_v13 = vadd.f32 %v9598_v14, %v9593_v62  ;;  %v7462_v8 = vadd.f32 %v9614_v16, %v9612_v47  ;;  %v7414_v47 = vpop.f32.mrb[24].mxu0 }
 0x18b   : > { %v2183_v36 = vrot.slane %v2181_v49, 4  ;;  %v2191_v28 = vor.u32 %v2190_v61, %v2187_v32  ;;  %7988 = vmatprep.mubr.bf16.mxu0 %v7034_v63  ;;  %v2182_v26 = vsel %vm8758_vm8, %v2178_v21, %v2181_v49  ;;  %v7389_v56 = vadd.f32 %v9608_v51, %v9604_v50  ;;  %v11185_v51 = vld [vmem:[#allocation13_spill] sm:$0xff]  ;;  %v11186_v50 = vld [vmem:[#allocation14_spill] sm:$0xff] }
 0x18c   : > { %v7465_v59 = vadd.f32 %v9626_v55, %v9620_v44  ;;  %v7392_v30 = vadd.f32 %v9662_v43, %v9656_v40  ;;  %v9887_v22 = vadd.f32 %v7459_v4, %v7383_v54  ;;  %v9889_v62 = vadd.f32 %v7462_v8, %v7386_v13  ;;  %v11187_v55 = vld [vmem:[#allocation15_spill] sm:$0xff]  ;;  %v7415_v43 = vpop.f32.mrb[25].mxu0  ;;  %v7490_v61 = vpop.f32.mrb[24].mxu1 }
 0x18d   : > { %v2192_v45 = vsel %vm8758_vm8, %v2183_v36, %v2191_v28  ;;  %v7468_v14 = vadd.f32 %v9681_v35, %v9674_v57  ;;  %v7395_v44 = vadd.f32 %v11186_v50, %v11185_v51  ;;  %v7471_v40 = vadd.f32 %v11188_v15, %v11187_v55  ;;  %v11191_v35 = vld [vmem:[#allocation17_spill] sm:$0xff]  ;;  %v11192_v57 = vld [vmem:[#allocation19_spill] sm:$0xff]  ;;  %v7417_v7 = vpop.f32.mrb[26].mxu0 }
 0x18e   : > { %v7035_v16 = vcombine.low %v2182_v26, %v2192_v45  ;;  %v9893_v19 = vadd.f32 %v7465_v59, %v7389_v56  ;;  %v7398_v52 = vadd.f32 %v9724_v37, %v9722_v39  ;;  %v7474_v34 = vadd.f32 %v11190_v17, %v11189_v20  ;;  %v7418_v39 = vpop.f32.mrb[27].mxu0 }
 0x18f   : > { %v9899_v33 = vadd.f32 %v7468_v14, %v7392_v30  ;;  %v7401_v24 = vadd.f32 %v11192_v57, %v11191_v35  ;;  %v9907_v5 = vadd.f32 %v7471_v40, %v7395_v44  ;;  %v7477_v41 = vadd.f32 %v11194_v42, %v11193_v0 }
 0x190   : > { %7989 = vmatmul.mubr.bf16.gmra.mrb[96].mxu0 %v7035_v16  ;;  %v7404_v49 = vadd.f32 %v9774_v2, %v9768_v38  ;;  %v7480_v46 = vadd.f32 %v9793_v48, %v9787_v6  ;;  %v9915_v37 = vadd.f32 %v7474_v34, %v7398_v52  ;;  %v7407_v23 = vadd.f32 %v9785_v11, %v9779_v9  ;;  %v7491_v6 = vpop.f32.mrb[25].mxu1 }
 0x191   : > { %v7483_v60 = vadd.f32 %v9802_v12, %v9797_v10  ;;  %v7410_v32 = vadd.f32 %v9827_v18, %v9821_v1  ;;  %v9923_v54 = vadd.f32 %v7477_v41, %v7401_v24  ;;  %v7486_v38 = vadd.f32 %v9845_v27, %v9842_v53  ;;  %v7493_v12 = vpop.f32.mrb[26].mxu1 }
 0x192   : > { %v9925_v63 = vadd.f32 %v7480_v46, %v7404_v49  ;;  %v7413_v2 = vadd.f32 %v9834_v29, %v9832_v3  ;;  %v7489_v9 = vadd.f32 %v9855_v58, %v9853_v25  ;;  %v7416_v11 = vadd.f32 %v7415_v43, %v7414_v47  ;;  %v7494_v21 = vpop.f32.mrb[27].mxu1 }
 0x193   : > { %v9931_v48 = vadd.f32 %v7483_v60, %v7407_v23  ;;  %v7492_v10 = vadd.f32 %v7491_v6, %v7490_v61  ;;  %v9935_v1 = vadd.f32 %v7486_v38, %v7410_v32  ;;  %v7419_v18 = vadd.f32 %v7418_v39, %v7417_v7 }
 0x194   : > { %v9937_v36 = vadd.f32 %v7489_v9, %v7413_v2  ;;  %v7495_v53 = vadd.f32 %v7494_v21, %v7493_v12 }
 0x195   : > { %v9939_v28 = vadd.f32 %v7492_v10, %v7416_v11 }
 0x196   : > { %v9941_v27 = vadd.f32 %v7495_v53, %v7419_v18  ;;  %v7420_v3 = vpop.f32.mrb[28].mxu0 }
 0x197   : > { %v7421_v29 = vpop.f32.mrb[29].mxu0 }
 0x198   : > { %v7422_v4 = vadd.f32 %v7421_v29, %v7420_v3  ;;  %v7423_v13 = vpop.f32.mrb[30].mxu0 }
 0x199   : > { %v7424_v25 = vpop.f32.mrb[31].mxu0 }
 0x19a   : > { %v7496_v8 = vpop.f32.mrb[28].mxu1  ;;  %v7425_v26 = vadd.f32 %v7424_v25, %v7423_v13 }
 0x19b   : > { %v7497_v58 = vpop.f32.mrb[29].mxu1 }
 0x19c   : > { %v7498_v56 = vadd.f32 %v7497_v58, %v7496_v8  ;;  %v7499_v59 = vpop.f32.mrb[30].mxu1 }
 0x19d   : > { %v7500_v30 = vpop.f32.mrb[31].mxu1 }
 0x19e   : > { %v9943_v45 = vadd.f32 %v7498_v56, %v7422_v4  ;;  %v7501_v14 = vadd.f32 %v7500_v30, %v7499_v59 }
 0x1a0   : > { %v9945_v47 = vadd.f32 %v7501_v14, %v7425_v26 }
 0x1a5   : > { %v7426_v16 = vpop.f32.mrb[32].mxu0 }
 0x1a6   : > { %v7427_v51 = vpop.f32.mrb[33].mxu0 }
 0x1a7   : > { %v7428_v50 = vadd.f32 %v7427_v51, %v7426_v16  ;;  %v7429_v44 = vpop.f32.mrb[34].mxu0 }
 0x1a8   : > { %v7430_v55 = vpop.f32.mrb[35].mxu0 }
 0x1a9   : > { %v7502_v15 = vpop.f32.mrb[32].mxu1  ;;  %v7431_v40 = vadd.f32 %v7430_v55, %v7429_v44 }
 0x1aa   : > { %v7503_v43 = vpop.f32.mrb[33].mxu1 }
 0x1ab   : > { %v7504_v52 = vadd.f32 %v7503_v43, %v7502_v15  ;;  %v7505_v20 = vpop.f32.mrb[34].mxu1 }
 0x1ac   : > { %v7506_v17 = vpop.f32.mrb[35].mxu1 }
 0x1ad   : > { %v9947_v34 = vadd.f32 %v7504_v52, %v7428_v50  ;;  %v7507_v35 = vadd.f32 %v7506_v17, %v7505_v20 }
 0x1af   : > { %v9949_v57 = vadd.f32 %v7507_v35, %v7431_v40 }
 0x1b4   : > { %v7432_v24 = vpop.f32.mrb[36].mxu0 }
 0x1b5   : > { %v7433_v7 = vpop.f32.mrb[37].mxu0 }
 0x1b6   : > { %v7434_v0 = vadd.f32 %v7433_v7, %v7432_v24  ;;  %v7435_v42 = vpop.f32.mrb[38].mxu0 }
 0x1b7   : > { %v7436_v41 = vpop.f32.mrb[39].mxu0 }
 0x1b8   : > { %v7508_v49 = vpop.f32.mrb[36].mxu1  ;;  %v7437_v46 = vadd.f32 %v7436_v41, %v7435_v42 }
 0x1b9   : > { %v7509_v39 = vpop.f32.mrb[37].mxu1 }
 0x1ba   : > { %v7510_v23 = vadd.f32 %v7509_v39, %v7508_v49  ;;  %v7511_v60 = vpop.f32.mrb[38].mxu1 }
 0x1bb   : > { %v7512_v32 = vpop.f32.mrb[39].mxu1 }
 0x1bc   : > { %v9951_v61 = vadd.f32 %v7510_v23, %v7434_v0  ;;  %v7513_v38 = vadd.f32 %v7512_v32, %v7511_v60 }
 0x1be   : > { %v9953_v2 = vadd.f32 %v7513_v38, %v7437_v46  ;;  %v7530_v6 = vpop.f32.mrb[40].mxu0 }
 0x1bf   : > { %v7531_v9 = vpop.f32.mrb[41].mxu0 }
 0x1c0   : > { %v7532_v11 = vadd.f32 %v7531_v9, %v7530_v6  ;;  %v7533_v10 = vpop.f32.mrb[42].mxu0 }
 0x1c1   : > { %v7534_v12 = vpop.f32.mrb[43].mxu0 }
 0x1c2   : > { %v3390_v18 = vadd.f32 %v7532_v11, %v9869_v31  ;;  %v7535_v21 = vadd.f32 %v7534_v12, %v7533_v10 }
 0x1c4   : > { %v7606_v53 = vpop.f32.mrb[40].mxu1  ;;  %v3393_v3 = vadd.f32 %v7535_v21, %v9887_v22 }
 0x1c5   : > { %v7607_v29 = vpop.f32.mrb[41].mxu1 }
 0x1c6   : > { %v7608_v4 = vadd.f32 %v7607_v29, %v7606_v53  ;;  %v7609_v13 = vpop.f32.mrb[42].mxu1 }
 0x1c7   : > { %v7610_v8 = vpop.f32.mrb[43].mxu1 }
 0x1c8   : > { %v7611_v25 = vadd.f32 %v7610_v8, %v7609_v13  ;;  %v7536_v58 = vpop.f32.mrb[44].mxu0  ;;  %v9957_v26 = vadd.f32 %v7608_v4, %v3390_v18 }
 0x1c9   : > { %v7537_v56 = vpop.f32.mrb[45].mxu0 }
 0x1ca   : > { %v7538_v59 = vadd.f32 %v7537_v56, %v7536_v58  ;;  %v7539_v30 = vpop.f32.mrb[46].mxu0  ;;  %v9959_v14 = vadd.f32 %v7611_v25, %v3393_v3 }
 0x1cb   : > { %v7540_v16 = vpop.f32.mrb[47].mxu0 }
 0x1cc   : > { %v3398_v31 = vadd.f32 %v7538_v59, %v9889_v62  ;;  %v7541_v51 = vadd.f32 %v7540_v16, %v7539_v30 }
 0x1ce   : > { %v3401_v50 = vadd.f32 %v7541_v51, %v9893_v19 }
 0x1d2   : > { %v7612_v22 = vpop.f32.mrb[44].mxu1 }
 0x1d3   : > { %v7613_v44 = vpop.f32.mrb[45].mxu1 }
 0x1d4   : > { %v7614_v55 = vadd.f32 %v7613_v44, %v7612_v22  ;;  %v7615_v15 = vpop.f32.mrb[46].mxu1 }
 0x1d5   : > { %v7616_v40 = vpop.f32.mrb[47].mxu1 }
 0x1d6   : > { %v7617_v43 = vadd.f32 %v7616_v40, %v7615_v15  ;;  %v9963_v52 = vadd.f32 %v7614_v55, %v3398_v31  ;;  %v7542_v20 = vpop.f32.mrb[48].mxu0 }
 0x1d7   : > { %v7543_v17 = vpop.f32.mrb[49].mxu0 }
 0x1d8   : > { %v9965_v35 = vadd.f32 %v7617_v43, %v3401_v50  ;;  %v7544_v24 = vadd.f32 %v7543_v17, %v7542_v20  ;;  %v7545_v7 = vpop.f32.mrb[50].mxu0 }
 0x1d9   : > { %v7546_v0 = vpop.f32.mrb[51].mxu0 }
 0x1da   : > { %v3406_v62 = vadd.f32 %v7544_v24, %v9899_v33  ;;  %v7547_v42 = vadd.f32 %v7546_v0, %v7545_v7 }
 0x1dc   : > { %v3409_v19 = vadd.f32 %v7547_v42, %v9907_v5 }
 0x1df   : > { %v7618_v41 = vpop.f32.mrb[48].mxu1 }
 0x1e0   : > { %v7619_v49 = vpop.f32.mrb[49].mxu1 }
 0x1e1   : > { %v7620_v46 = vadd.f32 %v7619_v49, %v7618_v41  ;;  %v7621_v39 = vpop.f32.mrb[50].mxu1 }
 0x1e2   : > { %v7622_v23 = vpop.f32.mrb[51].mxu1 }
 0x1e3   : > { %v7548_v60 = vpop.f32.mrb[52].mxu0  ;;  %v7623_v32 = vadd.f32 %v7622_v23, %v7621_v39  ;;  %v9969_v6 = vadd.f32 %v7620_v46, %v3406_v62 }
 0x1e4   : > { %v7549_v38 = vpop.f32.mrb[53].mxu0 }
 0x1e5   : > { %v7550_v9 = vadd.f32 %v7549_v38, %v7548_v60  ;;  %v7551_v11 = vpop.f32.mrb[54].mxu0  ;;  %v9971_v12 = vadd.f32 %v7623_v32, %v3409_v19 }
 0x1e6   : > { %v7552_v10 = vpop.f32.mrb[55].mxu0 }
 0x1e7   : > { %v3414_v33 = vadd.f32 %v7550_v9, %v9915_v37  ;;  %v7553_v18 = vadd.f32 %v7552_v10, %v7551_v11 }
 0x1e9   : > { %v3417_v5 = vadd.f32 %v7553_v18, %v9923_v54 }
 0x1eb   : > { %v7624_v21 = vpop.f32.mrb[52].mxu1 }
 0x1ec   : > { %v7625_v53 = vpop.f32.mrb[53].mxu1 }
 0x1ed   : > { %v7626_v3 = vadd.f32 %v7625_v53, %v7624_v21  ;;  %v7627_v29 = vpop.f32.mrb[54].mxu1 }
 0x1ee   : > { %v7628_v4 = vpop.f32.mrb[55].mxu1 }
 0x1ef   : > { %v7554_v13 = vpop.f32.mrb[56].mxu0  ;;  %v7629_v8 = vadd.f32 %v7628_v4, %v7627_v29  ;;  %v9975_v58 = vadd.f32 %v7626_v3, %v3414_v33 }
 0x1f0   : > { %v7555_v25 = vpop.f32.mrb[57].mxu0 }
 0x1f1   : > { %v7556_v56 = vadd.f32 %v7555_v25, %v7554_v13  ;;  %v7557_v59 = vpop.f32.mrb[58].mxu0  ;;  %v9977_v16 = vadd.f32 %v7629_v8, %v3417_v5 }
 0x1f2   : > { %v7558_v30 = vpop.f32.mrb[59].mxu0 }
 0x1f3   : > { %v3422_v37 = vadd.f32 %v7556_v56, %v9925_v63  ;;  %v7559_v31 = vadd.f32 %v7558_v30, %v7557_v59 }
 0x1f5   : > { %v3425_v54 = vadd.f32 %v7559_v31, %v9931_v48 }
 0x1f7   : > { %v7630_v51 = vpop.f32.mrb[56].mxu1 }
 0x1f8   : > { %v7631_v50 = vpop.f32.mrb[57].mxu1 }
 0x1f9   : > { %v7632_v22 = vadd.f32 %v7631_v50, %v7630_v51  ;;  %v7633_v44 = vpop.f32.mrb[58].mxu1 }
 0x1fa   : > { %v7634_v55 = vpop.f32.mrb[59].mxu1 }
 0x1fb   : > { %v7560_v15 = vpop.f32.mrb[60].mxu0  ;;  %v7635_v40 = vadd.f32 %v7634_v55, %v7633_v44  ;;  %v9981_v20 = vadd.f32 %v7632_v22, %v3422_v37 }
 0x1fc   : > { %v7561_v43 = vpop.f32.mrb[61].mxu0 }
 0x1fd   : > { %v7562_v17 = vadd.f32 %v7561_v43, %v7560_v15  ;;  %v7563_v24 = vpop.f32.mrb[62].mxu0  ;;  %v9983_v0 = vadd.f32 %v7635_v40, %v3425_v54 }
 0x1fe   : > { %v7564_v7 = vpop.f32.mrb[63].mxu0 }
 0x1ff   : > { %v3430_v63 = vadd.f32 %v7562_v17, %v9935_v1  ;;  %v7565_v62 = vadd.f32 %v7564_v7, %v7563_v24 }
 0x201   : > { %v3433_v48 = vadd.f32 %v7565_v62, %v9937_v36 }
 0x204   : > { %v7636_v42 = vpop.f32.mrb[60].mxu1 }
 0x205   : > { %v7637_v19 = vpop.f32.mrb[61].mxu1 }
 0x206   : > { %v7638_v41 = vadd.f32 %v7637_v19, %v7636_v42  ;;  %v7639_v49 = vpop.f32.mrb[62].mxu1 }
 0x207   : > { %v7640_v46 = vpop.f32.mrb[63].mxu1  ;;  %v7566_v39 = vpop.f32.mrb[64].mxu0 }
 0x208   : > { %v7641_v23 = vadd.f32 %v7640_v46, %v7639_v49  ;;  %v7567_v60 = vpop.f32.mrb[65].mxu0  ;;  %v9987_v32 = vadd.f32 %v7638_v41, %v3430_v63 }
 0x209   : > { %v7568_v38 = vadd.f32 %v7567_v60, %v7566_v39  ;;  %v7569_v9 = vpop.f32.mrb[66].mxu0 }
 0x20a   : > { %v7570_v11 = vpop.f32.mrb[67].mxu0  ;;  %v9989_v10 = vadd.f32 %v7641_v23, %v3433_v48 }
 0x20b   : > { %v3438_v1 = vadd.f32 %v7568_v38, %v9939_v28  ;;  %v7571_v33 = vadd.f32 %v7570_v11, %v7569_v9 }
 0x20d   : > { %v3441_v36 = vadd.f32 %v7571_v33, %v9941_v27 }
 0x210   : > { %v7642_v18 = vpop.f32.mrb[64].mxu1 }
 0x211   : > { %v7643_v5 = vpop.f32.mrb[65].mxu1 }
 0x212   : > { %v7644_v21 = vadd.f32 %v7643_v5, %v7642_v18  ;;  %v7645_v53 = vpop.f32.mrb[66].mxu1 }
 0x213   : > { %v7646_v3 = vpop.f32.mrb[67].mxu1  ;;  %v7572_v4 = vpop.f32.mrb[68].mxu0 }
 0x214   : > { %v7647_v29 = vadd.f32 %v7646_v3, %v7645_v53  ;;  %v9993_v13 = vadd.f32 %v7644_v21, %v3438_v1  ;;  %v7573_v8 = vpop.f32.mrb[69].mxu0 }
 0x215   : > { %v7574_v25 = vadd.f32 %v7573_v8, %v7572_v4  ;;  %v7575_v56 = vpop.f32.mrb[70].mxu0  ;;  %v10016_v4 = vld [vmem:[%s11105_s2] ss:$0 sm:$0xff] }
 0x216   : > { %v9995_v59 = vadd.f32 %v7647_v29, %v3441_v36  ;;  %v7576_v30 = vpop.f32.mrb[71].mxu0 }
 0x217   : > { %v3446_v28 = vadd.f32 %v7574_v25, %v9943_v45  ;;  %v7577_v37 = vadd.f32 %v7576_v30, %v7575_v56 }
 0x219   : > { %v3449_v27 = vadd.f32 %v7577_v37, %v9945_v47 }
 0x21c   : > { %v7648_v31 = vpop.f32.mrb[68].mxu1 }
 0x21d   : > { %v7649_v54 = vpop.f32.mrb[69].mxu1 }
 0x21e   : > { %v7650_v51 = vadd.f32 %v7649_v54, %v7648_v31  ;;  %v7651_v50 = vpop.f32.mrb[70].mxu1 }
 0x21f   : > { %v7652_v22 = vpop.f32.mrb[71].mxu1 }
 0x220   : > { %v7578_v44 = vpop.f32.mrb[72].mxu0  ;;  %v7653_v55 = vadd.f32 %v7652_v22, %v7651_v50  ;;  %v9999_v40 = vadd.f32 %v7650_v51, %v3446_v28 }
 0x221   : > { %v7579_v15 = vpop.f32.mrb[73].mxu0 }
 0x222   : > { %v7580_v43 = vadd.f32 %v7579_v15, %v7578_v44  ;;  %v7581_v17 = vpop.f32.mrb[74].mxu0  ;;  %v10001_v7 = vadd.f32 %v7653_v55, %v3449_v27 }
 0x223   : > { %v7582_v24 = vpop.f32.mrb[75].mxu0 }
 0x224   : > { %v3454_v45 = vadd.f32 %v7580_v43, %v9947_v34  ;;  %v7583_v63 = vadd.f32 %v7582_v24, %v7581_v17 }
 0x226   : > { %v3457_v47 = vadd.f32 %v7583_v63, %v9949_v57 }
 0x229   : > { %v7654_v62 = vpop.f32.mrb[72].mxu1 }
 0x22a   : > { %v7655_v48 = vpop.f32.mrb[73].mxu1 }
 0x22b   : > { %v7656_v42 = vadd.f32 %v7655_v48, %v7654_v62  ;;  %v7657_v19 = vpop.f32.mrb[74].mxu1 }
 0x22c   : > { %v7658_v41 = vpop.f32.mrb[75].mxu1  ;;  %v7584_v49 = vpop.f32.mrb[76].mxu0 }
 0x22d   : > { %v7659_v46 = vadd.f32 %v7658_v41, %v7657_v19  ;;  %v7585_v39 = vpop.f32.mrb[77].mxu0  ;;  %v10005_v23 = vadd.f32 %v7656_v42, %v3454_v45 }
 0x22e   : > { %v7586_v60 = vadd.f32 %v7585_v39, %v7584_v49  ;;  %v7587_v38 = vpop.f32.mrb[78].mxu0 }
 0x22f   : > { %v7588_v9 = vpop.f32.mrb[79].mxu0  ;;  %v10007_v11 = vadd.f32 %v7659_v46, %v3457_v47 }
 0x230   : > { %v3462_v34 = vadd.f32 %v7586_v60, %v9951_v61  ;;  %v7589_v1 = vadd.f32 %v7588_v9, %v7587_v38 }
 0x232   : > { %v3465_v57 = vadd.f32 %v7589_v1, %v9953_v2  ;;  %v10024_v2 = vld [vmem:[%s11106_s3] ss:$0 sm:$0xff] }
 0x235   : > { %v7660_v33 = vpop.f32.mrb[76].mxu1 }
 0x236   : > { %v7661_v36 = vpop.f32.mrb[77].mxu1 }
 0x237   : > { %v7662_v18 = vadd.f32 %v7661_v36, %v7660_v33  ;;  %v7663_v5 = vpop.f32.mrb[78].mxu1 }
 0x238   : > { %v7664_v21 = vpop.f32.mrb[79].mxu1 }
 0x239   : > { %v7665_v53 = vadd.f32 %v7664_v21, %v7663_v5  ;;  %v10011_v3 = vadd.f32 %v7662_v18, %v3462_v34 }
 0x23b   : > { %v7974_v29 = vpop.f32.mrb[80].mxu0  ;;  %v10019_v25 = vadd.f32 %v7665_v53, %v3465_v57  ;;  %v4043_v57 = vld [vmem:[#allocation2 + $0xc] sm:$0xf] }
 0x23c   : > { %v3624_v8 = vadd.f32 %v7974_v29, %v9963_v52  ;;  %v3615_v61 = vpop.f32.mrb[81].mxu0  ;;  %v4034_v29 = vld [vmem:[#allocation2] sm:$0xf] }
 0x23d   : > { %v3616_v56 = vadd.f32 %v3615_v61, %v9957_v26  ;;  %v7975_v30 = vpop.f32.mrb[82].mxu0 }
 0x23e   : > { %v3703_v28 = vmul.f32 %v10016_v4, %v3624_v8  ;;  %v3627_v37 = vadd.f32 %v7975_v30, %v9965_v35  ;;  %v3618_v27 = vpop.f32.mrb[83].mxu0 }
 0x23f   : > { %v3701_v31 = vmul.f32 %v10016_v4, %v3616_v56  ;;  %v3619_v52 = vadd.f32 %v3618_v27, %v9959_v14 }
 0x240   : > { %v3730_v54 = vadd.f32 %v10024_v2, %v3703_v28  ;;  %v3704_v51 = vmul.f32 %v10016_v4, %v3627_v37  ;;  %v4047_v37 = vld [vmem:[#allocation2 + $0x14] sm:$0x1] }
 0x241   : > { %v3728_v50 = vadd.f32 %v10024_v2, %v3701_v31  ;;  %v3702_v22 = vmul.f32 %v10016_v4, %v3619_v52 }
 0x242   : > { %v3750_v44 = vmax.f32 %v3730_v54, 0.0  ;;  %v3731_v26 = vadd.f32 %v10024_v2, %v3704_v51 }
 0x243   : > { %v3748_v55 = vmax.f32 %v3728_v50, 0.0  ;;  %v3729_v35 = vadd.f32 %v10024_v2, %v3702_v22  ;;  %v4040_v50 = vld [vmem:[#allocation2 + $0x8] sm:$0x1] }
 0x244   : > { %v7343_v15 = vpack.c.bf16 %v3750_v44, %v3750_v44  ;;  %v3751_v14 = vmax.f32 %v3731_v26, 0.0 }
 0x245   : > { %v7978_v43 = vpop.f32.mrb[84].mxu0  ;;  %v7341_v17 = vpack.c.bf16 %v3748_v55, %v3748_v55  ;;  %v3749_v24 = vmax.f32 %v3729_v35, 0.0 }
 0x246   : > { %v3640_v45 = vadd.f32 %v7978_v43, %v9975_v58  ;;  %v3631_v63 = vpop.f32.mrb[85].mxu0  ;;  %v3849_v47 = vshrl.u32 %v7343_v15, 16  ;;  %v3852_v62 = vshll.u32 %v7343_v15, 16  ;;  %v7344_v48 = vpack.c.bf16 %v3751_v14, %v3751_v14 }
 0x247   : > { %v3632_v42 = vadd.f32 %v3631_v63, %v9969_v6  ;;  %v7979_v19 = vpop.f32.mrb[86].mxu0  ;;  %v3832_v41 = vshrl.u32 %v7341_v17, 16  ;;  %v3835_v49 = vshll.u32 %v7341_v17, 16  ;;  %v7342_v46 = vpack.c.bf16 %v3749_v24, %v3749_v24 }
 0x248   : > { %v3707_v39 = vmul.f32 %v10016_v4, %v3640_v45  ;;  %v3634_v60 = vpop.f32.mrb[87].mxu0  ;;  %v3851_v38 = vrot.slane %v3849_v47, 7  ;;  %v3857_v9 = vshrl.u32 %v7344_v48, 16  ;;  %v3860_v34 = vshll.u32 %v7344_v48, 16 }
 0x249   : > { %v3705_v1 = vmul.f32 %v10016_v4, %v3632_v42  ;;  %v3834_v6 = vrot.slane %v3832_v41, 7  ;;  %v3840_v33 = vshrl.u32 %v7342_v46, 16  ;;  %v3843_v36 = vshll.u32 %v7342_v46, 16 }
 0x24a   : > { %v3734_v18 = vadd.f32 %v10024_v2, %v3707_v39  ;;  %v3854_v5 = vor.u32 %v3852_v62, %v3851_v38  ;;  %v3855_v21 = vrot.slane %v3851_v38, 4  ;;  %v3859_v8 = vrot.slane %v3857_v9, 7 }
 0x24b   : > { %v3732_v61 = vadd.f32 %v10024_v2, %v3705_v1  ;;  %v3837_v56 = vor.u32 %v3835_v49, %v3834_v6  ;;  %v3838_v30 = vrot.slane %v3834_v6, 4  ;;  %v3842_v27 = vrot.slane %v3840_v33, 7  ;;  %v4057_v1 = vld [vmem:[#allocation2 + $0x24] sm:$0xf] }
 0x24c   : > { %v3754_v31 = vmax.f32 %v3734_v18, 0.0  ;;  %v4044_v52 = vsel %vm10043_vm14, %v3854_v5, %v4043_v57  ;;  %v3862_v54 = vor.u32 %v3860_v34, %v3859_v8  ;;  %v3864_v51 = vrot.slane %v3859_v8, 4  ;;  %v4050_v18 = vld [vmem:[#allocation2 + $0x18] sm:$0xf] }
 0x24d   : > { %v3752_v22 = vmax.f32 %v3732_v61, 0.0  ;;  %4045 = vst [vmem:[#allocation2 + $0xc] sm:$0xf] %v4044_v52  ;;  %v4035_v44 = vsel %vm10043_vm14, %v3837_v56, %v4034_v29  ;;  %v3845_v26 = vor.u32 %v3843_v36, %v3842_v27  ;;  %v3847_v55 = vrot.slane %v3842_v27, 4 }
 0x24e   : > { %v7347_v35 = vpack.c.bf16 %v3754_v31, %v3754_v31  ;;  %4036 = vst [vmem:[#allocation2] sm:$0xf] %v4035_v44  ;;  %v3863_v14 = vsel %vm10057_vm0, %v3855_v21, %v3862_v54  ;;  %v4048_v43 = vsel %vm10050_vm15, %v3864_v51, %v4047_v37  ;;  %v3643_v24 = vadd.f32 %v7979_v19, %v9977_v16 }
 0x24f   : > { %v7982_v15 = vpop.f32.mrb[88].mxu0  ;;  %v7345_v17 = vpack.c.bf16 %v3752_v22, %v3752_v22  ;;  %4046 = vst [vmem:[#allocation2 + $0x10] sm:$0xf] %v3863_v14  ;;  %4049 = vst [vmem:[#allocation2 + $0x14] sm:$0x1] %v4048_v43  ;;  %v3846_v63 = vsel %vm10057_vm0, %v3838_v30, %v3845_v26  ;;  %v4041_v47 = vsel %vm10050_vm15, %v3847_v55, %v4040_v50 }
 0x250   : > { %v3647_v45 = vpop.f32.mrb[89].mxu0  ;;  %v3883_v62 = vshrl.u32 %v7347_v35, 16  ;;  %v3886_v48 = vshll.u32 %v7347_v35, 16  ;;  %4037 = vst [vmem:[#allocation2 + $0x4] sm:$0xf] %v3846_v63  ;;  %v3708_v46 = vmul.f32 %v10016_v4, %v3643_v24  ;;  %v3635_v16 = vadd.f32 %v3634_v60, %v9971_v12 }
 0x251   : > { %v7983_v42 = vpop.f32.mrb[90].mxu0  ;;  %4042 = vst [vmem:[#allocation2 + $0x8] sm:$0x1] %v4041_v47  ;;  %v3866_v41 = vshrl.u32 %v7345_v17, 16  ;;  %v3869_v49 = vshll.u32 %v7345_v17, 16  ;;  %v3656_v38 = vadd.f32 %v7982_v15, %v9987_v32  ;;  %v3648_v9 = vadd.f32 %v3647_v45, %v9981_v20 }
 0x252   : > { %v3650_v19 = vpop.f32.mrb[91].mxu0  ;;  %v10076_v39 = vrot.slane %v3883_v62, 7  ;;  %v3659_v34 = vadd.f32 %v7983_v42, %v9989_v10  ;;  %v3735_v6 = vadd.f32 %v10024_v2, %v3708_v46  ;;  %v3706_v33 = vmul.f32 %v10016_v4, %v3635_v16 }
 0x253   : > { %v10081_v57 = vrot.slane %v3866_v41, 7  ;;  %v3651_v36 = vadd.f32 %v3650_v19, %v9983_v0  ;;  %v3711_v32 = vmul.f32 %v10016_v4, %v3656_v38  ;;  %v3709_v20 = vmul.f32 %v10016_v4, %v3648_v9  ;;  %v4061_v38 = vld [vmem:[#allocation2 + $0x2c] sm:$0x1] }
 0x254   : > { %v3888_v12 = vor.u32 %v3886_v48, %v10076_v39  ;;  %v3889_v60 = vrot.slane %v10076_v39, 4  ;;  %v4109_v5 = vld [vmem:[#allocation2 + $0xc] sm:$0x1]  ;;  %v3755_v29 = vmax.f32 %v3735_v6, 0.0  ;;  %v3733_v8 = vadd.f32 %v10024_v2, %v3706_v33  ;;  %v4064_v39 = vld [vmem:[#allocation2 + $0x30] sm:$0xf] }
 0x255   : > { %v3871_v21 = vor.u32 %v3869_v49, %v10081_v57  ;;  %v3872_v0 = vrot.slane %v10081_v57, 4  ;;  %v4110_v61 = vsel %vm10050_vm15, 0, %v4109_v5  ;;  %v4106_v56 = vld [vmem:[#allocation2] sm:$0x1]  ;;  %v3738_v37 = vadd.f32 %v10024_v2, %v3711_v32 }
 0x256   : > { %v4058_v30 = vsel %vm10043_vm14, %v3888_v12, %v4057_v1  ;;  %v3736_v27 = vadd.f32 %v10024_v2, %v3709_v20  ;;  %4111 = vst [vmem:[#allocation2 + $0xc] sm:$0x1] %v4110_v61  ;;  %v4107_v31 = vsel %vm10050_vm15, 0, %v4106_v56  ;;  %v4140_v52 = vld [vmem:[#allocation2 + $0x14] sm:$0x1]  ;;  %v7348_v51 = vpack.c.bf16 %v3755_v29, %v3755_v29 }
 0x257   : > { %4059 = vst [vmem:[#allocation2 + $0x24] sm:$0xf] %v4058_v30  ;;  %v4051_v54 = vsel %vm10043_vm14, %v3871_v21, %v4050_v18  ;;  %v3753_v50 = vmax.f32 %v3733_v8, 0.0  ;;  %4108 = vst [vmem:[#allocation2] sm:$0x1] %v4107_v31  ;;  %v4141_v44 = vsel %vm10092_vm1, 0, %v4140_v52  ;;  %v3712_v15 = vmul.f32 %v10016_v4, %v3659_v34 }
 0x258   : > { %v4137_v26 = vld [vmem:[#allocation2 + $0x8] sm:$0x1]  ;;  %4052 = vst [vmem:[#allocation2 + $0x18] sm:$0xf] %v4051_v54  ;;  %v3758_v55 = vmax.f32 %v3738_v37, 0.0  ;;  %v3756_v35 = vmax.f32 %v3736_v27, 0.0  ;;  %v3710_v42 = vmul.f32 %v10016_v4, %v3651_v36 }
 0x259   : > { %v7986_v22 = vpop.f32.mrb[92].mxu0  ;;  %4142 = vst [vmem:[#allocation2 + $0x14] sm:$0x1] %v4141_v44  ;;  %v4138_v43 = vsel %vm10092_vm1, 0, %v4137_v26  ;;  %v3891_v17 = vshrl.u32 %v7348_v51, 16  ;;  %v3894_v24 = vshll.u32 %v7348_v51, 16  ;;  %v7346_v45 = vpack.c.bf16 %v3753_v50, %v3753_v50 }
 0x25a   : > { %v10112_v14 = vpop.f32.mrb[93].mxu0  ;;  %4139 = vst [vmem:[#allocation2 + $0x8] sm:$0x1] %v4138_v43  ;;  %v7351_v47 = vpack.c.bf16 %v3758_v55, %v3758_v55  ;;  %v7349_v62 = vpack.c.bf16 %v3756_v35, %v3756_v35  ;;  %v3739_v48 = vadd.f32 %v10024_v2, %v3712_v15  ;;  %v3672_v19 = vadd.f32 %v7986_v22, %v9999_v40  ;;  %v4054_v5 = vld [vmem:[#allocation2 + $0x20] sm:$0x1] }
 0x25b   : > { %v10116_v63 = vpop.f32.mrb[94].mxu0  ;;  %v3893_v49 = vrot.slane %v3891_v17, 7  ;;  %v3874_v46 = vshrl.u32 %v7346_v45, 16  ;;  %v3877_v16 = vshll.u32 %v7346_v45, 16  ;;  %v3737_v29 = vadd.f32 %v10024_v2, %v3710_v42  ;;  %v4071_v27 = vld [vmem:[#allocation2 + $0x3c] sm:$0xf] }
 0x25c   : > { %v3666_v41 = vpop.f32.mrb[95].mxu0  ;;  %v3917_v9 = vshrl.u32 %v7351_v47, 16  ;;  %v3920_v34 = vshll.u32 %v7351_v47, 16  ;;  %v3900_v1 = vshrl.u32 %v7349_v62, 16  ;;  %v3903_v6 = vshll.u32 %v7349_v62, 16 }
 0x25d   : > { %v3896_v33 = vor.u32 %v3894_v24, %v3893_v49  ;;  %v3898_v12 = vrot.slane %v3893_v49, 4  ;;  %v3876_v18 = vrot.slane %v3874_v46, 7  ;;  %v3759_v32 = vmax.f32 %v3739_v48, 0.0 }
 0x25e   : > { %v4115_v20 = vld [vmem:[#allocation2 + $0x24] sm:$0x1]  ;;  %v10121_v21 = vrot.slane %v3917_v9, 7  ;;  %v10123_v36 = vrot.slane %v3900_v1, 7  ;;  %v3715_v8 = vmul.f32 %v10016_v4, %v3672_v19  ;;  %v3757_v43 = vmax.f32 %v3737_v29, 0.0 }
 0x25f   : > { %v4116_v40 = vsel %vm10050_vm15, 0, %v4115_v20  ;;  %v4112_v61 = vld [vmem:[#allocation2 + $0x18] sm:$0x1]  ;;  %v3897_v56 = vsel %vm10057_vm0, %v3889_v60, %v3896_v33  ;;  %v4062_v30 = vsel %vm10050_vm15, %v3898_v12, %v4061_v38  ;;  %v3879_v37 = vor.u32 %v3877_v16, %v3876_v18 }
 0x260   : > { %4117 = vst [vmem:[#allocation2 + $0x24] sm:$0x1] %v4116_v40  ;;  %v4113_v31 = vsel %vm10050_vm15, 0, %v4112_v61  ;;  %4060 = vst [vmem:[#allocation2 + $0x28] sm:$0xf] %v3897_v56  ;;  %v3881_v52 = vrot.slane %v3876_v18, 4  ;;  %v3922_v54 = vor.u32 %v3920_v34, %v10121_v21  ;;  %v3905_v22 = vor.u32 %v3903_v6, %v10123_v36 }
 0x261   : > { %4063 = vst [vmem:[#allocation2 + $0x2c] sm:$0x1] %v4062_v30  ;;  %v3923_v51 = vrot.slane %v10121_v21, 4  ;;  %4114 = vst [vmem:[#allocation2 + $0x18] sm:$0x1] %v4113_v31  ;;  %v3880_v60 = vsel %vm10057_vm0, %v3872_v0, %v3879_v37  ;;  %v3906_v44 = vrot.slane %v10123_v36, 4  ;;  %v7352_v26 = vpack.c.bf16 %v3759_v32, %v3759_v32 }
 0x262   : > { %4053 = vst [vmem:[#allocation2 + $0x1c] sm:$0xf] %v3880_v60  ;;  %v4055_v35 = vsel %vm10050_vm15, %v3881_v52, %v4054_v5  ;;  %v4072_v15 = vsel %vm10043_vm14, %v3922_v54, %v4071_v27  ;;  %v3742_v17 = vadd.f32 %v10024_v2, %v3715_v8  ;;  %v4065_v0 = vsel %vm10043_vm14, %v3905_v22, %v4064_v39  ;;  %v4075_v34 = vld [vmem:[#allocation2 + $0x44] sm:$0x1]  ;;  %v4068_v5 = vld [vmem:[#allocation2 + $0x38] sm:$0x1] }
 0x263   : > { %v7990_v50 = vpop.f32.mrb[96].mxu0  ;;  %4056 = vst [vmem:[#allocation2 + $0x20] sm:$0x1] %v4055_v35  ;;  %4073 = vst [vmem:[#allocation2 + $0x3c] sm:$0xf] %v4072_v15  ;;  %v3925_v24 = vshrl.u32 %v7352_v26, 16  ;;  %v3664_v47 = vadd.f32 %v10112_v14, %v9993_v13  ;;  %v7350_v48 = vpack.c.bf16 %v3757_v43, %v3757_v43  ;;  %v3675_v49 = vadd.f32 %v10116_v63, %v10001_v7 }
 0x264   : > { %v3679_v55 = vpop.f32.mrb[97].mxu0  ;;  %v3928_v45 = vshll.u32 %v7352_v26, 16  ;;  %4066 = vst [vmem:[#allocation2 + $0x30] sm:$0xf] %v4065_v0  ;;  %v3762_v42 = vmax.f32 %v3742_v17, 0.0  ;;  %v3667_v46 = vadd.f32 %v3666_v41, %v9995_v59  ;;  %v3688_v38 = vadd.f32 %v7990_v50, %v10011_v3 }
 0x265   : > { %v10150_v57 = vpop.f32.mrb[98].mxu0  ;;  %v3927_v16 = vrot.slane %v3925_v24, 7  ;;  %v3713_v19 = vmul.f32 %v10016_v4, %v3664_v47  ;;  %v3680_v9 = vadd.f32 %v3679_v55, %v10005_v23  ;;  %v3908_v1 = vshrl.u32 %v7350_v48, 16  ;;  %v4085_v21 = vld [vmem:[#allocation2 + $0x54] sm:$0xf] }
 0x266   : > { %v10156_v62 = vpop.f32.mrb[99].mxu0  ;;  %v3911_v13 = vshll.u32 %v7350_v48, 16  ;;  %v7355_v14 = vpack.c.bf16 %v3762_v42, %v3762_v42  ;;  %v3716_v6 = vmul.f32 %v10016_v4, %v3675_v49  ;;  %v3714_v59 = vmul.f32 %v10016_v4, %v3667_v46  ;;  %v4078_v48 = vld [vmem:[#allocation2 + $0x48] sm:$0xf] }
 0x267   : > { %v3930_v12 = vor.u32 %v3928_v45, %v3927_v16  ;;  %v3932_v18 = vrot.slane %v3927_v16, 4  ;;  %v3740_v7 = vadd.f32 %v10024_v2, %v3713_v19  ;;  %v3910_v41 = vrot.slane %v3908_v1, 7 }
 0x268   : > { %v4146_v33 = vld [vmem:[#allocation2 + $0x2c] sm:$0x1]  ;;  %v3951_v3 = vshrl.u32 %v7355_v14, 16  ;;  %v3954_v32 = vshll.u32 %v7355_v14, 16  ;;  %v3743_v8 = vadd.f32 %v10024_v2, %v3716_v6  ;;  %v3741_v27 = vadd.f32 %v10024_v2, %v3714_v59  ;;  %v4089_v14 = vld [vmem:[#allocation2 + $0x5c] sm:$0x1] }
 0x269   : > { %v4147_v63 = vsel %vm10092_vm1, 0, %v4146_v33  ;;  %v3931_v23 = vsel %vm10057_vm0, %v3923_v51, %v3930_v12  ;;  %v4076_v20 = vsel %vm10050_vm15, %v3932_v18, %v4075_v34  ;;  %v3760_v29 = vmax.f32 %v3740_v7, 0.0 }
 0x26a   : > { %4148 = vst [vmem:[#allocation2 + $0x2c] sm:$0x1] %v4147_v63  ;;  %v4143_v40 = vld [vmem:[#allocation2 + $0x20] sm:$0x1]  ;;  %v4121_v61 = vld [vmem:[#allocation2 + $0x3c] sm:$0x1]  ;;  %v3913_v56 = vor.u32 %v3911_v13, %v3910_v41  ;;  %v3719_v0 = vmul.f32 %v10016_v4, %v3688_v38  ;;  %v3717_v36 = vmul.f32 %v10016_v4, %v3680_v9  ;;  %v3691_v47 = vadd.f32 %v10150_v57, %v10019_v25 }
 0x26b   : > { %4074 = vst [vmem:[#allocation2 + $0x40] sm:$0xf] %v3931_v23  ;;  %4077 = vst [vmem:[#allocation2 + $0x44] sm:$0x1] %v4076_v20  ;;  %v3915_v30 = vrot.slane %v3910_v41, 4  ;;  %v3953_v37 = vrot.slane %v3951_v3, 7  ;;  %v7353_v51 = vpack.c.bf16 %v3760_v29, %v3760_v29  ;;  %v3683_v16 = vadd.f32 %v10156_v62, %v10007_v11 }
 0x26c   : > { %v4144_v31 = vsel %vm10092_vm1, 0, %v4143_v40  ;;  %v4122_v52 = vsel %vm10050_vm15, 0, %v4121_v61  ;;  %v4118_v54 = vld [vmem:[#allocation2 + $0x30] sm:$0x1]  ;;  %v3763_v39 = vmax.f32 %v3743_v8, 0.0  ;;  %v3914_v60 = vsel %vm10057_vm0, %v3906_v44, %v3913_v56 }
 0x26d   : > { %4145 = vst [vmem:[#allocation2 + $0x20] sm:$0x1] %v4144_v31  ;;  %4123 = vst [vmem:[#allocation2 + $0x3c] sm:$0x1] %v4122_v52  ;;  %v4119_v50 = vsel %vm10050_vm15, 0, %v4118_v54  ;;  %v4069_v22 = vsel %vm10050_vm15, %v3915_v30, %v4068_v5  ;;  %v3956_v26 = vor.u32 %v3954_v32, %v3953_v37  ;;  %v3957_v55 = vrot.slane %v3953_v37, 4 }
 0x26e   : > { %4120 = vst [vmem:[#allocation2 + $0x30] sm:$0x1] %v4119_v50  ;;  %4067 = vst [vmem:[#allocation2 + $0x34] sm:$0xf] %v3914_v60  ;;  %v3934_v35 = vshrl.u32 %v7353_v51, 16  ;;  %v7356_v15 = vpack.c.bf16 %v3763_v39, %v3763_v39  ;;  %v3761_v17 = vmax.f32 %v3741_v27, 0.0  ;;  %v3746_v49 = vadd.f32 %v10024_v2, %v3719_v0 }
 0x26f   : > { %4070 = vst [vmem:[#allocation2 + $0x38] sm:$0x1] %v4069_v22  ;;  %v4086_v43 = vsel %vm10043_vm14, %v3956_v26, %v4085_v21  ;;  %v3937_v24 = vshll.u32 %v7353_v51, 16  ;;  %v3744_v46 = vadd.f32 %v10024_v2, %v3717_v36  ;;  %v3720_v1 = vmul.f32 %v10016_v4, %v3691_v47  ;;  %v4082_v20 = vld [vmem:[#allocation2 + $0x50] sm:$0x1] }
 0x270   : > { %4087 = vst [vmem:[#allocation2 + $0x54] sm:$0xf] %v4086_v43  ;;  %v3936_v44 = vrot.slane %v3934_v35, 7  ;;  %v3959_v45 = vshrl.u32 %v7356_v15, 16  ;;  %v7354_v42 = vpack.c.bf16 %v3761_v17, %v3761_v17  ;;  %v3962_v9 = vshll.u32 %v7356_v15, 16 }
 0x271   : > { %v3766_v6 = vmax.f32 %v3746_v49, 0.0  ;;  %v3764_v11 = vmax.f32 %v3744_v46, 0.0  ;;  %v3747_v63 = vadd.f32 %v10024_v2, %v3720_v1  ;;  %v3718_v41 = vmul.f32 %v10016_v4, %v3683_v16  ;;  %v4099_v51 = vld [vmem:[#allocation2 + $0x6c] sm:$0xf]  ;;  %v4092_v26 = vld [vmem:[#allocation2 + $0x60] sm:$0xf] }
 0x272   : > { %v4152_v19 = vld [vmem:[#allocation2 + $0x44] sm:$0x1]  ;;  %v3939_v38 = vor.u32 %v3937_v24, %v3936_v44  ;;  %v3961_v34 = vrot.slane %v3959_v45, 7  ;;  %v3942_v25 = vshrl.u32 %v7354_v42, 16  ;;  %v3945_v57 = vshll.u32 %v7354_v42, 16 }
 0x273   : > { %v4153_v13 = vsel %vm10092_vm1, 0, %v4152_v19  ;;  %v7359_v59 = vpack.c.bf16 %v3766_v6, %v3766_v6  ;;  %v7357_v5 = vpack.c.bf16 %v3764_v11, %v3764_v11  ;;  %v3940_v29 = vrot.slane %v3936_v44, 4 }
 0x274   : > { %4154 = vst [vmem:[#allocation2 + $0x44] sm:$0x1] %v4153_v13  ;;  %v4079_v33 = vsel %vm10043_vm14, %v3939_v38, %v4078_v48  ;;  %v3964_v12 = vor.u32 %v3962_v9, %v3961_v34  ;;  %v3966_v18 = vrot.slane %v3961_v34, 4  ;;  %v3944_v7 = vrot.slane %v3942_v25, 7  ;;  %v4103_v48 = vld [vmem:[#allocation2 + $0x74] sm:$0x1] }
 0x275   : > { %4080 = vst [vmem:[#allocation2 + $0x48] sm:$0xf] %v4079_v33  ;;  %v3985_v61 = vshrl.u32 %v7359_v59, 16  ;;  %v3988_v56 = vshll.u32 %v7359_v59, 16  ;;  %v3968_v30 = vshrl.u32 %v7357_v5, 16  ;;  %v3767_v37 = vmax.f32 %v3747_v63, 0.0 }
 0x276   : > { %v4149_v62 = vld [vmem:[#allocation2 + $0x38] sm:$0x1]  ;;  %v3965_v32 = vsel %vm10057_vm0, %v3957_v55, %v3964_v12  ;;  %v4090_v23 = vsel %vm10050_vm15, %v3966_v18, %v4089_v14  ;;  %v3947_v8 = vor.u32 %v3945_v57, %v3944_v7  ;;  %v3949_v40 = vrot.slane %v3944_v7, 4  ;;  %v4096_v13 = vld [vmem:[#allocation2 + $0x68] sm:$0x1] }
 0x277   : > { %v4150_v3 = vsel %vm10092_vm1, 0, %v4149_v62  ;;  %v4127_v21 = vld [vmem:[#allocation2 + $0x54] sm:$0x1]  ;;  %4088 = vst [vmem:[#allocation2 + $0x58] sm:$0xf] %v3965_v32  ;;  %v3987_v52 = vrot.slane %v3985_v61, 7  ;;  %v3745_v54 = vadd.f32 %v10024_v2, %v3718_v41  ;;  %v7360_v60 = vpack.c.bf16 %v3767_v37, %v3767_v37 }
 0x278   : > { %4151 = vst [vmem:[#allocation2 + $0x38] sm:$0x1] %v4150_v3  ;;  %4091 = vst [vmem:[#allocation2 + $0x5c] sm:$0x1] %v4090_v23  ;;  %v4128_v4 = vsel %vm10050_vm15, 0, %v4127_v21  ;;  %v3948_v27 = vsel %vm10057_vm0, %v3940_v29, %v3947_v8  ;;  %v4083_v31 = vsel %vm10050_vm15, %v3949_v40, %v4082_v20  ;;  %v3970_v39 = vrot.slane %v3968_v30, 7 }
 0x279   : > { %4129 = vst [vmem:[#allocation2 + $0x54] sm:$0x1] %v4128_v4  ;;  %4081 = vst [vmem:[#allocation2 + $0x4c] sm:$0xf] %v3948_v27  ;;  %v3971_v50 = vshll.u32 %v7357_v5, 16  ;;  %v3990_v22 = vor.u32 %v3988_v56, %v3987_v52  ;;  %v3765_v55 = vmax.f32 %v3745_v54, 0.0 }
 0x27a   : > { %4084 = vst [vmem:[#allocation2 + $0x50] sm:$0x1] %v4083_v31  ;;  %v3993_v43 = vshrl.u32 %v7360_v60, 16  ;;  %v3996_v45 = vshll.u32 %v7360_v60, 16  ;;  %v3991_v49 = vrot.slane %v3987_v52, 4  ;;  %v3974_v14 = vrot.slane %v3970_v39, 4 }
 0x27b   : > { %v3973_v15 = vor.u32 %v3971_v50, %v3970_v39  ;;  %v4100_v0 = vsel %vm10043_vm14, %v3990_v22, %v4099_v51  ;;  %v7358_v36 = vpack.c.bf16 %v3765_v55, %v3765_v55  ;;  %v8432_v41 = vmov (!%p7130_p8), 0  }
 0x27c   : > { %v4124_v35 = vld [vmem:[#allocation2 + $0x48] sm:$0x1]  ;;  %4101 = vst [vmem:[#allocation2 + $0x6c] sm:$0xf] %v4100_v0  ;;  %v3995_v24 = vrot.slane %v3993_v43, 7 }
 0x27d   : > { %v4125_v17 = vsel %vm10050_vm15, 0, %v4124_v35  ;;  %v4093_v44 = vsel %vm10043_vm14, %v3973_v15, %v4092_v26  ;;  %v3976_v42 = vshrl.u32 %v7358_v36, 16  ;;  %v3979_v34 = vshll.u32 %v7358_v36, 16  ;;  %4171 = vst [vmem:[#allocation2] sm:$0xf] (!%p7130_p8), %v8432_v41 }
 0x27e   : > { %4126 = vst [vmem:[#allocation2 + $0x48] sm:$0x1] %v4125_v17  ;;  %4094 = vst [vmem:[#allocation2 + $0x60] sm:$0xf] %v4093_v44  ;;  %v3998_v46 = vor.u32 %v3996_v45, %v3995_v24  ;;  %v4000_v16 = vrot.slane %v3995_v24, 4 }
 0x27f   : > { %v4158_v2 = vld [vmem:[#allocation2 + $0x5c] sm:$0x1]  ;;  %v3978_v38 = vrot.slane %v3976_v42, 7  ;;  %4172 = vst [vmem:[#allocation2 + $0x4] sm:$0xf] (!%p7130_p8), %v8432_v41 }
 0x280   : > { %v4159_v47 = vsel %vm10092_vm1, 0, %v4158_v2  ;;  %v3999_v58 = vsel %vm10057_vm0, %v3991_v49, %v3998_v46  ;;  %v4104_v1 = vsel %vm10050_vm15, %v4000_v16, %v4103_v48  ;;  %4173 = vst [vmem:[#allocation2 + $0x8] sm:$0x1] (!%p7130_p8), %v8432_v41 }
 0x281   : > { %4160 = vst [vmem:[#allocation2 + $0x5c] sm:$0x1] %v4159_v47  ;;  %v4155_v19 = vld [vmem:[#allocation2 + $0x50] sm:$0x1]  ;;  %4102 = vst [vmem:[#allocation2 + $0x70] sm:$0xf] %v3999_v58  ;;  %v3981_v25 = vor.u32 %v3979_v34, %v3978_v38 }
 0x282   : > { %v4156_v9 = vsel %vm10092_vm1, 0, %v4155_v19  ;;  %4105 = vst [vmem:[#allocation2 + $0x74] sm:$0x1] %v4104_v1  ;;  %v3983_v57 = vrot.slane %v3978_v38, 4 }
 0x283   : > { %4157 = vst [vmem:[#allocation2 + $0x50] sm:$0x1] %v4156_v9  ;;  %v4133_v6 = vld [vmem:[#allocation2 + $0x6c] sm:$0x1]  ;;  %v3982_v33 = vsel %vm10057_vm0, %v3974_v14, %v3981_v25 }
 0x284   : > { %v4097_v12 = vsel %vm10050_vm15, %v3983_v57, %v4096_v13  ;;  %v4134_v18 = vsel %vm10050_vm15, 0, %v4133_v6  ;;  %4095 = vst [vmem:[#allocation2 + $0x64] sm:$0xf] %v3982_v33 }
 0x285   : > { %v4130_v11 = vld [vmem:[#allocation2 + $0x60] sm:$0x1]  ;;  %4098 = vst [vmem:[#allocation2 + $0x68] sm:$0x1] %v4097_v12  ;;  %4135 = vst [vmem:[#allocation2 + $0x6c] sm:$0x1] %v4134_v18 }
 0x286   : > { %v4131_v62 = vsel %vm10050_vm15, 0, %v4130_v11 }
 0x287   : > { %4132 = vst [vmem:[#allocation2 + $0x60] sm:$0x1] %v4131_v62 }
 0x288   : > { %4170 = sbr.rel (%p7130_p8) target bundleno = 655 (0x28f), region = 56 }
 0x289   : > { %v4164_v7 = vld [vmem:[#allocation2 + $0x74] sm:$0x1] }
 0x28a   : > { %v4165_v28 = vsel %vm10092_vm1, 0, %v4164_v7 }
 0x28b   : > { %4166 = vst [vmem:[#allocation2 + $0x74] sm:$0x1] %v4165_v28 }
 0x28c   : > { %v4161_v59 = vld [vmem:[#allocation2 + $0x68] sm:$0x1] }
 0x28d   : > { %v4162_v63 = vsel %vm10092_vm1, 0, %v4161_v59 }
 0x28e   : > { %4163 = vst [vmem:[#allocation2 + $0x68] sm:$0x1] %v4162_v63 }
 0x28f PF: > { %p7131_p10 = scmp.ne.s32.totalorder %s8411_s27, 1 }
 0x290   : > { %v8433_v53 = vmov (!%p7131_p10), 0  }
 0x291   : > { %4177 = sbr.rel (%p7131_p10) target bundleno = 664 (0x298), region = 60  ;;  %4179 = vst [vmem:[#allocation2 + $0x6c] sm:$0xf] (!%p7131_p10), %v8433_v53  ;;  %4180 = vst [vmem:[#allocation2 + $0x70] sm:$0xf] (!%p7131_p10), %v8433_v53 }
 0x292   : > { %4181 = vst [vmem:[#allocation2 + $0x74] sm:$0x1] (!%p7131_p10), %v8433_v53 }
 0x298 PF: > { %v8205_v10 = vld [vmem:[#allocation3 + $0x40] sm:$0xff]   ;;  %v8209_v20 = vld [vmem:[#allocation3 + $0x48] sm:$0xff]   ;;  %v8213_v8 = vld [vmem:[#allocation3 + $0x50] sm:$0xff]   ;;  %s7337_s17 = sshll.u32 %s8415_s28, 5  ;;  %s6716_s18 = sshll.u32 %s10244_s13, 4  ;;  %s11044_s18 = int_to_ptr.vmem [resolvable:$true] %s6716_s18 }
 0x299   : > { %v8206_v3 = vld [vmem:[#allocation3 + $0xc0] sm:$0xff]   ;;  %7684 = vmatprep.subr.bf16.mxu1 %v8205_v10  ;;  %v8210_v5 = vld [vmem:[#allocation3 + $0xc8] sm:$0xff]   ;;  %v8214_v40 = vld [vmem:[#allocation3 + $0xd0] sm:$0xff]   ;;  %s11205_s23 = sand.u32 1, %s8403_s25   ;;  %s8329_s11 = scalar_lea.vmem %s11044_s18, 2048 }
 0x29a   : > { %v8207_v32 = vld [vmem:[#allocation3] sm:$0xff]   ;;  %7748 = vmatprep.subr.bf16.mxu0 %v8206_v3  ;;  %v8211_v21 = vld [vmem:[#allocation3 + $0x8] sm:$0xff]   ;;  %v8215_v61 = vld [vmem:[#allocation3 + $0x10] sm:$0xff]   ;;  %s11051_s9 = scalar_lea.sflag [#allocation5], %s11205_s23  ;;  %p8330_p12 = scmp.ne.s32.totalorder %s11044_s18, %s8329_s11 }
 0x29b   : > { %v8208_v23 = vld [vmem:[#allocation3 + $0x80] sm:$0xff]   ;;  %7685 = vmatpush3.bf16.msra.mxu1 %v8207_v32  ;;  %v8212_v29 = vld [vmem:[#allocation3 + $0x88] sm:$0xff]   ;;  %v8216_v4 = vld [vmem:[#allocation3 + $0x90] sm:$0xff]   ;;  %p11206_p0 = scmp.ne.s32.totalorder %s11141_s15, 0  ;;  %s8434_s20 = smov [#allocation6]  }
 0x29c   : > { %7749 = vmatpush3.bf16.msra.mxu0 %v8208_v23  ;;  %7686 = vmatprep.subr.bf16.mxu1 %v8209_v20  ;;  %v8217_v56 = vld [vmem:[#allocation3 + $0x58] sm:$0xff]   ;;  %v8221_v31 = vld [vmem:[#allocation3 + $0x60] sm:$0xff]   ;;  %v8225_v39 = vld [vmem:[#allocation3 + $0x68] sm:$0xff]   ;;  %s8333_s14 = sshll.u32 %s8434_s20, 4  ;;  %s8334_s14 = int_to_ptr.vmem [resolvable:$false] %s8333_s14 }
 0x29d   : > { %7750 = vmatprep.subr.bf16.mxu0 %v8210_v5  ;;  %v8218_v30 = vld [vmem:[#allocation3 + $0xd8] sm:$0xff]   ;;  %v8222_v52 = vld [vmem:[#allocation3 + $0xe0] sm:$0xff]   ;;  %v8226_v50 = vld [vmem:[#allocation3 + $0xe8] sm:$0xff]   ;;  %p8331_p2 = pnand %p8330_p12, %p11206_p0  ;;  %p8336_p6 = scmp.lt.s32.totalorder %s11044_s18, %s8334_s14 }
 0x29e   : > { %v8219_v37 = vld [vmem:[#allocation3 + $0x18] sm:$0xff]   ;;  %v8223_v54 = vld [vmem:[#allocation3 + $0x20] sm:$0xff]   ;;  %v8227_v60 = vld [vmem:[#allocation3 + $0x28] sm:$0xff]  }
 0x29f   : > { %7687 = vmatpush3.bf16.msra.mxu1 %v8211_v21  ;;  %v8220_v27 = vld [vmem:[#allocation3 + $0x98] sm:$0xff]   ;;  %v8224_v51 = vld [vmem:[#allocation3 + $0xa0] sm:$0xff]   ;;  %v8228_v22 = vld [vmem:[#allocation3 + $0xa8] sm:$0xff]   ;;  %p8332_p5 = pneg %p8331_p2 }
 0x2a0   : > { %7751 = vmatpush3.bf16.msra.mxu0 %v8212_v29  ;;  %7688 = vmatprep.subr.bf16.mxu1 %v8213_v8  ;;  %v8229_v26 = vld [vmem:[#allocation3 + $0x70] sm:$0xff]   ;;  %v8233_v43 = vld [vmem:[#allocation3 + $0x78] sm:$0xff]   ;;  %v10248_v2 = vld [vmem:[#allocation2] sm:$0xf] }
 0x2a1   : > { %7752 = vmatprep.subr.bf16.mxu0 %v8214_v40  ;;  %v8230_v55 = vld [vmem:[#allocation3 + $0xf0] sm:$0xff]   ;;  %v8234_v17 = vld [vmem:[#allocation3 + $0xf8] sm:$0xff]   ;;  %v10250_v44 = vld [vmem:[#allocation2 + $0x4] sm:$0xf]  ;;  %v4207_v45 = vshrl.u32 %v10248_v2, 16  ;;  %v4210_v47 = vshll.u32 %v10248_v2, 16 }
 0x2a2   : > { %v8231_v35 = vld [vmem:[#allocation3 + $0x30] sm:$0xff]   ;;  %v8235_v0 = vld [vmem:[#allocation3 + $0x38] sm:$0xff]   ;;  %v4216_v48 = vshll.u32 %v10250_v44, 16  ;;  %v4220_v42 = vshrl.u32 %v10250_v44, 16  ;;  %v4398_v13 = vld [vmem:[#allocation2] sm:$0xe] }
 0x2a3   : > { %7689 = vmatpush3.bf16.msra.mxu1 %v8215_v61  ;;  %v8232_v15 = vld [vmem:[#allocation3 + $0xb0] sm:$0xff]   ;;  %v8236_v36 = vld [vmem:[#allocation3 + $0xb8] sm:$0xff]   ;;  %v4209_v34 = vrot.slane %v4207_v45, 4  ;;  %v4212_v9 = vrot.slane %v4210_v47, 5  ;;  %v8239_v62 = vld [vmem:[#allocation3 + $0x140] sm:$0xff]   ;;  %v7132_v59 = vrot.slane %v4398_v13, 9 }
 0x2a4   : > { %7753 = vmatpush3.bf16.msra.mxu0 %v8216_v4  ;;  %7690 = vmatprep.subr.bf16.mxu1 %v8217_v56  ;;  %v4198_v24 = vld [vmem:[#allocation2 + $0x8] sm:$0x1]  ;;  %v4487_v49 = vld [vmem:[#allocation2 + $0xc] sm:$0xf]  ;;  %v10256_v16 = vld [vmem:[#allocation2 + $0x10] sm:$0xf]  ;;  %v7156_v4 = vcombine.low %v10248_v2, %v10250_v44 }
 0x2a5   : > { %7754 = vmatprep.subr.bf16.mxu0 %v8218_v30  ;;  %v4226_v46 = vshll.u32 %v4198_v24, 16  ;;  %v4512_v19 = vshrl.u32 %v4487_v49, 16  ;;  %v4515_v38 = vshll.u32 %v4487_v49, 16  ;;  %v4218_v58 = vrot.slane %v4216_v48, 5  ;;  %v10264_v3 = vld [vmem:[#allocation2 + $0xc] sm:$0xf] }
 0x2a6   : > { %v4222_v1 = vrot.slane %v4220_v42, 4  ;;  %v4521_v6 = vshll.u32 %v10256_v16, 16  ;;  %v4213_v33 = vor.u32 %v4212_v9, %v4209_v34  ;;  %v4525_v18 = vshrl.u32 %v10256_v16, 16  ;;  %v8240_v20 = vld [vmem:[#allocation3 + $0x100] sm:$0xff]   ;;  %v10268_v5 = vld [vmem:[#allocation2 + $0x10] sm:$0xf] }
 0x2a7   : > { %7691 = vmatpush3.bf16.msra.mxu1 %v8219_v37  ;;  %v4228_v14 = vrot.slane %v4226_v46, 5  ;;  %v4514_v25 = vrot.slane %v4512_v19, 4  ;;  %v4517_v57 = vrot.slane %v4515_v38, 5  ;;  %v7180_v11 = vcombine.low %v4487_v49, %v10256_v16  ;;  %v10278_v56 = vld [vmem:[#allocation2 + $0x14] sm:$0x1]  ;;  %v8244_v49 = vld [vmem:[#allocation3 + $0x108] sm:$0xff]  }
 0x2a8   : > { %7755 = vmatpush3.bf16.msra.mxu0 %v8220_v27  ;;  %7692 = vmatprep.subr.bf16.mxu1 %v8221_v31  ;;  %v4223_v12 = vor.u32 %v4222_v1, %v4218_v58  ;;  %v10261_v28 = vrot.slane %v4521_v6, 5  ;;  %v4214_v63 = vrot.slane %v4213_v33, 4  ;;  %v4527_v53 = vrot.slane %v4525_v18, 4  ;;  %v4489_v30 = vld [vmem:[#allocation2 + $0x18] sm:$0xf]  ;;  %v8243_v27 = vld [vmem:[#allocation3 + $0x148] sm:$0xff]  }
 0x2a9   : > { %7756 = vmatprep.subr.bf16.mxu0 %v8222_v52  ;;  %v4518_v7 = vor.u32 %v4517_v57, %v4514_v25  ;;  %6113 = vmatprep.mubr.bf16.mxu0 %v7180_v11  ;;  %v4432_v10 = vrot.slane %v10250_v44, 5  ;;  %v4435_v32 = vrot.slane %v4198_v24, 5  ;;  %v4231_v21 = vshrl.u32 %v10264_v3, 16  ;;  %v10280_v37 = vld [vmem:[#allocation2 + $0x1c] sm:$0xf] }
 0x2aa   : > { %v4224_v41 = vrot.slane %v4223_v12, 4  ;;  %v4219_v8 = vsel %vm8731_vm7, %v4214_v63, %v4218_v58  ;;  %v4528_v61 = vor.u32 %v4527_v53, %v10261_v28  ;;  %v10292_v24 = vld [vmem:[#allocation2 + $0x18] sm:$0xf]  ;;  %v7181_v42 = vcombine.low %v4489_v30, %v10280_v37  ;;  %v10299_v46 = vld [vmem:[#allocation2 + $0x1c] sm:$0xf]  ;;  %v8247_v58 = vld [vmem:[#allocation3 + $0x150] sm:$0xff]  }
 0x2ab   : > { %7693 = vmatpush3.bf16.msra.mxu1 %v8223_v54  ;;  %v10266_v23 = vrot.slane %v4518_v7, 4  ;;  %v4433_v54 = vsel %vm8702_vm4, %v7132_v59, %v4432_v10  ;;  %v7157_v34 = vcombine.low %v10264_v3, %v10268_v5  ;;  %v4439_v1 = vrot.slane %v10268_v5, 5  ;;  %v10311_v11 = vld [vmem:[#allocation2 + $0x24] sm:$0xf]  ;;  %v8248_v53 = vld [vmem:[#allocation3 + $0x110] sm:$0xff]  }
 0x2ac   : > { %7757 = vmatpush3.bf16.msra.mxu0 %v8224_v51  ;;  %7694 = vmatprep.subr.bf16.mxu1 %v8225_v39  ;;  %v4229_v40 = vsel %vm8731_vm7, %v4224_v41, %v4228_v14  ;;  %v4434_v51 = vrot.slane %v4432_v10, 4  ;;  %v4233_v39 = vrot.slane %v4231_v21, 4  ;;  %v4442_v13 = vrot.slane %v10278_v56, 5  ;;  %v10305_v14 = vld [vmem:[#allocation2 + $0x20] sm:$0x1] }
 0x2ad   : > { %7758 = vmatprep.subr.bf16.mxu0 %v8226_v50  ;;  %v7164_v31 = vcombine.low %v4219_v8, %v4229_v40  ;;  %v4399_v50 = vld [vmem:[#allocation2 + $0xc] sm:$0xe]  ;;  %v4255_v25 = vshrl.u32 %v10292_v24, 16  ;;  %v4258_v57 = vshll.u32 %v10292_v24, 16  ;;  %v4264_v12 = vshll.u32 %v10299_v46, 16 }
 0x2ae   : > { %v7133_v9 = vrot.slane %v4399_v50, 9  ;;  %v4268_v18 = vshrl.u32 %v10299_v46, 16  ;;  %v4441_v59 = vrot.slane %v4439_v1, 4  ;;  %v4274_v40 = vshll.u32 %v10305_v14, 16 }
 0x2af   : > { %7695 = vmatpush3.bf16.msra.mxu1 %v8227_v60  ;;  %v10284_v60 = vrot.slane %v4528_v61, 4  ;;  %6016 = vmatprep.mubr.bf16.mxu1 %v7164_v31  ;;  %v4257_v63 = vrot.slane %v4255_v25, 4  ;;  %v4260_v41 = vrot.slane %v4258_v57, 5  ;;  %v4400_v61 = vld [vmem:[#allocation2 + $0x18] sm:$0xe]  ;;  %v4563_v31 = vshll.u32 %v10311_v11, 16 }
 0x2b0   : > { %7759 = vmatpush3.bf16.msra.mxu0 %v8228_v22  ;;  %7696 = vmatprep.subr.bf16.mxu1 %v8229_v26  ;;  %v4234_v22 = vshll.u32 %v10264_v3, 16  ;;  %v4240_v26 = vshll.u32 %v10268_v5, 16  ;;  %v4440_v7 = vsel %vm8702_vm4, %v7133_v9, %v4439_v1  ;;  %v4443_v21 = vsel %vm8702_vm4, %v4441_v59, %v4442_v13  ;;  %v8257_v1 = vld [vmem:[#allocation3 + $0x160] sm:$0xff]  }
 0x2b1   : > { %7760 = vmatprep.subr.bf16.mxu0 %v8230_v55  ;;  %v4244_v55 = vshrl.u32 %v10268_v5, 16  ;;  %v4261_v8 = vor.u32 %v4260_v41, %v4257_v63 }
 0x2b2   : > { %v4242_v2 = vrot.slane %v4240_v26, 5 }
 0x2b3   : > { %7697 = vmatpush3.bf16.msra.mxu1 %v8231_v35  ;;  %v4436_v35 = vsel %vm8702_vm4, %v4434_v51, %v4435_v32  ;;  %v4246_v44 = vrot.slane %v4244_v55, 4  ;;  %v4266_v32 = vrot.slane %v4264_v12, 5  ;;  %v8252_v51 = vld [vmem:[#allocation3 + $0x118] sm:$0xff]   ;;  %v4262_v50 = vrot.slane %v4261_v8, 4  ;;  %v10330_v55 = vld [vmem:[#allocation2 + $0x28] sm:$0xf] }
 0x2b4   : > { %7761 = vmatpush3.bf16.msra.mxu0 %v8232_v15  ;;  %7698 = vmatprep.subr.bf16.mxu1 %v8233_v43  ;;  %v4250_v15 = vshll.u32 %v10278_v56, 16  ;;  %v4536_v43 = vshrl.u32 %v4489_v30, 16  ;;  %v7173_v56 = vcombine.low %v4440_v7, %v4443_v21  ;;  %v4292_v9 = vshrl.u32 %v10330_v55, 16 }
 0x2b5   : > { %7762 = vmatprep.subr.bf16.mxu0 %v8234_v17  ;;  %v4539_v17 = vshll.u32 %v4489_v30, 16  ;;  %v4247_v38 = vor.u32 %v4246_v44, %v4242_v2  ;;  %v4267_v44 = vsel %vm8731_vm7, %v4262_v50, %v4266_v32 }
 0x2b6   : > { %v4252_v45 = vrot.slane %v4250_v15, 5  ;;  %v10294_v47 = vrot.slane %v4536_v43, 4 }
 0x2b7   : > { %7699 = vmatpush3.bf16.msra.mxu1 %v8235_v0  ;;  %v7172_v0 = vcombine.low %v4433_v54, %v4436_v35  ;;  %v10296_v48 = vrot.slane %v4539_v17, 5  ;;  %v4248_v33 = vrot.slane %v4247_v38, 4  ;;  %v10326_v54 = vld [vmem:[#allocation2 + $0x24] sm:$0xf]  ;;  %v10332_v35 = vld [vmem:[#allocation2 + $0x2c] sm:$0x1]  ;;  %v7158_v17 = vcombine.low %v10292_v24, %v10299_v46 }
 0x2b8   : > { %7763 = vmatpush3.bf16.msra.mxu0 %v8236_v36  ;;  %7812 = vmatprep.subr.bf16.mxu1 %v8239_v62  ;;  %v4236_v36 = vrot.slane %v4234_v22, 5  ;;  %v10313_v62 = vld [vmem:[#allocation2 + $0x28] sm:$0xf]  ;;  %v4276_v22 = vrot.slane %v4274_v40, 5  ;;  %v4282_v38 = vshll.u32 %v10326_v54, 16  ;;  %v4298_v12 = vshll.u32 %v10332_v35, 16 }
 0x2b9   : > { %v4253_v3 = vsel %vm8731_vm7, %v4248_v33, %v4252_v45  ;;  %v7182_v26 = vcombine.low %v10311_v11, %v10313_v62  ;;  %v4446_v45 = vrot.slane %v10299_v46, 5  ;;  %v4294_v33 = vrot.slane %v4292_v9, 4  ;;  %v10369_v40 = vld [vmem:[#allocation2 + $0x34] sm:$0xf] }
 0x2ba   : > { %6017 = vmatmul.mubr.bf16.vlgmr.msra.gmra.mrb[80].mxu1 %v7156_v4  ;;  %v4237_v19 = vor.u32 %v4236_v36, %v4233_v39  ;;  %v8251_v4 = vld [vmem:[#allocation3 + $0x158] sm:$0xff]   ;;  %v8253_v39 = vld [vmem:[#allocation3 + $0x1c0] sm:$0xff]   ;;  %v4284_v57 = vrot.slane %v4282_v38, 5  ;;  %v7159_v21 = vcombine.low %v10326_v54, %v10330_v55  ;;  %v4316_v50 = vshrl.u32 %v10369_v40, 16 }
 0x2bb   : > { %7813 = vmatpush3.bf16.msra.mxu1 %v8240_v20  ;;  %6114 = vmatmul.mubr.bf16.vlgmr.msra.gmra.mrb[100].mxu0 %v7172_v0  ;;  %v4270_v20 = vrot.slane %v4268_v18, 4  ;;  %v7134_v0 = vrot.slane %v4400_v61, 9  ;;  %v10338_v36 = vld [vmem:[#allocation2 + $0x30] sm:$0xf]  ;;  %v10355_v18 = vrot.slane %v4563_v31, 5  ;;  %v8259_v61 = vld [vmem:[#allocation3 + $0x1c8] sm:$0xff]  }
 0x2bc   : > { %7814 = vmatprep.subr.bf16.mxu1 %v8243_v27  ;;  %6121 = vmatprep.mubr.bf16.mxu0 %v7181_v42  ;;  %v4238_v6 = vrot.slane %v4237_v19, 4  ;;  %v4560_v27 = vshrl.u32 %v10311_v11, 16  ;;  %v4449_v42 = vrot.slane %v10305_v14, 5  ;;  %v8254_v19 = vld [vmem:[#allocation3 + $0x180] sm:$0xff]   ;;  %v4448_v14 = vrot.slane %v4446_v45, 4 }
 0x2bd   : > { %v4271_v30 = vor.u32 %v4270_v20, %v4266_v32  ;;  %7876 = vmatprep.subr.bf16.mxu0 %v8253_v39  ;;  %v4447_v46 = vsel %vm8702_vm4, %v7134_v0, %v4446_v45  ;;  %v4584_v7 = vshrl.u32 %v10338_v36, 16  ;;  %v8258_v32 = vld [vmem:[#allocation3 + $0x120] sm:$0xff]   ;;  %v4402_v0 = vld [vmem:[#allocation2 + $0x30] sm:$0xe]  ;;  %v4318_v38 = vrot.slane %v4316_v50, 4 }
 0x2be   : > { %v4243_v10 = vsel %vm8731_vm7, %v4238_v6, %v4242_v2  ;;  %v10334_v43 = vrot.slane %v4560_v27, 4  ;;  %v10340_v2 = vld [vmem:[#allocation2 + $0x34] sm:$0xf]  ;;  %7877 = vmatpush3.bf16.msra.mxu0 %v8254_v19  ;;  %v4450_v11 = vsel %vm8702_vm4, %v4448_v14, %v4449_v42  ;;  %v4456_v27 = vrot.slane %v10332_v35, 5  ;;  %v10373_v31 = vld [vmem:[#allocation2 + $0x38] sm:$0x1] }
 0x2bf   : > { %7815 = vmatpush3.bf16.msra.mxu1 %v8244_v49  ;;  %v7165_v5 = vcombine.low %v4243_v10, %v4253_v3  ;;  %v4272_v15 = vrot.slane %v4271_v30, 4  ;;  %v4279_v49 = vshrl.u32 %v10326_v54, 16  ;;  %v7183_v59 = vcombine.low %v10338_v36, %v10340_v2  ;;  %v10362_v3 = vld [vmem:[#allocation2 + $0x30] sm:$0xf]  ;;  %7878 = vmatprep.subr.bf16.mxu0 %v8259_v61  ;;  %v8263_v19 = vld [vmem:[#allocation3 + $0x168] sm:$0xff]  }
 0x2c0   : > { %7816 = vmatprep.subr.bf16.mxu1 %v8247_v58  ;;  %v4401_v58 = vld [vmem:[#allocation2 + $0x24] sm:$0xe]  ;;  %v7174_v63 = vcombine.low %v4447_v46, %v4450_v11  ;;  %v4300_v10 = vrot.slane %v4298_v12, 5  ;;  %v10364_v20 = vrot.slane %v4584_v7, 4  ;;  %v4453_v30 = vrot.slane %v10330_v55, 5 }
 0x2c1   : > { %6024 = vmatprep.mubr.bf16.mxu1 %v7165_v5  ;;  %v4277_v24 = vsel %vm8731_vm7, %v4272_v15, %v4276_v22  ;;  %v4281_v25 = vrot.slane %v4279_v49, 4  ;;  %v4587_v5 = vshll.u32 %v10338_v36, 16  ;;  %v7135_v8 = vrot.slane %v4401_v58, 9  ;;  %v10379_v22 = vld [vmem:[#allocation2 + $0x3c] sm:$0xf]  ;;  %v8260_v36 = vld [vmem:[#allocation3 + $0x188] sm:$0xff]  }
 0x2c2   : > { %6025 = vmatmul.mubr.bf16.gmra.mrb[84].mxu1 %v7157_v34  ;;  %v4288_v34 = vshll.u32 %v10330_v55, 16  ;;  %v7166_v13 = vcombine.low %v4267_v44, %v4277_v24  ;;  %v4306_v39 = vshll.u32 %v10362_v3, 16  ;;  %v4312_v54 = vshll.u32 %v10369_v40, 16  ;;  %7879 = vmatpush3.bf16.msra.mxu0 %v8260_v36  ;;  %v8264_v58 = vld [vmem:[#allocation3 + $0x128] sm:$0xff]   ;;  %v8267_v36 = vld [vmem:[#allocation3 + $0x1d8] sm:$0xff]  }
 0x2c3   : > { %7817 = vmatpush3.bf16.msra.mxu1 %v8248_v53  ;;  %6122 = vmatmul.mubr.bf16.gmra.mrb[104].mxu0 %v7173_v56  ;;  %v4285_v41 = vor.u32 %v4284_v57, %v4281_v25  ;;  %v4454_v35 = vsel %vm8702_vm4, %v7135_v8, %v4453_v30  ;;  %v4455_v15 = vrot.slane %v4453_v30, 4  ;;  %v4608_v9 = vshrl.u32 %v10379_v22, 16  ;;  %v8265_v25 = vld [vmem:[#allocation3 + $0x1d0] sm:$0xff]   ;;  %v10410_v61 = vld [vmem:[#allocation2 + $0x40] sm:$0xf] }
 0x2c4   : > { %6129 = vmatprep.mubr.bf16.mxu0 %v7182_v26  ;;  %7818 = vmatprep.subr.bf16.mxu1 %v8251_v4  ;;  %v4290_v6 = vrot.slane %v4288_v34, 5  ;;  %v4308_v42 = vrot.slane %v4306_v39, 5  ;;  %v4314_v49 = vrot.slane %v4312_v54, 5  ;;  %v4322_v34 = vshll.u32 %v10373_v31, 16 }
 0x2c5   : > { %6032 = vmatprep.mubr.bf16.mxu1 %v7166_v13  ;;  %v4286_v4 = vrot.slane %v4285_v41, 4  ;;  %v4457_v24 = vsel %vm8702_vm4, %v4455_v15, %v4456_v27  ;;  %v10398_v11 = vrot.slane %v4608_v9, 4  ;;  %v7136_v7 = vrot.slane %v4402_v0, 9  ;;  %7880 = vmatprep.subr.bf16.mxu0 %v8265_v25  ;;  %v4497_v27 = vld [vmem:[#allocation2 + $0x48] sm:$0xf] }
 0x2c6   : > { %v4295_v53 = vor.u32 %v4294_v33, %v4290_v6  ;;  %v7175_v13 = vcombine.low %v4454_v35, %v4457_v24  ;;  %v4319_v57 = vor.u32 %v4318_v38, %v4314_v49  ;;  %v4611_v33 = vshll.u32 %v10379_v22, 16  ;;  %v8271_v9 = vld [vmem:[#allocation3 + $0x170] sm:$0xff]  }
 0x2c7   : > { %7819 = vmatpush3.bf16.msra.mxu1 %v8252_v51  ;;  %v4303_v51 = vshrl.u32 %v10362_v3, 16  ;;  %v4291_v26 = vsel %vm8731_vm7, %v4286_v4, %v4290_v6  ;;  %v4324_v6 = vrot.slane %v4322_v34, 5  ;;  %v7160_v41 = vcombine.low %v10362_v3, %v10369_v40 }
 0x2c8   : > { %7820 = vmatprep.subr.bf16.mxu1 %v8257_v1  ;;  %v4296_v56 = vrot.slane %v4295_v53, 4  ;;  %v10393_v1 = vrot.slane %v4587_v5, 5  ;;  %v4463_v53 = vrot.slane %v10373_v31, 5  ;;  %v4340_v30 = vshrl.u32 %v10410_v61, 16  ;;  %v8266_v31 = vld [vmem:[#allocation3 + $0x190] sm:$0xff]  }
 0x2c9   : > { %v4305_v45 = vrot.slane %v4303_v51, 4  ;;  %7881 = vmatpush3.bf16.msra.mxu0 %v8266_v31 }
 0x2ca   : > { %6033 = vmatmul.mubr.bf16.gmra.mrb[88].mxu1 %v7158_v17  ;;  %v4301_v55 = vsel %vm8731_vm7, %v4296_v56, %v4300_v10  ;;  %v10387_v17 = vld [vmem:[#allocation2 + $0x40] sm:$0xf]  ;;  %v10404_v10 = vld [vmem:[#allocation2 + $0x3c] sm:$0xf]  ;;  %v4336_v56 = vshll.u32 %v10410_v61, 16  ;;  %v4342_v0 = vrot.slane %v4340_v30, 4  ;;  %7882 = vmatprep.subr.bf16.mxu0 %v8267_v36 }
 0x2cb   : > { %6130 = vmatmul.mubr.bf16.gmra.mrb[108].mxu0 %v7174_v63  ;;  %7821 = vmatpush3.bf16.msra.mxu1 %v8258_v32  ;;  %v7167_v44 = vcombine.low %v4291_v26, %v4301_v55  ;;  %v4309_v46 = vor.u32 %v4308_v42, %v4305_v45  ;;  %v7184_v14 = vcombine.low %v10379_v22, %v10387_v17  ;;  %v4320_v63 = vrot.slane %v4319_v57, 4  ;;  %v10420_v22 = vld [vmem:[#allocation2 + $0x4c] sm:$0xf]  ;;  %v4403_v26 = vld [vmem:[#allocation2 + $0x3c] sm:$0xe] }
 0x2cc   : > { %6137 = vmatprep.mubr.bf16.mxu0 %v7183_v59  ;;  %7822 = vmatprep.subr.bf16.mxu1 %v8263_v19  ;;  %v4460_v59 = vrot.slane %v10369_v40, 5  ;;  %v4327_v4 = vshrl.u32 %v10404_v10, 16  ;;  %v4330_v40 = vshll.u32 %v10404_v10, 16  ;;  %v4338_v15 = vrot.slane %v4336_v56, 5  ;;  %v8269_v19 = vld [vmem:[#allocation3 + $0x198] sm:$0xff]  }
 0x2cd   : > { %6040 = vmatprep.mubr.bf16.mxu1 %v7167_v44  ;;  %v4310_v12 = vrot.slane %v4309_v46, 4  ;;  %v4325_v3 = vsel %vm8731_vm7, %v4320_v63, %v4324_v6  ;;  %v10422_v44 = vrot.slane %v4611_v33, 5  ;;  %v4632_v42 = vshrl.u32 %v4497_v27, 16  ;;  %7883 = vmatpush3.bf16.msra.mxu0 %v8269_v19  ;;  %v10446_v30 = vld [vmem:[#allocation2 + $0x58] sm:$0xf] }
 0x2ce   : > { %v4461_v5 = vsel %vm8702_vm4, %v7136_v7, %v4460_v59  ;;  %v4462_v8 = vrot.slane %v4460_v59, 4  ;;  %v4329_v54 = vrot.slane %v4327_v4, 4  ;;  %v4332_v35 = vrot.slane %v4330_v40, 5 }
 0x2cf   : > { %7823 = vmatpush3.bf16.msra.mxu1 %v8264_v58  ;;  %v4315_v32 = vsel %vm8731_vm7, %v4310_v12, %v4314_v49  ;;  %v7185_v49 = vcombine.low %v4497_v27, %v10420_v22  ;;  %v4343_v38 = vor.u32 %v4342_v0, %v4338_v15  ;;  %v7137_v34 = vrot.slane %v4403_v26, 9  ;;  %v8272_v12 = vld [vmem:[#allocation3 + $0x130] sm:$0xff]  }
 0x2d0   : > { %v7168_v51 = vcombine.low %v4315_v32, %v4325_v3  ;;  %v4464_v39 = vsel %vm8702_vm4, %v4462_v8, %v4463_v53  ;;  %v4333_v24 = vor.u32 %v4332_v35, %v4329_v54  ;;  %v10425_v58 = vrot.slane %v4632_v42, 4  ;;  %v10438_v53 = vld [vmem:[#allocation2 + $0x4c] sm:$0xf]  ;;  %7824 = vmatprep.subr.bf16.mxu1 %v8271_v9  ;;  %v4204_v8 = vld [vmem:[#allocation2 + $0x50] sm:$0x1] }
 0x2d1   : > { %v7176_v55 = vcombine.low %v4461_v5, %v4464_v39  ;;  %v4467_v46 = vrot.slane %v10410_v61, 5  ;;  %v4344_v57 = vrot.slane %v4343_v38, 4  ;;  %v7161_v63 = vcombine.low %v10404_v10, %v10410_v61  ;;  %v4499_v3 = vld [vmem:[#allocation2 + $0x54] sm:$0xf]  ;;  %v4404_v42 = vld [vmem:[#allocation2 + $0x48] sm:$0xe] }
 0x2d2   : > { %6041 = vmatmul.mubr.bf16.gmra.mrb[92].mxu1 %v7159_v21  ;;  %v4203_v21 = vld [vmem:[#allocation2 + $0x44] sm:$0x1]  ;;  %v4334_v25 = vrot.slane %v4333_v24, 4  ;;  %v4360_v56 = vshll.u32 %v10438_v53, 16  ;;  %v4364_v10 = vshrl.u32 %v10438_v53, 16  ;;  %v4370_v61 = vshll.u32 %v4204_v8, 16 }
 0x2d3   : > { %6138 = vmatmul.mubr.bf16.gmra.mrb[112].mxu0 %v7175_v13  ;;  %v4346_v50 = vshll.u32 %v4203_v21, 16  ;;  %6048 = vmatprep.mubr.bf16.mxu1 %v7168_v51  ;;  %v4635_v13 = vshll.u32 %v4497_v27, 16  ;;  %v4468_v6 = vsel %vm8702_vm4, %v7137_v34, %v4467_v46  ;;  %v4469_v33 = vrot.slane %v4467_v46, 4  ;;  %v8273_v27 = vld [vmem:[#allocation3 + $0x1e0] sm:$0xff]   ;;  %v8275_v34 = vld [vmem:[#allocation3 + $0x1e8] sm:$0xff]  }
 0x2d4   : > { %6145 = vmatprep.mubr.bf16.mxu0 %v7184_v14  ;;  %v4470_v14 = vrot.slane %v4203_v21, 5  ;;  %v4339_v7 = vsel %vm8731_vm7, %v4334_v25, %v4338_v15  ;;  %7825 = vmatpush3.bf16.msra.mxu1 %v8272_v12  ;;  %v4656_v54 = vshrl.u32 %v4499_v3, 16  ;;  %v4366_v26 = vrot.slane %v4364_v10, 4  ;;  %v8274_v15 = vld [vmem:[#allocation3 + $0x1a0] sm:$0xff]  }
 0x2d5   : > { %v4348_v45 = vrot.slane %v4346_v50, 5  ;;  %v10448_v31 = vrot.slane %v4635_v13, 5  ;;  %v4362_v50 = vrot.slane %v4360_v56, 5  ;;  %v7186_v35 = vcombine.low %v4499_v3, %v10446_v30  ;;  %7884 = vmatprep.subr.bf16.mxu0 %v8273_v27  ;;  %v8277_v13 = vld [vmem:[#allocation3 + $0x1a8] sm:$0xff]  }
 0x2d6   : > { %v4471_v5 = vsel %vm8702_vm4, %v4469_v33, %v4470_v14  ;;  %v4372_v36 = vrot.slane %v4370_v61, 5  ;;  %v7138_v19 = vrot.slane %v4404_v42, 9  ;;  %v4474_v24 = vrot.slane %v10438_v53, 5  ;;  %7885 = vmatpush3.bf16.msra.mxu0 %v8274_v15 }
 0x2d7   : > { %v4349_v59 = vsel %vm8731_vm7, %v4344_v57, %v4348_v45  ;;  %v7177_v40 = vcombine.low %v4468_v6, %v4471_v5  ;;  %v10451_v45 = vrot.slane %v4656_v54, 4  ;;  %v4477_v38 = vrot.slane %v4204_v8, 5  ;;  %7886 = vmatprep.subr.bf16.mxu0 %v8275_v34  ;;  %v4205_v5 = vld [vmem:[#allocation2 + $0x5c] sm:$0x1]  ;;  %v8280_v34 = vld [vmem:[#allocation3 + $0x138] sm:$0xff]  }
 0x2d8   : > { %v7169_v32 = vcombine.low %v4339_v7, %v4349_v59  ;;  %v4475_v14 = vsel %vm8702_vm4, %v7138_v19, %v4474_v24  ;;  %v4476_v25 = vrot.slane %v4474_v24, 4  ;;  %v10464_v7 = vld [vmem:[#allocation2 + $0x54] sm:$0xf]  ;;  %v10466_v59 = vld [vmem:[#allocation2 + $0x58] sm:$0xf]  ;;  %v4484_v19 = vrot.slane %v4205_v5, 5 }
 0x2d9   : > { %v4375_v8 = vshrl.u32 %v10464_v7, 16 }
 0x2da   : > { %6049 = vmatmul.mubr.bf16.gmra.mrb[96].mxu1 %v7160_v41  ;;  %v10436_v41 = vld [vmem:[#allocation2 + $0x48] sm:$0xf]  ;;  %v4478_v12 = vsel %vm8702_vm4, %v4476_v25, %v4477_v38  ;;  %7887 = vmatpush3.bf16.msra.mxu0 %v8277_v13  ;;  %v4524_v25 = vsel %vm8731_vm7, %v10266_v23, %v10261_v28  ;;  %v4737_v28 = vrot.slane %v10256_v16, 5 }
 0x2db   : > { %6146 = vmatmul.mubr.bf16.gmra.mrb[116].mxu0 %v7176_v55  ;;  %v4351_v21 = vshrl.u32 %v10436_v41, 16  ;;  %v4354_v4 = vshll.u32 %v10436_v41, 16  ;;  %6056 = vmatprep.mubr.bf16.mxu1 %v7169_v32  ;;  %v4659_v55 = vshll.u32 %v4499_v3, 16  ;;  %v7162_v33 = vcombine.low %v10436_v41, %v10438_v53 }
 0x2dc   : > { %6153 = vmatprep.mubr.bf16.mxu0 %v7185_v49  ;;  %v4367_v49 = vor.u32 %v4366_v26, %v4362_v50  ;;  %v7178_v32 = vcombine.low %v4475_v14, %v4478_v12  ;;  %v4384_v3 = vshll.u32 %v10466_v59, 16  ;;  %v4388_v41 = vshrl.u32 %v10466_v59, 16  ;;  %v8282_v14 = vld [vmem:[#allocation3 + $0x1b0] sm:$0xff]  }
 0x2dd   : > { %v4353_v51 = vrot.slane %v4351_v21, 4  ;;  %v4356_v39 = vrot.slane %v4354_v4, 5  ;;  %v4378_v21 = vshll.u32 %v10464_v7, 16  ;;  %v10470_v4 = vld [vmem:[#allocation2 + $0x60] sm:$0xf]  ;;  %v4394_v53 = vshll.u32 %v4205_v5, 16 }
 0x2de   : > { %v4368_v46 = vrot.slane %v4367_v49, 4  ;;  %v4680_v56 = vshrl.u32 %v10470_v4, 16  ;;  %v10477_v10 = vrot.slane %v4659_v55, 5  ;;  %v4377_v61 = vrot.slane %v4375_v8, 4  ;;  %v4503_v5 = vld [vmem:[#allocation2 + $0x14] sm:$0x1] }
 0x2df   : > { %v4357_v0 = vor.u32 %v4356_v39, %v4353_v51  ;;  %v4380_v27 = vrot.slane %v4378_v21, 5  ;;  %v8279_v39 = vld [vmem:[#allocation3 + $0x178] sm:$0xff]   ;;  %v4386_v54 = vrot.slane %v4384_v3, 5  ;;  %v4396_v26 = vrot.slane %v4394_v53, 5  ;;  %v4703_v21 = vld [vmem:[#allocation2 + $0xc] sm:$0xe] }
 0x2e0   : > { %v4373_v6 = vsel %vm8731_vm7, %v4368_v46, %v4372_v36  ;;  %v4405_v36 = vld [vmem:[#allocation2 + $0x54] sm:$0xe]  ;;  %v4481_v55 = vrot.slane %v10466_v59, 5  ;;  %7826 = vmatprep.subr.bf16.mxu1 %v8279_v39  ;;  %v7163_v12 = vcombine.low %v10464_v7, %v10466_v59  ;;  %v4531_v8 = vshll.u32 %v4503_v5, 16 }
 0x2e1   : > { %v4358_v9 = vrot.slane %v4357_v0, 4  ;;  %v4381_v15 = vor.u32 %v4380_v27, %v4377_v61  ;;  %v10482_v0 = vrot.slane %v4680_v56, 4  ;;  %v7139_v49 = vrot.slane %v4405_v36, 9  ;;  %7827 = vmatpush3.bf16.msra.mxu1 %v8280_v34  ;;  %v8284_v56 = vld [vmem:[#allocation3 + $0x1b8] sm:$0xff]   ;;  %v8285_v61 = vld [vmem:[#allocation3 + $0x200] sm:$0xff]  }
 0x2e2   : > { %6057 = vmatmul.mubr.bf16.gmra.mrb[100].mxu1 %v7161_v63  ;;  %v4483_v38 = vrot.slane %v4481_v55, 4  ;;  %v4542_v3 = vor.u32 %v10296_v48, %v10294_v47  ;;  %v4739_v53 = vrot.slane %v4737_v28, 4  ;;  %v4566_v7 = vor.u32 %v10355_v18, %v10334_v43  ;;  %7992 = vmatprep.subr.bf16.mxu1 %v8285_v61  ;;  %v8293_v43 = vld [vmem:[#allocation3 + $0x220] sm:$0xff]  }
 0x2e3   : > { %6154 = vmatmul.mubr.bf16.gmra.mrb[120].mxu0 %v7177_v40  ;;  %v4363_v57 = vsel %vm8731_vm7, %v4358_v9, %v4362_v50  ;;  %v10474_v40 = vld [vmem:[#allocation2 + $0x64] sm:$0xf]  ;;  %v4390_v50 = vrot.slane %v4388_v41, 4  ;;  %v4382_v24 = vrot.slane %v4381_v15, 4  ;;  %v8281_v9 = vld [vmem:[#allocation3 + $0x1f0] sm:$0xff]   ;;  %v4482_v46 = vsel %vm8702_vm4, %v7139_v49, %v4481_v55 }
 0x2e4   : > { %6161 = vmatprep.mubr.bf16.mxu0 %v7186_v35  ;;  %v7170_v63 = vcombine.low %v4363_v57, %v4373_v6  ;;  %v7187_v51 = vcombine.low %v10470_v4, %v10474_v40  ;;  %v4683_v35 = vshll.u32 %v10470_v4, 16  ;;  %v4485_v6 = vsel %vm8702_vm4, %v4483_v38, %v4484_v19  ;;  %7888 = vmatprep.subr.bf16.mxu0 %v8281_v9  ;;  %v4504_v19 = vld [vmem:[#allocation2 + $0x20] sm:$0x1] }
 0x2e5   : > { %v4391_v42 = vor.u32 %v4390_v50, %v4386_v54  ;;  %v4387_v57 = vsel %vm8731_vm7, %v4382_v24, %v4386_v54  ;;  %7889 = vmatpush3.bf16.msra.mxu0 %v8282_v14  ;;  %v4740_v4 = vrot.slane %v4503_v5, 5  ;;  %v7140_v41 = vrot.slane %v4703_v21, 9  ;;  %v10515_v54 = vld [vmem:[#allocation2 + $0x18] sm:$0xf]  ;;  %v10517_v50 = vld [vmem:[#allocation2 + $0x1c] sm:$0xf] }
 0x2e6   : > { %6064 = vmatprep.mubr.bf16.mxu1 %v7170_v63  ;;  %v7179_v63 = vcombine.low %v4482_v46, %v4485_v6  ;;  %v4590_v59 = vor.u32 %v10393_v1, %v10364_v20  ;;  %v4533_v16 = vrot.slane %v4531_v8, 5  ;;  %v4744_v27 = vrot.slane %v10280_v37, 5  ;;  %v4704_v24 = vld [vmem:[#allocation2 + $0x18] sm:$0xe]  ;;  %v10611_v1 = vld [vmem:[#allocation2 + $0x40] sm:$0xf] }
 0x2e7   : > { %v4392_v13 = vrot.slane %v4391_v42, 4  ;;  %v4638_v47 = vor.u32 %v10448_v31, %v10425_v58  ;;  %v4738_v48 = vsel %vm8702_vm4, %v7140_v41, %v4737_v28  ;;  %v4741_v39 = vsel %vm8702_vm4, %v4739_v53, %v4740_v4  ;;  %v8287_v41 = vld [vmem:[#allocation3 + $0x208] sm:$0xff]   ;;  %v10539_v53 = vld [vmem:[#allocation2 + $0x28] sm:$0xf] }
 0x2e8   : > { %v4662_v15 = vor.u32 %v10477_v10, %v10451_v45  ;;  %v4534_v36 = vsel %vm8731_vm7, %v10284_v60, %v4533_v16  ;;  %v7196_v55 = vcombine.low %v4738_v48, %v4741_v39  ;;  %v4817_v42 = vshrl.u32 %v10515_v54, 16  ;;  %v10543_v48 = vld [vmem:[#allocation2 + $0x2c] sm:$0x1] }
 0x2e9   : > { %v4820_v49 = vshll.u32 %v10515_v54, 16  ;;  %v10528_v38 = vrot.slane %v4683_v35, 5  ;;  %v4826_v34 = vshll.u32 %v10517_v50, 16  ;;  %v4830_v9 = vshrl.u32 %v10517_v50, 16 }
 0x2ea   : > { %6065 = vmatmul.mubr.bf16.gmra.mrb[104].mxu1 %v7162_v33  ;;  %v4397_v33 = vsel %vm8731_vm7, %v4392_v13, %v4396_v26  ;;  %v10519_v26 = vld [vmem:[#allocation2 + $0x20] sm:$0x1]  ;;  %v7188_v46 = vcombine.low %v4524_v25, %v4534_v36  ;;  %v4819_v14 = vrot.slane %v4817_v42, 4  ;;  %v4747_v28 = vrot.slane %v4504_v19, 5 }
 0x2eb   : > { %6162 = vmatmul.mubr.bf16.gmra.mrb[124].mxu0 %v7178_v32  ;;  %v8283_v32 = vld [vmem:[#allocation3 + $0x1f8] sm:$0xff]   ;;  %v7171_v23 = vcombine.low %v4387_v57, %v4397_v33  ;;  %v4836_v13 = vshll.u32 %v10519_v26, 16  ;;  %v4822_v60 = vrot.slane %v4820_v49, 5  ;;  %v7141_v57 = vrot.slane %v4704_v24, 9 }
 0x2ec   : > { %6169 = vmatprep.mubr.bf16.mxu0 %v7187_v51  ;;  %7890 = vmatprep.subr.bf16.mxu0 %v8283_v32  ;;  %v4614_v51 = vor.u32 %v10422_v44, %v10398_v11  ;;  %v4828_v6 = vrot.slane %v4826_v34, 5  ;;  %v4832_v33 = vrot.slane %v4830_v9, 4  ;;  %v10533_v32 = vld [vmem:[#allocation2 + $0x24] sm:$0xf]  ;;  %v4545_v21 = vshll.u32 %v10280_v37, 16 }
 0x2ed   : > { %6072 = vmatprep.mubr.bf16.mxu1 %v7171_v23  ;;  %7891 = vmatpush3.bf16.msra.mxu0 %v8284_v56  ;;  %v4823_v5 = vor.u32 %v4822_v60, %v4819_v14  ;;  %v4745_v35 = vsel %vm8702_vm4, %v7141_v57, %v4744_v27  ;;  %v4543_v23 = vrot.slane %v4542_v3, 4  ;;  %v4549_v25 = vshrl.u32 %v10280_v37, 16  ;;  %v8289_v14 = vld [vmem:[#allocation3 + $0x210] sm:$0xff]  }
 0x2ee   : > { %v4833_v8 = vor.u32 %v4832_v33, %v4828_v6  ;;  %v4555_v4 = vshll.u32 %v4504_v19, 16  ;;  %v4841_v39 = vshrl.u32 %v10533_v32, 16  ;;  %v7204_v49 = vcombine.low %v10515_v54, %v10517_v50  ;;  %v4705_v33 = vld [vmem:[#allocation2 + $0x24] sm:$0xe] }
 0x2ef   : > { %v4824_v56 = vrot.slane %v4823_v5, 4  ;;  %v4551_v42 = vrot.slane %v4549_v25, 4  ;;  %v5052_v25 = vrot.slane %v10543_v48, 5  ;;  %v4597_v20 = vshrl.u32 %v10340_v2, 16 }
 0x2f0   : > { %v4834_v3 = vrot.slane %v4833_v8, 4  ;;  %v4843_v19 = vrot.slane %v4841_v39, 4 }
 0x2f1   : > { %v4829_v37 = vsel %vm8731_vm7, %v4824_v56, %v4828_v6  ;;  %v4854_v6 = vshrl.u32 %v10539_v53, 16 }
 0x2f2   : > { %6073 = vmatmul.mubr.bf16.gmra.mrb[108].mxu1 %v7163_v12  ;;  %v4838_v12 = vrot.slane %v4836_v13, 5  ;;  %v4557_v13 = vrot.slane %v4555_v4, 5 }
 0x2f3   : > { %6170 = vmatmul.mubr.bf16.gmra.mrb[128].mxu0 %v7179_v63  ;;  %6210 = vmatprep.mubr.bf16.mxu1 %v7196_v55  ;;  %v4746_v63 = vrot.slane %v4744_v27, 4  ;;  %v4844_v27 = vshll.u32 %v10533_v32, 16  ;;  %v4547_v55 = vrot.slane %v4545_v21, 5  ;;  %v4856_v8 = vrot.slane %v4854_v6, 4 }
 0x2f4   : > { %v4839_v34 = vsel %vm8731_vm7, %v4834_v3, %v4838_v12  ;;  %v4505_v12 = vld [vmem:[#allocation2 + $0x2c] sm:$0x1]  ;;  %v5049_v21 = vrot.slane %v10539_v53, 5  ;;  %v7205_v3 = vcombine.low %v10533_v32, %v10539_v53  ;;  %v4569_v32 = vshll.u32 %v10313_v62, 16 }
 0x2f5   : > { %v4748_v16 = vsel %vm8702_vm4, %v4746_v63, %v4747_v28  ;;  %v4846_v24 = vrot.slane %v4844_v27, 5  ;;  %v4552_v9 = vor.u32 %v4551_v42, %v4547_v55  ;;  %v7212_v60 = vcombine.low %v4829_v37, %v4839_v34  ;;  %v10569_v42 = vld [vmem:[#allocation2 + $0x34] sm:$0xf] }
 0x2f6   : > { %v7197_v36 = vcombine.low %v4745_v35, %v4748_v16  ;;  %v4548_v54 = vsel %vm8731_vm7, %v4543_v23, %v4547_v55  ;;  %v4686_v35 = vor.u32 %v10528_v38, %v10482_v0  ;;  %v7142_v23 = vrot.slane %v4705_v33, 9  ;;  %v10567_v55 = vld [vmem:[#allocation2 + $0x30] sm:$0xf] }
 0x2f7   : > { %v4847_v57 = vor.u32 %v4846_v24, %v4843_v19  ;;  %v4553_v63 = vrot.slane %v4552_v9, 4  ;;  %6307 = vmatprep.mubr.bf16.mxu0 %v7212_v60  ;;  %v4751_v16 = vrot.slane %v10313_v62, 5  ;;  %v4567_v24 = vrot.slane %v4566_v7, 4 }
 0x2f8   : > { %v4573_v9 = vshrl.u32 %v10313_v62, 16  ;;  %v4868_v6 = vshll.u32 %v10567_v55, 16  ;;  %v4571_v33 = vrot.slane %v4569_v32, 5 }
 0x2f9   : > { %v4848_v28 = vrot.slane %v4847_v57, 4  ;;  %v4558_v4 = vsel %vm8731_vm7, %v4553_v63, %v4557_v13  ;;  %v4753_v19 = vrot.slane %v4751_v16, 4  ;;  %v4579_v13 = vshll.u32 %v4505_v12, 16 }
 0x2fa   : > { %6211 = vmatmul.mubr.bf16.vlgmr.msra.gmra.mrb[112].mxu1 %v7188_v46  ;;  %v4850_v46 = vshll.u32 %v10539_v53, 16  ;;  %v7189_v39 = vcombine.low %v4548_v54, %v4558_v4  ;;  %v4865_v57 = vshrl.u32 %v10567_v55, 16  ;;  %v4575_v62 = vrot.slane %v4573_v9, 4  ;;  %v4706_v54 = vld [vmem:[#allocation2 + $0x30] sm:$0xe] }
 0x2fb   : > { %7993 = vmatpush3.bf16.msra.mxu1 %v8285_v61  ;;  %6218 = vmatprep.mubr.bf16.mxu1 %v7197_v36  ;;  %v4860_v61 = vshll.u32 %v10543_v48, 16  ;;  %v4754_v36 = vrot.slane %v4505_v12, 5  ;;  %v10591_v63 = vrot.slane %v5049_v21, 4 }
 0x2fc   : > { %7994 = vmatprep.subr.bf16.mxu1 %v8287_v41  ;;  %v4852_v5 = vrot.slane %v4850_v46, 5  ;;  %6308 = vmatmul.mubr.bf16.vlgmr.msra.gmra.mrb[132].mxu0 %v7204_v49  ;;  %v4752_v49 = vsel %vm8702_vm4, %v7142_v23, %v4751_v16  ;;  %v10580_v46 = vld [vmem:[#allocation2 + $0x38] sm:$0x1]  ;;  %v4867_v12 = vrot.slane %v4865_v57, 4  ;;  %v4576_v4 = vor.u32 %v4575_v62, %v4571_v33  ;;  %v10602_v57 = vld [vmem:[#allocation2 + $0x3c] sm:$0xf] }
 0x2fd   : > { %v4862_v56 = vrot.slane %v4860_v61, 5  ;;  %v4755_v60 = vsel %vm8702_vm4, %v4753_v19, %v4754_v36  ;;  %v4874_v61 = vshll.u32 %v10569_v42, 16  ;;  %v4878_v16 = vshrl.u32 %v10569_v42, 16 }
 0x2fe   : > { %v4857_v27 = vor.u32 %v4856_v8, %v4852_v5  ;;  %v4853_v37 = vsel %vm8731_vm7, %v4848_v28, %v4852_v5  ;;  %v7198_v7 = vcombine.low %v4752_v49, %v4755_v60  ;;  %v4870_v28 = vrot.slane %v4868_v6, 5  ;;  %v4506_v8 = vld [vmem:[#allocation2 + $0x38] sm:$0x1]  ;;  %v8295_v49 = vld [vmem:[#allocation3 + $0x228] sm:$0xff]  }
 0x2ff   : > { %7995 = vmatpush3.bf16.msra.mxu1 %v8287_v41  ;;  %v8291_v41 = vld [vmem:[#allocation3 + $0x218] sm:$0xff]   ;;  %v4876_v23 = vrot.slane %v4874_v61, 5  ;;  %v7143_v36 = vrot.slane %v4706_v54, 9  ;;  %v4880_v19 = vrot.slane %v4878_v16, 4  ;;  %v4761_v32 = vrot.slane %v4506_v8, 5 }
 0x300   : > { %7996 = vmatprep.subr.bf16.mxu1 %v8289_v14  ;;  %v4858_v34 = vrot.slane %v4857_v27, 4  ;;  %v4884_v27 = vshll.u32 %v10580_v46, 16  ;;  %v4591_v60 = vrot.slane %v4590_v59, 4  ;;  %v10613_v59 = vld [vmem:[#allocation2 + $0x44] sm:$0x1] }
 0x301   : > { %v4707_v16 = vld [vmem:[#allocation2 + $0x3c] sm:$0xe] }
 0x302   : > { %6219 = vmatmul.mubr.bf16.gmra.mrb[116].mxu1 %v7189_v39  ;;  %v4863_v18 = vsel %vm8731_vm7, %v4858_v34, %v4862_v56  ;;  %v4572_v56 = vsel %vm8731_vm7, %v4567_v24, %v4571_v33  ;;  %v4871_v39 = vor.u32 %v4870_v28, %v4867_v12  ;;  %v4758_v34 = vrot.slane %v10340_v2, 5  ;;  %v8297_v28 = vld [vmem:[#allocation3 + $0x230] sm:$0xff]  }
 0x303   : > { %7997 = vmatpush3.bf16.msra.mxu1 %v8289_v14  ;;  %v7213_v5 = vcombine.low %v4853_v37, %v4863_v18  ;;  %6226 = vmatprep.mubr.bf16.mxu1 %v7198_v7  ;;  %v4581_v14 = vrot.slane %v4579_v13, 5  ;;  %v4577_v37 = vrot.slane %v4576_v4, 4  ;;  %v4886_v13 = vrot.slane %v4884_v27, 5 }
 0x304   : > { %7998 = vmatprep.subr.bf16.mxu1 %v8291_v41  ;;  %v4872_v9 = vrot.slane %v4871_v39, 4  ;;  %v4593_v24 = vshll.u32 %v10340_v2, 16  ;;  %v4759_v6 = vsel %vm8702_vm4, %v7143_v36, %v4758_v34  ;;  %v4760_v61 = vrot.slane %v4758_v34, 4  ;;  %v4507_v34 = vld [vmem:[#allocation2 + $0x44] sm:$0x1] }
 0x305   : > { %6315 = vmatprep.mubr.bf16.mxu0 %v7213_v5  ;;  %v4603_v5 = vshll.u32 %v4506_v8, 16  ;;  %v4889_v12 = vshrl.u32 %v10602_v57, 16  ;;  %v7206_v4 = vcombine.low %v10567_v55, %v10569_v42  ;;  %v4599_v2 = vrot.slane %v4597_v20, 4 }
 0x306   : > { %6316 = vmatmul.mubr.bf16.gmra.mrb[136].mxu0 %v7205_v3  ;;  %v4881_v3 = vor.u32 %v4880_v19, %v4876_v23  ;;  %v4877_v7 = vsel %vm8731_vm7, %v4872_v9, %v4876_v23  ;;  %v4595_v33 = vrot.slane %v4593_v24, 5  ;;  %v4762_v54 = vsel %vm8702_vm4, %v4760_v61, %v4761_v32 }
 0x307   : > { %7999 = vmatpush3.bf16.msra.mxu1 %v8291_v41  ;;  %v4582_v41 = vsel %vm8731_vm7, %v4577_v37, %v4581_v14  ;;  %v7199_v14 = vcombine.low %v4759_v6, %v4762_v54  ;;  %v4892_v23 = vshll.u32 %v10602_v57, 16  ;;  %v4891_v39 = vrot.slane %v4889_v12, 4 }
 0x308   : > { %8000 = vmatprep.subr.bf16.mxu1 %v8293_v43  ;;  %v7190_v18 = vcombine.low %v4572_v56, %v4582_v41  ;;  %v4882_v62 = vrot.slane %v4881_v3, 4  ;;  %v4605_v56 = vrot.slane %v4603_v5, 5  ;;  %v4898_v8 = vshll.u32 %v10611_v1, 16  ;;  %v8299_v41 = vld [vmem:[#allocation3 + $0x238] sm:$0xff]  }
 0x309   : > { %v4600_v36 = vor.u32 %v4599_v2, %v4595_v33  ;;  %v4894_v37 = vrot.slane %v4892_v23, 5  ;;  %v4902_v19 = vshrl.u32 %v10611_v1, 16  ;;  %v4596_v55 = vsel %vm8731_vm7, %v4591_v60, %v4595_v33  ;;  %v10642_v23 = vld [vmem:[#allocation2 + $0x4c] sm:$0xf] }
 0x30a   : > { %6227 = vmatmul.mubr.bf16.gmra.mrb[120].mxu1 %v7190_v18  ;;  %v4900_v32 = vrot.slane %v4898_v8, 5  ;;  %v4908_v9 = vshll.u32 %v10613_v59, 16  ;;  %v7144_v24 = vrot.slane %v4707_v16, 9  ;;  %v4765_v18 = vrot.slane %v10387_v17, 5  ;;  %v4708_v8 = vld [vmem:[#allocation2 + $0x48] sm:$0xe] }
 0x30b   : > { %8001 = vmatpush3.bf16.msra.mxu1 %v8293_v43  ;;  %v4887_v43 = vsel %vm8731_vm7, %v4882_v62, %v4886_v13  ;;  %6234 = vmatprep.mubr.bf16.mxu1 %v7199_v14  ;;  %v10628_v13 = vld [vmem:[#allocation2 + $0x48] sm:$0xf]  ;;  %v4601_v3 = vrot.slane %v4600_v36, 4  ;;  %v4895_v6 = vor.u32 %v4894_v37, %v4891_v39  ;;  %v4904_v61 = vrot.slane %v4902_v19, 4  ;;  %v10649_v39 = vld [vmem:[#allocation2 + $0x50] sm:$0x1] }
 0x30c   : > { %8002 = vmatprep.subr.bf16.mxu1 %v8295_v49  ;;  %v7214_v27 = vcombine.low %v4877_v7, %v4887_v43  ;;  %v4910_v7 = vrot.slane %v4908_v9, 5  ;;  %v4615_v60 = vrot.slane %v4614_v51, 4  ;;  %v4617_v33 = vshll.u32 %v10387_v17, 16  ;;  %v4508_v9 = vld [vmem:[#allocation2 + $0x50] sm:$0x1] }
 0x30d   : > { %v4606_v20 = vsel %vm8731_vm7, %v4601_v3, %v4605_v56  ;;  %v4896_v62 = vrot.slane %v4895_v6, 4  ;;  %v4905_v54 = vor.u32 %v4904_v61, %v4900_v32  ;;  %v4766_v5 = vsel %vm8702_vm4, %v7144_v24, %v4765_v18 }
 0x30e   : > { %6323 = vmatprep.mubr.bf16.mxu0 %v7214_v27  ;;  %v7191_v12 = vcombine.low %v4596_v55, %v4606_v20  ;;  %v4767_v14 = vrot.slane %v4765_v18, 4  ;;  %v4621_v2 = vshrl.u32 %v10387_v17, 16  ;;  %v4627_v51 = vshll.u32 %v4507_v34, 16 }
 0x30f   : > { %8003 = vmatpush3.bf16.msra.mxu1 %v8295_v49  ;;  %6324 = vmatmul.mubr.bf16.gmra.mrb[140].mxu0 %v7206_v4  ;;  %v4768_v49 = vrot.slane %v4507_v34, 5  ;;  %v4619_v4 = vrot.slane %v4617_v33, 5  ;;  %v4901_v11 = vsel %vm8731_vm7, %v4896_v62, %v4900_v32  ;;  %v4906_v44 = vrot.slane %v4905_v54, 4 }
 0x310   : > { %8004 = vmatprep.subr.bf16.mxu1 %v8297_v28  ;;  %v4913_v16 = vshrl.u32 %v10628_v13, 16  ;;  %v7207_v43 = vcombine.low %v10602_v57, %v10611_v1  ;;  %v4623_v56 = vrot.slane %v4621_v2, 4  ;;  %v4916_v17 = vshll.u32 %v10628_v13, 16 }
 0x311   : > { %v4911_v27 = vsel %vm8731_vm7, %v4906_v44, %v4910_v7  ;;  %v4629_v37 = vrot.slane %v4627_v51, 5  ;;  %v4922_v57 = vshll.u32 %v10642_v23, 16  ;;  %v4620_v24 = vsel %vm8731_vm7, %v4615_v60, %v4619_v4  ;;  %v10663_v60 = vld [vmem:[#allocation2 + $0x54] sm:$0xf] }
 0x312   : > { %6235 = vmatmul.mubr.bf16.gmra.mrb[124].mxu1 %v7191_v12  ;;  %v4915_v19 = vrot.slane %v4913_v16, 4  ;;  %v7215_v34 = vcombine.low %v4901_v11, %v4911_v27  ;;  %v4624_v55 = vor.u32 %v4623_v56, %v4619_v4  ;;  %v4918_v32 = vrot.slane %v4916_v17, 5  ;;  %v10671_v16 = vld [vmem:[#allocation2 + $0x58] sm:$0xf]  ;;  %v10678_v27 = vld [vmem:[#allocation2 + $0x5c] sm:$0x1] }
 0x313   : > { %8005 = vmatpush3.bf16.msra.mxu1 %v8297_v28  ;;  %v4769_v28 = vsel %vm8702_vm4, %v4767_v14, %v4768_v49  ;;  %v4926_v3 = vshrl.u32 %v10642_v23, 16  ;;  %v4932_v6 = vshll.u32 %v10649_v39, 16  ;;  %v7145_v61 = vrot.slane %v4708_v8, 9 }
 0x314   : > { %8006 = vmatprep.subr.bf16.mxu1 %v8299_v41  ;;  %v7200_v36 = vcombine.low %v4766_v5, %v4769_v28  ;;  %6331 = vmatprep.mubr.bf16.mxu0 %v7215_v34  ;;  %v4625_v18 = vrot.slane %v4624_v55, 4  ;;  %v4919_v7 = vor.u32 %v4918_v32, %v4915_v19  ;;  %v4924_v49 = vrot.slane %v4922_v57, 5  ;;  %v4709_v34 = vld [vmem:[#allocation2 + $0x54] sm:$0xe] }
 0x315   : > { %v4928_v33 = vrot.slane %v4926_v3, 4  ;;  %v4934_v20 = vrot.slane %v4932_v6, 5  ;;  %v4775_v62 = vrot.slane %v4508_v9, 5  ;;  %v4639_v54 = vrot.slane %v4638_v47, 4 }
 0x316   : > { %6242 = vmatprep.mubr.bf16.mxu1 %v7200_v36  ;;  %v4630_v5 = vsel %vm8731_vm7, %v4625_v18, %v4629_v37  ;;  %v4920_v12 = vrot.slane %v4919_v7, 4  ;;  %v4641_v44 = vshll.u32 %v10420_v22, 16  ;;  %v4645_v51 = vshrl.u32 %v10420_v22, 16 }
 0x317   : > { %8007 = vmatpush3.bf16.msra.mxu1 %v8299_v41  ;;  %v4772_v41 = vrot.slane %v10420_v22, 5  ;;  %6332 = vmatmul.mubr.bf16.gmra.mrb[144].mxu0 %v7207_v43  ;;  %v7192_v2 = vcombine.low %v4620_v24, %v4630_v5  ;;  %v4929_v11 = vor.u32 %v4928_v33, %v4924_v49  ;;  %v4651_v47 = vshll.u32 %v4508_v9, 16  ;;  %v4509_v24 = vld [vmem:[#allocation2 + $0x5c] sm:$0x1] }
 0x318   : > { %v4925_v58 = vsel %vm8731_vm7, %v4920_v12, %v4924_v49  ;;  %v4937_v43 = vshrl.u32 %v10663_v60, 16  ;;  %v4643_v17 = vrot.slane %v4641_v44, 5  ;;  %v4647_v8 = vrot.slane %v4645_v51, 4 }
 0x319   : > { %v4773_v14 = vsel %vm8702_vm4, %v7145_v61, %v4772_v41  ;;  %v4774_v4 = vrot.slane %v4772_v41, 4  ;;  %v4930_v28 = vrot.slane %v4929_v11, 4  ;;  %v7208_v22 = vcombine.low %v10628_v13, %v10642_v23 }
 0x31a   : > { %6243 = vmatmul.mubr.bf16.gmra.mrb[128].mxu1 %v7192_v2  ;;  %v4939_v36 = vrot.slane %v4937_v43, 4  ;;  %v4940_v37 = vshll.u32 %v10663_v60, 16  ;;  %v4946_v19 = vshll.u32 %v10671_v16, 16  ;;  %v4648_v32 = vor.u32 %v4647_v8, %v4643_v17  ;;  %v10697_v2 = vld [vmem:[#allocation2 + $0x60] sm:$0xf] }
 0x31b   : > { %v4776_v31 = vsel %vm8702_vm4, %v4774_v4, %v4775_v62  ;;  %v4935_v55 = vsel %vm8731_vm7, %v4930_v28, %v4934_v20  ;;  %v4653_v57 = vrot.slane %v4651_v47, 5  ;;  %v4950_v9 = vshrl.u32 %v10671_v16, 16 }
 0x31c   : > { %v7201_v56 = vcombine.low %v4773_v14, %v4776_v31  ;;  %v7216_v3 = vcombine.low %v4925_v58, %v4935_v55  ;;  %v4942_v6 = vrot.slane %v4940_v37, 5  ;;  %v4948_v61 = vrot.slane %v4946_v19, 5  ;;  %v4710_v19 = vld [vmem:[#allocation2 + $0x60] sm:$0xe] }
 0x31d   : > { %v4956_v13 = vshll.u32 %v10678_v27, 16  ;;  %v4644_v18 = vsel %vm8731_vm7, %v4639_v54, %v4643_v17  ;;  %v4649_v7 = vrot.slane %v4648_v32, 4  ;;  %v4952_v49 = vrot.slane %v4950_v9, 4 }
 0x31e   : > { %6250 = vmatprep.mubr.bf16.mxu1 %v7201_v56  ;;  %v7146_v41 = vrot.slane %v4709_v34, 9  ;;  %6339 = vmatprep.mubr.bf16.mxu0 %v7216_v3  ;;  %v4943_v33 = vor.u32 %v4942_v6, %v4939_v36  ;;  %v4779_v62 = vrot.slane %v10446_v30, 5  ;;  %v4782_v5 = vrot.slane %v4509_v24, 5  ;;  %v10708_v56 = vld [vmem:[#allocation2 + $0x68] sm:$0x1] }
 0x31f   : > { %v4958_v20 = vrot.slane %v4956_v13, 5  ;;  %6340 = vmatmul.mubr.bf16.gmra.mrb[148].mxu0 %v7208_v22  ;;  %v4654_v12 = vsel %vm8731_vm7, %v4649_v7, %v4653_v57  ;;  %v4953_v14 = vor.u32 %v4952_v49, %v4948_v61  ;;  %v4663_v4 = vrot.slane %v4662_v15, 4  ;;  %v10706_v15 = vld [vmem:[#allocation2 + $0x64] sm:$0xf] }
 0x320   : > { %v4665_v54 = vshll.u32 %v10446_v30, 16  ;;  %v7193_v11 = vcombine.low %v4644_v18, %v4654_v12  ;;  %v4944_v44 = vrot.slane %v4943_v33, 4  ;;  %v4780_v51 = vsel %vm8702_vm4, %v7146_v41, %v4779_v62 }
 0x321   : > { %v4781_v58 = vrot.slane %v4779_v62, 4  ;;  %v4954_v31 = vrot.slane %v4953_v14, 4  ;;  %v4669_v43 = vshrl.u32 %v10446_v30, 16  ;;  %v4675_v28 = vshll.u32 %v4509_v24, 16 }
 0x322   : > { %v4667_v47 = vrot.slane %v4665_v54, 5  ;;  %6251 = vmatmul.mubr.bf16.gmra.mrb[132].mxu1 %v7193_v11  ;;  %v4949_v45 = vsel %vm8731_vm7, %v4944_v44, %v4948_v61  ;;  %v4961_v17 = vshrl.u32 %v10697_v2, 16  ;;  %v4964_v8 = vshll.u32 %v10697_v2, 16  ;;  %v4510_v61 = vld [vmem:[#allocation2 + $0x68] sm:$0x1] }
 0x323   : > { %v4783_v10 = vsel %vm8702_vm4, %v4781_v58, %v4782_v5  ;;  %v4959_v22 = vsel %vm8731_vm7, %v4954_v31, %v4958_v20  ;;  %v7209_v30 = vcombine.low %v10663_v60, %v10671_v16  ;;  %v4671_v37 = vrot.slane %v4669_v43, 4  ;;  %v10732_v58 = vld [vmem:[#allocation2 + $0x70] sm:$0xf] }
 0x324   : > { %v7202_v36 = vcombine.low %v4780_v51, %v4783_v10  ;;  %v7217_v34 = vcombine.low %v4949_v45, %v4959_v22  ;;  %v4677_v55 = vrot.slane %v4675_v28, 5  ;;  %v4963_v32 = vrot.slane %v4961_v17, 4  ;;  %v10730_v51 = vld [vmem:[#allocation2 + $0x6c] sm:$0xf] }
 0x325   : > { %v4966_v57 = vrot.slane %v4964_v8, 5  ;;  %v4672_v9 = vor.u32 %v4671_v37, %v4667_v47  ;;  %v4970_v24 = vshll.u32 %v10706_v15, 16  ;;  %v4974_v3 = vshrl.u32 %v10706_v15, 16 }
 0x326   : > { %6258 = vmatprep.mubr.bf16.mxu1 %v7202_v36  ;;  %v4980_v6 = vshll.u32 %v10708_v56, 16  ;;  %6347 = vmatprep.mubr.bf16.mxu0 %v7217_v34  ;;  %v4668_v60 = vsel %vm8731_vm7, %v4663_v4, %v4667_v47  ;;  %v7147_v18 = vrot.slane %v4710_v19, 9  ;;  %v4786_v7 = vrot.slane %v10474_v40, 5  ;;  %v5008_v34 = vld [vmem:[#allocation2 + $0x18] sm:$0xe] }
 0x327   : > { %v4967_v13 = vor.u32 %v4966_v57, %v4963_v32  ;;  %6348 = vmatmul.mubr.bf16.gmra.mrb[152].mxu0 %v7209_v30  ;;  %v4673_v49 = vrot.slane %v4672_v9, 4  ;;  %v4972_v41 = vrot.slane %v4970_v24, 5  ;;  %v4976_v33 = vrot.slane %v4974_v3, 4  ;;  %v5009_v24 = vld [vmem:[#allocation2 + $0x24] sm:$0xe] }
 0x328   : > { %v4982_v20 = vrot.slane %v4980_v6, 5  ;;  %v4787_v5 = vsel %vm8702_vm4, %v7147_v18, %v4786_v7  ;;  %v4788_v12 = vrot.slane %v4786_v7, 4  ;;  %v4789_v14 = vrot.slane %v4510_v61, 5 }
 0x329   : > { %v4968_v62 = vrot.slane %v4967_v13, 4  ;;  %v4678_v54 = vsel %vm8731_vm7, %v4673_v49, %v4677_v55  ;;  %v4977_v11 = vor.u32 %v4976_v33, %v4972_v41  ;;  %v4687_v4 = vrot.slane %v4686_v35, 4  ;;  %v10739_v35 = vld [vmem:[#allocation2 + $0x74] sm:$0x1]  ;;  %v5010_v49 = vld [vmem:[#allocation2 + $0x30] sm:$0xe] }
 0x32a   : > { %v4689_v44 = vshll.u32 %v10474_v40, 16  ;;  %v7194_v31 = vcombine.low %v4668_v60, %v4678_v54  ;;  %v4790_v43 = vsel %vm8702_vm4, %v4788_v12, %v4789_v14  ;;  %v4693_v28 = vshrl.u32 %v10474_v40, 16 }
 0x32b   : > { %v4973_v47 = vsel %vm8731_vm7, %v4968_v62, %v4972_v41  ;;  %v4978_v45 = vrot.slane %v4977_v11, 4  ;;  %v7203_v10 = vcombine.low %v4787_v5, %v4790_v43  ;;  %v4699_v0 = vshll.u32 %v4510_v61, 16 }
 0x32c   : > { %v4691_v17 = vrot.slane %v4689_v44, 5  ;;  %6259 = vmatmul.mubr.bf16.gmra.mrb[136].mxu1 %v7194_v31  ;;  %v4695_v38 = vrot.slane %v4693_v28, 4  ;;  %v4985_v8 = vshrl.u32 %v10730_v51, 16  ;;  %v4988_v22 = vshll.u32 %v10730_v51, 16 }
 0x32d   : > { %v4994_v30 = vshll.u32 %v10732_v58, 16  ;;  %v4983_v36 = vsel %vm8731_vm7, %v4978_v45, %v4982_v20  ;;  %v7210_v40 = vcombine.low %v10697_v2, %v10706_v15  ;;  %6266 = vmatprep.mubr.bf16.mxu1 %v7203_v10  ;;  %v4701_v37 = vrot.slane %v4699_v0, 5 }
 0x32e   : > { %v4998_v19 = vshrl.u32 %v10732_v58, 16  ;;  %v7218_v55 = vcombine.low %v4973_v47, %v4983_v36  ;;  %v4696_v32 = vor.u32 %v4695_v38, %v4691_v17  ;;  %v4987_v57 = vrot.slane %v4985_v8, 4 }
 0x32f   : > { %v4990_v9 = vrot.slane %v4988_v22, 5  ;;  %v4692_v3 = vsel %vm8731_vm7, %v4687_v4, %v4691_v17  ;;  %v4996_v6 = vrot.slane %v4994_v30, 5  ;;  %v5004_v60 = vshll.u32 %v10739_v35, 16 }
 0x330   : > { %v5000_v61 = vrot.slane %v4998_v19, 4  ;;  %6355 = vmatprep.mubr.bf16.mxu0 %v7218_v55  ;;  %v4697_v13 = vrot.slane %v4696_v32, 4  ;;  %v7148_v18 = vrot.slane %v5008_v34, 9  ;;  %v5042_v7 = vrot.slane %v10517_v50, 5  ;;  %v5013_v34 = vld [vmem:[#allocation2 + $0x54] sm:$0xe] }
 0x331   : > { %v4991_v2 = vor.u32 %v4990_v9, %v4987_v57  ;;  %6356 = vmatmul.mubr.bf16.gmra.mrb[156].mxu0 %v7210_v40  ;;  %v5006_v33 = vrot.slane %v5004_v60, 5  ;;  %v5045_v20 = vrot.slane %v10519_v26, 5  ;;  %v7149_v62 = vrot.slane %v5009_v24, 9 }
 0x332   : > { %v5001_v41 = vor.u32 %v5000_v61, %v4996_v6  ;;  %v4702_v5 = vsel %vm8731_vm7, %v4697_v13, %v4701_v37  ;;  %v5043_v14 = vsel %vm8702_vm4, %v7148_v18, %v5042_v7  ;;  %v5044_v54 = vrot.slane %v5042_v7, 4  ;;  %v5015_v18 = vld [vmem:[#allocation2 + $0x6c] sm:$0xe] }
 0x333   : > { %v4992_v12 = vrot.slane %v4991_v2, 4  ;;  %v7195_v11 = vcombine.low %v4692_v3, %v4702_v5  ;;  %v7150_v44 = vrot.slane %v5010_v49, 9  ;;  %v5053_v50 = vsel %vm8702_vm4, %v10591_v63, %v5052_v25 }
 0x334   : > { %v5002_v4 = vrot.slane %v5001_v41, 4  ;;  %v5046_v31 = vsel %vm8702_vm4, %v5044_v54, %v5045_v20  ;;  %v5056_v47 = vrot.slane %v10569_v42, 5  ;;  %v7211_v28 = vcombine.low %v10730_v51, %v10732_v58  ;;  %v5011_v42 = vld [vmem:[#allocation2 + $0x3c] sm:$0xe]  ;;  %v5012_v51 = vld [vmem:[#allocation2 + $0x48] sm:$0xe] }
 0x335   : > { %v4997_v26 = vsel %vm8731_vm7, %v4992_v12, %v4996_v6  ;;  %6267 = vmatmul.mubr.bf16.gmra.mrb[140].mxu1 %v7195_v11  ;;  %v7220_v48 = vcombine.low %v5043_v14, %v5046_v31  ;;  %v5059_v45 = vrot.slane %v10580_v46, 5  ;;  %v5050_v25 = vsel %vm8702_vm4, %v7149_v62, %v5049_v21 }
 0x336   : > { %v5007_v43 = vsel %vm8731_vm7, %v5002_v4, %v5006_v33  ;;  %v5058_v63 = vrot.slane %v5056_v47, 4  ;;  %v5063_v17 = vrot.slane %v10611_v1, 5  ;;  %v5057_v29 = vsel %vm8702_vm4, %v7150_v44, %v5056_v47 }
 0x337   : > { %v7219_v10 = vcombine.low %v4997_v26, %v5007_v43  ;;  %8008 = vmatprep.mubr.bf16.mxu1 %v7220_v48  ;;  %v5070_v0 = vrot.slane %v10642_v23, 5  ;;  %v7221_v53 = vcombine.low %v5050_v25, %v5053_v50  ;;  %v7151_v8 = vrot.slane %v5011_v42, 9 }
 0x338   : > { %v5060_v46 = vsel %vm8702_vm4, %v5058_v63, %v5059_v45  ;;  %v5065_v21 = vrot.slane %v5063_v17, 4  ;;  %v5066_v22 = vrot.slane %v10613_v59, 5  ;;  %v7152_v1 = vrot.slane %v5012_v51, 9 }
 0x339   : > { %6363 = vmatprep.mubr.bf16.mxu0 %v7219_v10  ;;  %v7222_v38 = vcombine.low %v5057_v29, %v5060_v46  ;;  %v5072_v30 = vrot.slane %v5070_v0, 4  ;;  %v5073_v36 = vrot.slane %v10649_v39, 5  ;;  %v5064_v23 = vsel %vm8702_vm4, %v7151_v8, %v5063_v17  ;;  %v5014_v39 = vld [vmem:[#allocation2 + $0x60] sm:$0xe] }
 0x33a   : > { %6364 = vmatmul.mubr.bf16.gmra.mrb[160].mxu0 %v7211_v28  ;;  %v5067_v40 = vsel %vm8702_vm4, %v5065_v21, %v5066_v22  ;;  %v5077_v37 = vrot.slane %v10671_v16, 5  ;;  %v5071_v19 = vsel %vm8702_vm4, %v7152_v1, %v5070_v0  ;;  %v5084_v55 = vrot.slane %v10706_v15, 5 }
 0x33b   : > { %v5074_v59 = vsel %vm8702_vm4, %v5072_v30, %v5073_v36  ;;  %v7223_v32 = vcombine.low %v5064_v23, %v5067_v40  ;;  %v7153_v9 = vrot.slane %v5013_v34, 9  ;;  %v5080_v3 = vrot.slane %v10678_v27, 5 }
 0x33c   : > { %v7224_v57 = vcombine.low %v5071_v19, %v5074_v59  ;;  %v5079_v24 = vrot.slane %v5077_v37, 4  ;;  %v7154_v6 = vrot.slane %v5014_v39, 9  ;;  %v5086_v61 = vrot.slane %v5084_v55, 4 }
 0x33d   : > { %8009 = vmatmul.mubr.bf16.vlgmr.msra.gmra.mrb[144].mxu1 %v7221_v53  ;;  %v5087_v16 = vrot.slane %v10708_v56, 5  ;;  %v5078_v60 = vsel %vm8702_vm4, %v7153_v9, %v5077_v37  ;;  %v5091_v15 = vrot.slane %v10732_v58, 5  ;;  %v7155_v56 = vrot.slane %v5015_v18, 9 }
 0x33e   : > { %8012 = vmatprep.mubr.bf16.mxu1 %v7222_v38  ;;  %v5081_v13 = vsel %vm8702_vm4, %v5079_v24, %v5080_v3  ;;  %v5085_v2 = vsel %vm8702_vm4, %v7154_v6, %v5084_v55  ;;  %v5094_v33 = vrot.slane %v10739_v35, 5 }
 0x33f   : > { %v5088_v27 = vsel %vm8702_vm4, %v5086_v61, %v5087_v16  ;;  %v7225_v7 = vcombine.low %v5078_v60, %v5081_v13  ;;  %v5093_v41 = vrot.slane %v5091_v15, 4  ;;  %v5092_v20 = vsel %vm8702_vm4, %v7155_v56, %v5091_v15 }
 0x340   : > { %v7226_v49 = vcombine.low %v5085_v2, %v5088_v27 }
 0x341   : > { %v5095_v58 = vsel %vm8702_vm4, %v5093_v41, %v5094_v33 }
 0x342   : > { %v7227_v62 = vcombine.low %v5092_v20, %v5095_v58 }
 0x345   : > { %8013 = vmatmul.mubr.bf16.gmra.mrb[148].mxu1 %v7223_v32 }
 0x346   : > { %8016 = vmatprep.mubr.bf16.mxu1 %v7224_v57 }
 0x34d   : > { %8017 = vmatmul.mubr.bf16.gmra.mrb[152].mxu1 %v7225_v7 }
 0x34e   : > { %8020 = vmatprep.mubr.bf16.mxu1 %v7226_v49 }
 0x355   : > { %8021 = vmatmul.mubr.bf16.gmra.mrb[156].mxu1 %v7227_v62 }
 0x38d   : > { %v7700_v5 = vpop.f32.mrb[80].mxu1 }
 0x38e   : > { %v7701_v12 = vpop.f32.mrb[81].mxu1  ;;  %v7764_v14 = vpop.f32.mrb[100].mxu0 }
 0x38f   : > { %v7702_v54 = vadd.f32 %v7701_v12, %v7700_v5  ;;  %v7703_v11 = vpop.f32.mrb[82].mxu1  ;;  %v7765_v4 = vpop.f32.mrb[101].mxu0 }
 0x390   : > { %v7704_v44 = vpop.f32.mrb[83].mxu1  ;;  %v7766_v50 = vadd.f32 %v7765_v4, %v7764_v14  ;;  %v7767_v26 = vpop.f32.mrb[102].mxu0 }
 0x391   : > { %v7705_v35 = vadd.f32 %v7704_v44, %v7703_v11  ;;  %v7768_v31 = vpop.f32.mrb[103].mxu0 }
 0x392   : > { %v10811_v47 = vadd.f32 %v7766_v50, %v7702_v54  ;;  %v7769_v43 = vadd.f32 %v7768_v31, %v7767_v26 }
 0x394   : > { %v10813_v28 = vadd.f32 %v7769_v43, %v7705_v35 }
 0x395   : > { %v7706_v48 = vpop.f32.mrb[84].mxu1 }
 0x396   : > { %v7770_v45 = vpop.f32.mrb[104].mxu0  ;;  %v7707_v10 = vpop.f32.mrb[85].mxu1 }
 0x397   : > { %v7771_v25 = vpop.f32.mrb[105].mxu0  ;;  %v7708_v63 = vadd.f32 %v7707_v10, %v7706_v48  ;;  %v7709_v29 = vpop.f32.mrb[86].mxu1 }
 0x398   : > { %v7772_v17 = vadd.f32 %v7771_v25, %v7770_v45  ;;  %v7773_v42 = vpop.f32.mrb[106].mxu0  ;;  %v7710_v0 = vpop.f32.mrb[87].mxu1 }
 0x399   : > { %v7774_v46 = vpop.f32.mrb[107].mxu0  ;;  %v7711_v53 = vadd.f32 %v7710_v0, %v7709_v29 }
 0x39a   : > { %v10815_v51 = vadd.f32 %v7772_v17, %v7708_v63  ;;  %v7775_v38 = vadd.f32 %v7774_v46, %v7773_v42 }
 0x39c   : > { %v10817_v8 = vadd.f32 %v7775_v38, %v7711_v53 }
 0x39d   : > { %v7712_v21 = vpop.f32.mrb[88].mxu1 }
 0x39e   : > { %v7776_v22 = vpop.f32.mrb[108].mxu0  ;;  %v7713_v1 = vpop.f32.mrb[89].mxu1 }
 0x39f   : > { %v7777_v30 = vpop.f32.mrb[109].mxu0  ;;  %v7714_v36 = vadd.f32 %v7713_v1, %v7712_v21  ;;  %v7715_v40 = vpop.f32.mrb[90].mxu1 }
 0x3a0   : > { %v7778_v23 = vadd.f32 %v7777_v30, %v7776_v22  ;;  %v7779_v37 = vpop.f32.mrb[110].mxu0  ;;  %v7716_v19 = vpop.f32.mrb[91].mxu1 }
 0x3a1   : > { %v7780_v59 = vpop.f32.mrb[111].mxu0  ;;  %v7717_v55 = vadd.f32 %v7716_v19, %v7715_v40 }
 0x3a2   : > { %v10819_v34 = vadd.f32 %v7778_v23, %v7714_v36  ;;  %v7781_v39 = vadd.f32 %v7780_v59, %v7779_v37 }
 0x3a4   : > { %v10821_v32 = vadd.f32 %v7781_v39, %v7717_v55 }
 0x3a5   : > { %v7718_v57 = vpop.f32.mrb[92].mxu1 }
 0x3a6   : > { %v7782_v9 = vpop.f32.mrb[112].mxu0  ;;  %v7719_v24 = vpop.f32.mrb[93].mxu1 }
 0x3a7   : > { %v7783_v3 = vpop.f32.mrb[113].mxu0  ;;  %v7720_v6 = vadd.f32 %v7719_v24, %v7718_v57  ;;  %v7721_v16 = vpop.f32.mrb[94].mxu1 }
 0x3a8   : > { %v7784_v61 = vadd.f32 %v7783_v3, %v7782_v9  ;;  %v7785_v60 = vpop.f32.mrb[114].mxu0  ;;  %v7722_v13 = vpop.f32.mrb[95].mxu1 }
 0x3a9   : > { %v7786_v15 = vpop.f32.mrb[115].mxu0  ;;  %v7723_v27 = vadd.f32 %v7722_v13, %v7721_v16 }
 0x3aa   : > { %v10823_v2 = vadd.f32 %v7784_v61, %v7720_v6  ;;  %v7787_v18 = vadd.f32 %v7786_v15, %v7785_v60 }
 0x3ac   : > { %v10825_v7 = vadd.f32 %v7787_v18, %v7723_v27 }
 0x3ad   : > { %v7724_v49 = vpop.f32.mrb[96].mxu1 }
 0x3ae   : > { %v7788_v56 = vpop.f32.mrb[116].mxu0  ;;  %v7725_v41 = vpop.f32.mrb[97].mxu1 }
 0x3af   : > { %v7789_v33 = vpop.f32.mrb[117].mxu0  ;;  %v7726_v20 = vadd.f32 %v7725_v41, %v7724_v49  ;;  %v7727_v62 = vpop.f32.mrb[98].mxu1 }
 0x3b0   : > { %v7790_v58 = vadd.f32 %v7789_v33, %v7788_v56  ;;  %v7791_v5 = vpop.f32.mrb[118].mxu0  ;;  %v7728_v12 = vpop.f32.mrb[99].mxu1 }
 0x3b1   : > { %v7792_v14 = vpop.f32.mrb[119].mxu0  ;;  %v7729_v11 = vadd.f32 %v7728_v12, %v7727_v62 }
 0x3b2   : > { %v10827_v54 = vadd.f32 %v7790_v58, %v7726_v20  ;;  %v7793_v4 = vadd.f32 %v7792_v14, %v7791_v5 }
 0x3b4   : > { %v10829_v44 = vadd.f32 %v7793_v4, %v7729_v11 }
 0x3b5   : > { %v7730_v50 = vpop.f32.mrb[100].mxu1 }
 0x3b6   : > { %v7794_v26 = vpop.f32.mrb[120].mxu0  ;;  %v7731_v35 = vpop.f32.mrb[101].mxu1 }
 0x3b7   : > { %v7795_v31 = vpop.f32.mrb[121].mxu0  ;;  %v7732_v43 = vadd.f32 %v7731_v35, %v7730_v50  ;;  %v7733_v45 = vpop.f32.mrb[102].mxu1 }
 0x3b8   : > { %v7796_v48 = vadd.f32 %v7795_v31, %v7794_v26  ;;  %v7797_v10 = vpop.f32.mrb[122].mxu0  ;;  %v7734_v25 = vpop.f32.mrb[103].mxu1 }
 0x3b9   : > { %v7798_v63 = vpop.f32.mrb[123].mxu0  ;;  %v7735_v29 = vadd.f32 %v7734_v25, %v7733_v45 }
 0x3ba   : > { %v10831_v17 = vadd.f32 %v7796_v48, %v7732_v43  ;;  %v7799_v42 = vadd.f32 %v7798_v63, %v7797_v10 }
 0x3bc   : > { %v10833_v0 = vadd.f32 %v7799_v42, %v7735_v29 }
 0x3bd   : > { %v7736_v46 = vpop.f32.mrb[104].mxu1 }
 0x3be   : > { %v7800_v53 = vpop.f32.mrb[124].mxu0  ;;  %v7737_v38 = vpop.f32.mrb[105].mxu1 }
 0x3bf   : > { %v7801_v21 = vpop.f32.mrb[125].mxu0  ;;  %v7738_v22 = vadd.f32 %v7737_v38, %v7736_v46  ;;  %v7739_v30 = vpop.f32.mrb[106].mxu1 }
 0x3c0   : > { %v7802_v1 = vadd.f32 %v7801_v21, %v7800_v53  ;;  %v7803_v36 = vpop.f32.mrb[126].mxu0  ;;  %v7740_v23 = vpop.f32.mrb[107].mxu1 }
 0x3c1   : > { %v7804_v40 = vpop.f32.mrb[127].mxu0  ;;  %v7741_v19 = vadd.f32 %v7740_v23, %v7739_v30 }
 0x3c2   : > { %v10835_v37 = vadd.f32 %v7802_v1, %v7738_v22  ;;  %v7805_v59 = vadd.f32 %v7804_v40, %v7803_v36 }
 0x3c4   : > { %v10837_v55 = vadd.f32 %v7805_v59, %v7741_v19 }
 0x3c5   : > { %v7742_v9 = vpop.f32.mrb[108].mxu1 }
 0x3c6   : > { %v7806_v39 = vpop.f32.mrb[128].mxu0  ;;  %v7743_v6 = vpop.f32.mrb[109].mxu1 }
 0x3c7   : > { %v7807_v57 = vpop.f32.mrb[129].mxu0  ;;  %v7744_v16 = vadd.f32 %v7743_v6, %v7742_v9  ;;  %v7745_v60 = vpop.f32.mrb[110].mxu1 }
 0x3c8   : > { %v7808_v24 = vadd.f32 %v7807_v57, %v7806_v39  ;;  %v7809_v3 = vpop.f32.mrb[130].mxu0  ;;  %v7746_v15 = vpop.f32.mrb[111].mxu1 }
 0x3c9   : > { %v7810_v61 = vpop.f32.mrb[131].mxu0  ;;  %v7747_v18 = vadd.f32 %v7746_v15, %v7745_v60 }
 0x3ca   : > { %v7811_v13 = vadd.f32 %v7810_v61, %v7809_v3  ;;  %v10839_v27 = vadd.f32 %v7808_v24, %v7744_v16 }
 0x3cc   : > { %v10841_v49 = vadd.f32 %v7811_v13, %v7747_v18 }
 0x3cd   : > { %v7828_v56 = vpop.f32.mrb[112].mxu1 }
 0x3ce   : > { %v7829_v41 = vpop.f32.mrb[113].mxu1 }
 0x3cf   : > { %v7830_v33 = vadd.f32 %v7829_v41, %v7828_v56  ;;  %v7831_v20 = vpop.f32.mrb[114].mxu1  ;;  %v7892_v12 = vpop.f32.mrb[132].mxu0 }
 0x3d0   : > { %v7832_v58 = vpop.f32.mrb[115].mxu1  ;;  %v7893_v11 = vpop.f32.mrb[133].mxu0 }
 0x3d1   : > { %v6213_v62 = vadd.f32 %v7830_v33, %v10811_v47  ;;  %v7833_v5 = vadd.f32 %v7832_v58, %v7831_v20  ;;  %v7894_v4 = vadd.f32 %v7893_v11, %v7892_v12  ;;  %v7895_v50 = vpop.f32.mrb[134].mxu0 }
 0x3d2   : > { %v7896_v26 = vpop.f32.mrb[135].mxu0 }
 0x3d3   : > { %v6216_v14 = vadd.f32 %v7833_v5, %v10813_v28  ;;  %v7897_v31 = vadd.f32 %v7896_v26, %v7895_v50  ;;  %v10845_v48 = vadd.f32 %v7894_v4, %v6213_v62 }
 0x3d5   : > { %v7834_v35 = vpop.f32.mrb[116].mxu1  ;;  %v10847_v63 = vadd.f32 %v7897_v31, %v6216_v14 }
 0x3d6   : > { %v7835_v43 = vpop.f32.mrb[117].mxu1 }
 0x3d7   : > { %v7836_v45 = vadd.f32 %v7835_v43, %v7834_v35  ;;  %v7837_v10 = vpop.f32.mrb[118].mxu1 }
 0x3d8   : > { %v7838_v25 = vpop.f32.mrb[119].mxu1 }
 0x3d9   : > { %v6221_v47 = vadd.f32 %v7836_v45, %v10815_v51  ;;  %v7839_v29 = vadd.f32 %v7838_v25, %v7837_v10  ;;  %v7898_v42 = vpop.f32.mrb[136].mxu0 }
 0x3da   : > { %v7899_v46 = vpop.f32.mrb[137].mxu0 }
 0x3db   : > { %v6224_v28 = vadd.f32 %v7839_v29, %v10817_v8  ;;  %v7900_v53 = vadd.f32 %v7899_v46, %v7898_v42  ;;  %v7901_v38 = vpop.f32.mrb[138].mxu0 }
 0x3dc   : > { %v7902_v21 = vpop.f32.mrb[139].mxu0 }
 0x3dd   : > { %v7903_v22 = vadd.f32 %v7902_v21, %v7901_v38  ;;  %v10851_v1 = vadd.f32 %v7900_v53, %v6221_v47  ;;  %v7840_v30 = vpop.f32.mrb[120].mxu1 }
 0x3de   : > { %v7841_v36 = vpop.f32.mrb[121].mxu1 }
 0x3df   : > { %v10853_v23 = vadd.f32 %v7903_v22, %v6224_v28  ;;  %v7842_v40 = vadd.f32 %v7841_v36, %v7840_v30  ;;  %v7843_v19 = vpop.f32.mrb[122].mxu1 }
 0x3e0   : > { %v7844_v59 = vpop.f32.mrb[123].mxu1 }
 0x3e1   : > { %v6229_v51 = vadd.f32 %v7842_v40, %v10819_v34  ;;  %v7845_v39 = vadd.f32 %v7844_v59, %v7843_v19 }
 0x3e2   : > { %v7904_v57 = vpop.f32.mrb[140].mxu0 }
 0x3e3   : > { %v6232_v8 = vadd.f32 %v7845_v39, %v10821_v32  ;;  %v7905_v9 = vpop.f32.mrb[141].mxu0 }
 0x3e4   : > { %v7906_v24 = vadd.f32 %v7905_v9, %v7904_v57  ;;  %v7907_v3 = vpop.f32.mrb[142].mxu0 }
 0x3e5   : > { %v7908_v6 = vpop.f32.mrb[143].mxu0  ;;  %v7846_v16 = vpop.f32.mrb[124].mxu1 }
 0x3e6   : > { %v7909_v61 = vadd.f32 %v7908_v6, %v7907_v3  ;;  %v10857_v60 = vadd.f32 %v7906_v24, %v6229_v51  ;;  %v7847_v13 = vpop.f32.mrb[125].mxu1 }
 0x3e7   : > { %v7848_v15 = vadd.f32 %v7847_v13, %v7846_v16  ;;  %v7849_v18 = vpop.f32.mrb[126].mxu1  ;;  %v7306_v16 = vld [vmem:[%s8686_s12 + $0x28] sm:$0xf] }
 0x3e8   : > { %v10859_v56 = vadd.f32 %v7909_v61, %v6232_v8  ;;  %v7850_v41 = vpop.f32.mrb[127].mxu1 }
 0x3e9   : > { %v6237_v34 = vadd.f32 %v7848_v15, %v10823_v2  ;;  %v7851_v33 = vadd.f32 %v7850_v41, %v7849_v18  ;;  %v7305_v18 = vld [vmem:[%s8686_s12 + $0x24] sm:$0xe] }
 0x3ea   : > { %v7910_v20 = vpop.f32.mrb[144].mxu0 }
 0x3eb   : > { %v6240_v32 = vadd.f32 %v7851_v33, %v10825_v7  ;;  %v7911_v58 = vpop.f32.mrb[145].mxu0  ;;  %v7302_v33 = vld [vmem:[%s8686_s12 + $0x18] sm:$0xe] }
 0x3ec   : > { %v7912_v62 = vadd.f32 %v7911_v58, %v7910_v20  ;;  %v7913_v5 = vpop.f32.mrb[146].mxu0  ;;  %v7303_v20 = vld [vmem:[%s8686_s12 + $0x1c] sm:$0xf] }
 0x3ed   : > { %v7914_v12 = vpop.f32.mrb[147].mxu0  ;;  %v7852_v11 = vpop.f32.mrb[128].mxu1 }
 0x3ee   : > { %v7915_v14 = vadd.f32 %v7914_v12, %v7913_v5  ;;  %v10863_v4 = vadd.f32 %v7912_v62, %v6237_v34  ;;  %v7853_v50 = vpop.f32.mrb[129].mxu1  ;;  %v6572_v34 = vrot.slane %v7306_v16, 5  ;;  %v7307_v12 = vld [vmem:[%s8686_s12 + $0x2c] sm:$0x1]  ;;  %v7313_v16 = vld [vmem:[%s8686_s12 + $0x44] sm:$0x1] }
 0x3ef   : > { %v7854_v26 = vadd.f32 %v7853_v50, %v7852_v11  ;;  %v7855_v35 = vpop.f32.mrb[130].mxu1  ;;  %v7327_v11 = vrot.slane %v7305_v18, 9  ;;  %v7326_v50 = vrot.slane %v7302_v33, 9  ;;  %v7310_v33 = vld [vmem:[%s8686_s12 + $0x38] sm:$0x1] }
 0x3f0   : > { %v10865_v31 = vadd.f32 %v7915_v14, %v6240_v32  ;;  %v7856_v43 = vpop.f32.mrb[131].mxu1 }
 0x3f1   : > { %v6245_v2 = vadd.f32 %v7854_v26, %v10827_v54  ;;  %v7857_v45 = vadd.f32 %v7856_v43, %v7855_v35  ;;  %v6565_v26 = vrot.slane %v7303_v20, 5  ;;  %v6574_v43 = vrot.slane %v6572_v34, 4 }
 0x3f2   : > { %v7916_v10 = vpop.f32.mrb[148].mxu0 }
 0x3f3   : > { %v6248_v7 = vadd.f32 %v7857_v45, %v10829_v44  ;;  %v7917_v25 = vpop.f32.mrb[149].mxu0 }
 0x3f4   : > { %v7918_v47 = vadd.f32 %v7917_v25, %v7916_v10  ;;  %v7919_v29 = vpop.f32.mrb[150].mxu0  ;;  %v6575_v10 = vrot.slane %v7307_v12, 5  ;;  %v6589_v12 = vrot.slane %v7313_v16, 5 }
 0x3f5   : > { %v7920_v42 = vpop.f32.mrb[151].mxu0  ;;  %v7858_v28 = vpop.f32.mrb[132].mxu1 }
 0x3f6   : > { %v7921_v46 = vadd.f32 %v7920_v42, %v7919_v29  ;;  %v7859_v53 = vpop.f32.mrb[133].mxu1  ;;  %v10869_v38 = vadd.f32 %v7918_v47, %v6245_v2  ;;  %v7311_v29 = vld [vmem:[%s8686_s12 + $0x3c] sm:$0xe] }
 0x3f7   : > { %v7860_v21 = vadd.f32 %v7859_v53, %v7858_v28  ;;  %v7861_v22 = vpop.f32.mrb[134].mxu1  ;;  %v10899_v53 = vsel %vm8702_vm4, %v7326_v50, %v6565_v26  ;;  %v10930_v50 = vld [vmem:[%s11109_s6] ss:$0 sm:$0xff] }
 0x3f8   : > { %v7862_v30 = vpop.f32.mrb[135].mxu1  ;;  %v10871_v36 = vadd.f32 %v7921_v46, %v6248_v7  ;;  %v7312_v7 = vld [vmem:[%s8686_s12 + $0x40] sm:$0xf]  ;;  %v10895_v46 = vsel %vm8702_vm4, %v7327_v11, %v6572_v34  ;;  %v7318_v11 = vld [vmem:[%s8686_s12 + $0x58] sm:$0xf] }
 0x3f9   : > { %v6253_v54 = vadd.f32 %v7860_v21, %v10831_v17  ;;  %v7863_v40 = vadd.f32 %v7862_v30, %v7861_v22  ;;  %v6567_v21 = vrot.slane %v6565_v26, 4  ;;  %v7308_v22 = vld [vmem:[%s8686_s12 + $0x30] sm:$0xe]  ;;  %v7309_v30 = vld [vmem:[%s8686_s12 + $0x34] sm:$0xf] }
 0x3fa   : > { %v7922_v19 = vpop.f32.mrb[152].mxu0 }
 0x3fb   : > { %v6256_v44 = vadd.f32 %v7863_v40, %v10833_v0  ;;  %v7923_v59 = vpop.f32.mrb[153].mxu0 }
 0x3fc   : > { %v7924_v51 = vadd.f32 %v7923_v59, %v7922_v19  ;;  %v7925_v39 = vpop.f32.mrb[154].mxu0  ;;  %v6586_v59 = vrot.slane %v7312_v7, 5 }
 0x3fd   : > { %v7926_v57 = vpop.f32.mrb[155].mxu0 }
 0x3fe   : > { %v7927_v8 = vadd.f32 %v7926_v57, %v7925_v39  ;;  %v10875_v9 = vadd.f32 %v7924_v51, %v6253_v54  ;;  %v6576_v39 = vsel %vm8702_vm4, %v6574_v43, %v6575_v10  ;;  %v7329_v57 = vrot.slane %v7311_v29, 9  ;;  %v7315_v29 = vld [vmem:[%s8686_s12 + $0x4c] sm:$0xf] }
 0x3ff   : > { %v7864_v24 = vpop.f32.mrb[136].mxu1  ;;  %v6588_v34 = vrot.slane %v6586_v59, 4 }
 0x400   : > { %v7865_v3 = vpop.f32.mrb[137].mxu1  ;;  %v10877_v6 = vadd.f32 %v7927_v8, %v6256_v44 }
 0x401   : > { %v7866_v17 = vadd.f32 %v7865_v3, %v7864_v24  ;;  %v7867_v61 = vpop.f32.mrb[138].mxu1 }
 0x402   : > { %v7868_v13 = vpop.f32.mrb[139].mxu1 }
 0x403   : > { %v6261_v0 = vadd.f32 %v7866_v17, %v10835_v37  ;;  %v7869_v15 = vadd.f32 %v7868_v13, %v7867_v61  ;;  %v7328_v17 = vrot.slane %v7308_v22, 9  ;;  %v6579_v61 = vrot.slane %v7309_v30, 5 }
 0x404   : > { %v7928_v41 = vpop.f32.mrb[156].mxu0 }
 0x405   : > { %v6264_v32 = vadd.f32 %v7869_v15, %v10837_v55  ;;  %v7929_v58 = vpop.f32.mrb[157].mxu0  ;;  %v7304_v55 = vld [vmem:[%s8686_s12 + $0x20] sm:$0x1] }
 0x406   : > { %v7930_v62 = vadd.f32 %v7929_v58, %v7928_v41  ;;  %v7931_v5 = vpop.f32.mrb[158].mxu0  ;;  %v6568_v44 = vrot.slane %v7304_v55, 5  ;;  %v10913_v41 = vld [vmem:[%s11108_s5] ss:$0 sm:$0xff] }
 0x407   : > { %v7932_v14 = vpop.f32.mrb[159].mxu0 }
 0x408   : > { %v7933_v37 = vadd.f32 %v7932_v14, %v7931_v5  ;;  %v7870_v35 = vpop.f32.mrb[140].mxu1  ;;  %v10886_v2 = vadd.f32 %v7930_v62, %v6261_v0  ;;  %v6635_v0 = vunpack.c.l.bf16 %v10899_v53  ;;  %v6638_v62 = vunpack.c.l.bf16 %v6576_v39  ;;  %v7317_v14 = vld [vmem:[%s8686_s12 + $0x54] sm:$0xe] }
 0x409   : > { %v7871_v45 = vpop.f32.mrb[141].mxu1  ;;  %v10923_v5 = vsel %vm8702_vm4, %v7329_v57, %v6586_v59  ;;  %v6600_v53 = vrot.slane %v7318_v11, 5  ;;  %v7319_v59 = vld [vmem:[%s8686_s12 + $0x5c] sm:$0x1]  ;;  %v6590_v39 = vsel %vm8702_vm4, %v6588_v34, %v6589_v12 }
 0x40a   : > { %v7872_v25 = vadd.f32 %v7871_v45, %v7870_v35  ;;  %v7873_v47 = vpop.f32.mrb[142].mxu1  ;;  %v10891_v42 = vadd.f32 %v7933_v37, %v6264_v32  ;;  %v6581_v35 = vrot.slane %v6579_v61, 4  ;;  %v6641_v30 = vunpack.c.l.bf16 %v10923_v5 }
 0x40b   : > { %v7874_v28 = vpop.f32.mrb[143].mxu1 }
 0x40c   : > { %v6269_v54 = vadd.f32 %v7872_v25, %v10839_v27  ;;  %v7875_v19 = vadd.f32 %v7874_v28, %v7873_v47  ;;  %v6637_v27 = vunpack.c.l.bf16 %v10895_v46  ;;  %v6582_v25 = vrot.slane %v7310_v33, 5  ;;  %v7314_v47 = vld [vmem:[%s8686_s12 + $0x48] sm:$0xe] }
 0x40d   : > { %v7934_v40 = vpop.f32.mrb[160].mxu0  ;;  %v7331_v46 = vrot.slane %v7317_v14, 9 }
 0x40e   : > { %v7935_v51 = vpop.f32.mrb[161].mxu0  ;;  %v6272_v8 = vadd.f32 %v7875_v19, %v10841_v49  ;;  %v6569_v49 = vsel %vm8702_vm4, %v6567_v21, %v6568_v44  ;;  %v7330_v19 = vrot.slane %v7314_v47, 9  ;;  %v6593_v44 = vrot.slane %v7315_v29, 5  ;;  %v7324_v47 = vld [vmem:[%s8686_s12 + $0x70] sm:$0xf] }
 0x40f   : > { %v7936_v24 = vadd.f32 %v7935_v51, %v7934_v40  ;;  %v7937_v3 = vpop.f32.mrb[162].mxu0  ;;  %v6636_v7 = vunpack.c.l.bf16 %v6569_v49  ;;  %v6583_v57 = vsel %vm8702_vm4, %v6581_v35, %v6582_v25  ;;  %v7316_v49 = vld [vmem:[%s8686_s12 + $0x50] sm:$0x1] }
 0x410   : > { %v7938_v13 = vpop.f32.mrb[163].mxu0  ;;  %v8010_v18 = vpop.f32.mrb[144].mxu1  ;;  %v6595_v14 = vrot.slane %v6593_v44, 4 }
 0x411   : > { %v7939_v15 = vadd.f32 %v7938_v13, %v7937_v3  ;;  %v10918_v20 = vadd.f32 %v7936_v24, %v6269_v54  ;;  %v6415_v32 = vadd.f32 %v8010_v18, %v10851_v1  ;;  %v6406_v58 = vpop.f32.mrb[145].mxu1  ;;  %v10935_v1 = vsel %vm8702_vm4, %v7328_v17, %v6579_v61 }
 0x412   : > { %v6407_v26 = vadd.f32 %v6406_v58, %v10845_v48  ;;  %v8011_v37 = vpop.f32.mrb[146].mxu1  ;;  %v10960_v17 = vsel %vm8702_vm4, %v7331_v46, %v6600_v53  ;;  %v6602_v61 = vrot.slane %v6600_v53, 4  ;;  %v6603_v18 = vrot.slane %v7319_v59, 5 }
 0x413   : > { %v10937_v43 = vadd.f32 %v7939_v15, %v6272_v8  ;;  %v6478_v45 = vmul.f32 %v10913_v41, %v6415_v32  ;;  %v6418_v10 = vadd.f32 %v8011_v37, %v10853_v23  ;;  %v6409_v55 = vpop.f32.mrb[147].mxu1  ;;  %v6639_v23 = vunpack.c.l.bf16 %v10935_v1 }
 0x414   : > { %v6476_v48 = vmul.f32 %v10913_v41, %v6407_v26  ;;  %v6410_v28 = vadd.f32 %v6409_v55, %v10847_v63  ;;  %v10967_v58 = vsel %vm8702_vm4, %v7330_v19, %v6593_v44  ;;  %v6596_v37 = vrot.slane %v7316_v49, 5  ;;  %v7322_v49 = vld [vmem:[%s8686_s12 + $0x68] sm:$0x1] }
 0x415   : > { %v6501_v21 = vadd.f32 %v10930_v50, %v6478_v45  ;;  %v6479_v22 = vmul.f32 %v10913_v41, %v6418_v10  ;;  %v6642_v45 = vunpack.c.l.bf16 %v6590_v39  ;;  %v7323_v10 = vld [vmem:[%s8686_s12 + $0x6c] sm:$0xe]  ;;  %v6645_v25 = vunpack.c.l.bf16 %v10960_v17 }
 0x416   : > { %v6499_v54 = vadd.f32 %v10930_v50, %v6476_v48  ;;  %v6477_v40 = vmul.f32 %v10913_v41, %v6410_v28  ;;  %v6643_v48 = vunpack.c.l.bf16 %v10967_v58  ;;  %v6604_v28 = vsel %vm8702_vm4, %v6602_v61, %v6603_v18 }
 0x417   : > { %v6653_v51 = vadd.f32 %v6637_v27, %v6501_v21  ;;  %v6502_v63 = vadd.f32 %v10930_v50, %v6479_v22  ;;  %v6597_v22 = vsel %vm8702_vm4, %v6595_v14, %v6596_v37  ;;  %v6610_v14 = vrot.slane %v7322_v49, 5 }
 0x418   : > { %v6651_v8 = vadd.f32 %v6635_v0, %v6499_v54  ;;  %v6500_v24 = vadd.f32 %v10930_v50, %v6477_v40  ;;  %v8014_v3 = vpop.f32.mrb[148].mxu1  ;;  %v7333_v54 = vrot.slane %v7323_v10, 9  ;;  %v7321_v40 = vld [vmem:[%s8686_s12 + $0x64] sm:$0xf]  ;;  %v6644_v18 = vunpack.c.l.bf16 %v6597_v22 }
 0x419   : > { %v6669_v16 = vmax.f32 %v6653_v51, 0.0  ;;  %v6654_v13 = vadd.f32 %v6638_v62, %v6502_v63  ;;  %v6431_v27 = vadd.f32 %v8014_v3, %v10863_v4  ;;  %v6422_v15 = vpop.f32.mrb[149].mxu1  ;;  %v6614_v51 = vrot.slane %v7324_v47, 5 }
 0x41a   : > { %v6667_v34 = vmax.f32 %v6651_v8, 0.0  ;;  %v6652_v0 = vadd.f32 %v6636_v7, %v6500_v24  ;;  %v6423_v33 = vadd.f32 %v6422_v15, %v10857_v60  ;;  %v8015_v32 = vpop.f32.mrb[150].mxu1  ;;  %v6640_v7 = vunpack.c.l.bf16 %v6583_v57  ;;  %v7320_v24 = vld [vmem:[%s8686_s12 + $0x60] sm:$0xe] }
 0x41b   : > { %6685 = vst [vmem:[%s10244_s13 + $0x10] sm:$0xff] %v6669_v16  ;;  %v6670_v62 = vmax.f32 %v6654_v13, 0.0  ;;  %v6482_v5 = vmul.f32 %v10913_v41, %v6431_v27  ;;  %v6434_v4 = vadd.f32 %v8015_v32, %v10865_v31  ;;  %v6425_v12 = vpop.f32.mrb[151].mxu1  ;;  %v6646_v8 = vunpack.c.l.bf16 %v6604_v28  ;;  %v7325_v13 = vld [vmem:[%s8686_s12 + $0x74] sm:$0x1]  ;;  %s7361_s12 = sshll.u32 %s8411_s27, 4 }
 0x41c   : > { %6683 = vst [vmem:[%s10244_s13] sm:$0xff] %v6667_v34  ;;  %v6668_v11 = vmax.f32 %v6652_v0, 0.0  ;;  %v6480_v60 = vmul.f32 %v10913_v41, %v6423_v33  ;;  %v6426_v26 = vadd.f32 %v6425_v12, %v10859_v56  ;;  %v6607_v16 = vrot.slane %v7321_v40, 5  ;;  %s6713_s27 = sadd.s32 %s7361_s12, %s7337_s17  ;;  %s8335_s12 = scalar_lea.vmem %s8334_s14, 4096 }
 0x41d   : > { %6686 = vst [vmem:[%s10244_s13 + $0x18] sm:$0xff] %v6670_v62  ;;  %v6505_v1 = vadd.f32 %v10930_v50, %v6482_v5  ;;  %v6483_v35 = vmul.f32 %v10913_v41, %v6434_v4  ;;  %v6615_v33 = vsel %vm8702_vm4, %v7333_v54, %v6614_v51  ;;  %v6616_v62 = vrot.slane %v6614_v51, 4  ;;  %s7338_s28 = sshll.u32 %s6713_s27, 7  ;;  %p8337_p7 = scmp.lt.s32.totalorder %s8335_s12, %s8329_s11 }
 0x41e   : > { %6684 = vst [vmem:[%s10244_s13 + $0x8] sm:$0xff] %v6668_v11  ;;  %v6503_v31 = vadd.f32 %v10930_v50, %v6480_v60  ;;  %v6481_v55 = vmul.f32 %v10913_v41, %v6426_v26  ;;  %v6617_v5 = vrot.slane %v7325_v13, 5  ;;  %v6609_v12 = vrot.slane %v6607_v16, 4  ;;  %s11042_s10 = scalar_lea.hbm %s11110_s7, %s7338_s28 }
 0x41f   : > { %v6657_v29 = vadd.f32 %v6641_v30, %v6505_v1  ;;  %v6506_v56 = vadd.f32 %v10930_v50, %v6483_v35  ;;  %v6649_v37 = vunpack.c.l.bf16 %v6615_v33  ;;  %p8338_p9 = por %p8337_p7, %p8336_p6 }
 0x420   : > { %v6655_v46 = vadd.f32 %v6639_v23, %v6503_v31  ;;  %v6504_v53 = vadd.f32 %v10930_v50, %v6481_v55  ;;  %v8018_v21 = vpop.f32.mrb[152].mxu1 }
 0x421   : > { %v6673_v19 = vmax.f32 %v6657_v29, 0.0  ;;  %v6658_v30 = vadd.f32 %v6642_v45, %v6506_v56  ;;  %v6447_v44 = vadd.f32 %v8018_v21, %v10875_v9  ;;  %v6438_v59 = vpop.f32.mrb[153].mxu1  ;;  %v6618_v29 = vsel %vm8702_vm4, %v6616_v62, %v6617_v5  ;;  %p8339_p11 = pnand %p8338_p9, %p8332_p5 }
 0x422   : > { %v6671_v63 = vmax.f32 %v6655_v46, 0.0  ;;  %v6656_v23 = vadd.f32 %v6640_v7, %v6504_v53  ;;  %v6439_v39 = vadd.f32 %v6438_v59, %v10869_v38  ;;  %v8019_v57 = vpop.f32.mrb[154].mxu1  ;;  %v6611_v46 = vsel %vm8702_vm4, %v6609_v12, %v6610_v14 }
 0x423   : > { %6689 = vst [vmem:[%s10244_s13 + $0x30] sm:$0xff] %v6673_v19  ;;  %v6674_v3 = vmax.f32 %v6658_v30, 0.0  ;;  %v6486_v17 = vmul.f32 %v10913_v41, %v6447_v44  ;;  %v6450_v61 = vadd.f32 %v8019_v57, %v10877_v6  ;;  %v6441_v9 = vpop.f32.mrb[155].mxu1  ;;  %v7332_v6 = vrot.slane %v7320_v24, 9 }
 0x424   : > { %6687 = vst [vmem:[%s10244_s13 + $0x20] sm:$0xff] %v6671_v63  ;;  %v6672_v27 = vmax.f32 %v6656_v23, 0.0  ;;  %v6484_v15 = vmul.f32 %v10913_v41, %v6439_v39  ;;  %v6442_v38 = vadd.f32 %v6441_v9, %v10871_v36  ;;  %v6650_v19 = vunpack.c.l.bf16 %v6618_v29 }
 0x425   : > { %6690 = vst [vmem:[%s10244_s13 + $0x38] sm:$0xff] %v6674_v3  ;;  %v6509_v34 = vadd.f32 %v10930_v50, %v6486_v17  ;;  %v6487_v0 = vmul.f32 %v10913_v41, %v6450_v61  ;;  %v6608_v31 = vsel %vm8702_vm4, %v7332_v6, %v6607_v16  ;;  %v6648_v30 = vunpack.c.l.bf16 %v6611_v46 }
 0x426   : > { %6688 = vst [vmem:[%s10244_s13 + $0x28] sm:$0xff] %v6672_v27  ;;  %v6507_v32 = vadd.f32 %v10930_v50, %v6484_v15  ;;  %v6485_v58 = vmul.f32 %v10913_v41, %v6442_v38  ;;  %v6647_v21 = vunpack.c.l.bf16 %v6608_v31 }
 0x427   : > { %v6661_v4 = vadd.f32 %v6645_v25, %v6509_v34  ;;  %v6510_v36 = vadd.f32 %v10930_v50, %v6487_v0 }
 0x428   : > { %v6659_v11 = vadd.f32 %v6643_v48, %v6507_v32  ;;  %v6508_v60 = vadd.f32 %v10930_v50, %v6485_v58  ;;  %v8022_v26 = vpop.f32.mrb[156].mxu1 }
 0x429   : > { %v6677_v1 = vmax.f32 %v6661_v4, 0.0  ;;  %v6662_v35 = vadd.f32 %v6646_v8, %v6510_v36  ;;  %v6463_v45 = vadd.f32 %v8022_v26, %v10918_v20  ;;  %v6454_v10 = vpop.f32.mrb[157].mxu1 }
 0x42a   : > { %v6675_v55 = vmax.f32 %v6659_v11, 0.0  ;;  %v6660_v7 = vadd.f32 %v6644_v18, %v6508_v60  ;;  %v6455_v25 = vadd.f32 %v6454_v10, %v10886_v2  ;;  %v8023_v47 = vpop.f32.mrb[158].mxu1 }
 0x42b   : > { %6693 = vst [vmem:[%s10244_s13 + $0x50] sm:$0xff] %v6677_v1  ;;  %v6678_v56 = vmax.f32 %v6662_v35, 0.0  ;;  %v6490_v20 = vmul.f32 %v10913_v41, %v6463_v45  ;;  %v6466_v48 = vadd.f32 %v8023_v47, %v10937_v43  ;;  %v6457_v28 = vpop.f32.mrb[159].mxu1 }
 0x42c   : > { %6691 = vst [vmem:[%s10244_s13 + $0x40] sm:$0xff] %v6675_v55  ;;  %v6676_v2 = vmax.f32 %v6660_v7, 0.0  ;;  %v6488_v53 = vmul.f32 %v10913_v41, %v6455_v25  ;;  %v6458_v22 = vadd.f32 %v6457_v28, %v10891_v42 }
 0x42d   : > { %6694 = vst [vmem:[%s10244_s13 + $0x58] sm:$0xff] %v6678_v56  ;;  %v6513_v54 = vadd.f32 %v10930_v50, %v6490_v20  ;;  %v6491_v40 = vmul.f32 %v10913_v41, %v6466_v48 }
 0x42e   : > { %6692 = vst [vmem:[%s10244_s13 + $0x48] sm:$0xff] %v6676_v2  ;;  %v6511_v52 = vadd.f32 %v10930_v50, %v6488_v53  ;;  %v6489_v43 = vmul.f32 %v10913_v41, %v6458_v22 }
 0x42f   : > { %v6665_v44 = vadd.f32 %v6649_v37, %v6513_v54  ;;  %v6514_v59 = vadd.f32 %v10930_v50, %v6491_v40 }
 0x430   : > { %v6663_v42 = vadd.f32 %v6647_v21, %v6511_v52  ;;  %v6512_v51 = vadd.f32 %v10930_v50, %v6489_v43 }
 0x431   : > { %v6681_v63 = vmax.f32 %v6665_v44, 0.0  ;;  %v6666_v23 = vadd.f32 %v6650_v19, %v6514_v59 }
 0x432   : > { %v6679_v39 = vmax.f32 %v6663_v42, 0.0  ;;  %v6664_v57 = vadd.f32 %v6648_v30, %v6512_v51 }
 0x433   : > { %6697 = vst [vmem:[%s10244_s13 + $0x70] sm:$0xff] %v6681_v63  ;;  %v6682_v41 = vmax.f32 %v6666_v23, 0.0 }
 0x434   : > { %6695 = vst [vmem:[%s10244_s13 + $0x60] sm:$0xff] %v6679_v39  ;;  %v6680_v50 = vmax.f32 %v6664_v57, 0.0 }
 0x435   : > { %6698 = vst [vmem:[%s10244_s13 + $0x78] sm:$0xff] %v6682_v41 }
 0x436   : > { %6696 = vst [vmem:[%s10244_s13 + $0x68] sm:$0xff] %v6680_v50 }
 0x437   : > { %8342 = shalt.err (!%p8339_p11)
}
 0x438   : > { %s8343_s13 = scalar_lea.hbm %s11042_s10, 2048  ;;  %s8347_s28 = scalar_lea.hbm %s11110_s7, 8192 }
 0x439   : > { %p8344_p13 = scmp.ne.s32.totalorder %s11042_s10, %s8343_s13  ;;  %p8348_p3 = scmp.lt.u32.totalorder %s11042_s10, %s11110_s7 }
 0x43a   : > { %p8349_p8 = scmp.lt.u32.totalorder %s8347_s28, %s8343_s13  ;;  %p8351_p12 = scmp.lt.u32.totalorder %s8343_s13, %s11042_s10 }
 0x43b   : > { %p8345_p1 = pnand %p8344_p13, %p11206_p0 }
 0x43c   : > { %p8350_p10 = por %p8349_p8, %p8348_p3 }
 0x43d   : > { %p8346_p4 = pneg %p8345_p1 }
 0x43e   : > { %p8352_p2 = por %p8351_p12, %p8350_p10 }
 0x440   : > { %p8353_p5 = pnand %p8352_p2, %p8346_p4 }
 0x442   : > { %8356 = shalt.err (!%p8353_p5)
}
 0x443   : > { %s8435_s23 = smov 128   ;;  %s8436_s11 = smov 8  }
 0x444   : > { %8029 = dma.vmem_to_hbm [thread:$0]  (%p11206_p0), %s11044_s18, 2048, %s11042_s10, %s11051_s9, %s8435_s23, %s8435_s23, %s8436_s11  }
 0x445 PF: > { %p8041_p6 = scmp.ge.s32.totalorder %s8427_s8, 2  ;;  %s6731_s20 = sand.u32 1, %s8399_s24  }
 0x446   : > { %p11207_p7 = scmp.ne.s32.totalorder %s11143_s16, 0  ;;  %s6732_s14 = scalar_lea.sflag [#allocation5], %s6731_s20 }
 0x448   : > { %p8036_p9 = pnand %p8041_p6, %p11207_p7 }
 0x44a   : > { %8394 = dma.done.wait (!%p8036_p9), %s6732_s14, 2048  }
 0x44b   : > { %8396 = vsyncadd (!%p8036_p9), %s6732_s14, 4294965248  ;;  %s21_s8 = sadd.s32 1, %s8427_s8   ;;  %s11208_s15 = sld [smem:[#allocation9_spill]] }
 0x44c   : > { %p18_p11 = scmp.ge.s32.totalorder %s21_s8, 6   ;;  %s11209_s18 = sld [smem:[#allocation10_spill]] }
 0x44d   : > { %s11210_s24 = smov %s8403_s25  ;;  %s11211_s25 = smov %s8407_s26 }
 0x44e   : > { %s11212_s26 = smov %s8556_s21  ;;  %s11213_s27 = smov %s8419_s29 }
 0x44f   : > { %s11214_s28 = smov %s8423_s30  ;;  %20 = sbr.rel (!%p18_p11) target bundleno = 6 (0x6), region = 101 }
 0x451   : > { %s11215_s29 = smov %s11208_s15 }
 0x452   : > { %s11216_s30 = smov %s11209_s18 }
 0x456   :  { %6737 = vsyncpa [#allocation4], 1 }
 0x457   :  { %6739 = vsyncpa [#allocation4 + $0x1], 1 }
 0x458   :  { %6740 = vsyncpa [#allocation5], 1 }
 0x459   :  { %6742 = vsyncpa [#allocation5 + $0x1], 1 }

</bundles_post_ra>
